<compile_context>
chip_gen: v7x
topology: tpu7x:2x2x1
jax: 0.10.0
libtpu: 0.0.40
codegen_flags: <defaults>
</compile_context>

<pallas_src>
import jax
import jax.numpy as jnp
import numpy as np
from jax import lax
from jax.experimental import pallas as pl
from jax.experimental.pallas import tpu as pltpu


def _round_up(x, m):
    return (x + m - 1) // m * m


def _make_decoder_kernel(T, chunk, Hp, Vp):
    """Builds the chunked decode kernel (T, chunk, Hp, Vp baked in)."""

    def kernel(toks_ref,                 # SMEM (Tp,) int32 (scalar prefetch)
               emb_ref,                  # VMEM (Vr, Hp) f32  (resident)
               h0_ref,                   # VMEM (1, Hp) f32
               wg_ref,                   # VMEM (2Hp, 4Hp) bf16 (fused gates)
               bg_ref,                   # VMEM (1, 4Hp) f32
               wo_ref,                   # VMEM (Hp, Vp) bf16
               bo_ref,                   # VMEM (1, Vp) f32
               logp_ref,                 # VMEM out (chunk, Vp) f32
               hlast_ref,                # VMEM out (1, Hp) f32
               h_carry,                  # VMEM scratch (1, Hp) f32
               xh_buf):                  # VMEM scratch (1, 2Hp) f32
        c = pl.program_id(0)

        @pl.when(c == 0)
        def _():
            h_carry[...] = h0_ref[...]

        base = c * chunk

        def step(i, h):
            tok = toks_ref[base + i]
            # Embedding row gather (VMEM dynamic slice) + ReLU.
            x = jnp.maximum(emb_ref[pl.ds(tok, 1), :], 0.0)       # (1, Hp) f32

            # Pack [x, h] and run ONE fused gate matmul on the MXU.
            xh_buf[:, 0:Hp] = x
            xh_buf[:, Hp:2 * Hp] = h
            g = jnp.dot(xh_buf[...].astype(jnp.bfloat16), wg_ref[...],
                        preferred_element_type=jnp.float32) + bg_ref[...]

            # PyTorch nn.GRU semantics (gate order r, z, n).
            r = jax.nn.sigmoid(g[:, 0:Hp])
            z = jax.nn.sigmoid(g[:, Hp:2 * Hp])
            n = jnp.tanh(g[:, 2 * Hp:3 * Hp] + r * g[:, 3 * Hp:4 * Hp])
            h_new = (1.0 - z) * n + z * h

            # Do not advance the recurrence on padded trailing steps.
            valid = ((base + i) < T).astype(jnp.float32)
            h_new = valid * h_new + (1.0 - valid) * h

            # Output projection + numerically stable log-softmax.
            logits = jnp.dot(h_new.astype(jnp.bfloat16), wo_ref[...],
                             preferred_element_type=jnp.float32) + bo_ref[...]
            m = jnp.max(logits, axis=-1, keepdims=True)
            s = logits - m
            lse = jnp.log(jnp.sum(jnp.exp(s), axis=-1, keepdims=True))
            logp_ref[pl.ds(i, 1), :] = s - lse
            return h_new

        h_final = lax.fori_loop(0, chunk, step, h_carry[...], unroll=True)
        h_carry[...] = h_final

        @pl.when(c == pl.num_programs(0) - 1)
        def _():
            hlast_ref[...] = h_final

    return kernel


def decode(tokens, hidden, pp):
    """Fused T-step greedy-feed decode.

    tokens: (T,) int32, hidden: (1,1,H).  Returns (logp (T,V), hidden (1,1,H)).
    """
    H, V, Hp, Vp, Vr = pp["H"], pp["V"], pp["Hp"], pp["Vp"], pp["Vr"]
    toks = jnp.clip(jnp.asarray(tokens, jnp.int32).reshape(-1), 0, V - 1)
    T = int(toks.shape[0])

    chunk = min(32, _round_up(max(T, 1), 8))      # 8..32 tokens per grid step
    Tp = _round_up(T, chunk)
    n_chunks = Tp // chunk
    toks_p = jnp.zeros((Tp,), jnp.int32).at[:T].set(toks)

    h0 = jnp.zeros((1, Hp), jnp.float32).at[:, :H].set(
        jnp.asarray(hidden, jnp.float32).reshape(1, H))

    kernel = _make_decoder_kernel(T, chunk, Hp, Vp)

    grid_spec = pltpu.PrefetchScalarGridSpec(
        num_scalar_prefetch=1,
        grid=(n_chunks,),
        in_specs=[
            pl.BlockSpec((Vr, Hp), lambda c, toks: (0, 0)),          # emb (resident)
            pl.BlockSpec((1, Hp), lambda c, toks: (0, 0)),           # h0
            pl.BlockSpec((2 * Hp, 4 * Hp), lambda c, toks: (0, 0)),  # fused W_gate
            pl.BlockSpec((1, 4 * Hp), lambda c, toks: (0, 0)),       # fused b_gate
            pl.BlockSpec((Hp, Vp), lambda c, toks: (0, 0)),          # W_out^T
            pl.BlockSpec((1, Vp), lambda c, toks: (0, 0)),           # b_out
        ],
        out_specs=(
            pl.BlockSpec((chunk, Vp), lambda c, toks: (c, 0)),       # per-chunk logp slab
            pl.BlockSpec((1, Hp), lambda c, toks: (0, 0)),           # final hidden
        ),
        scratch_shapes=[
            pltpu.VMEM((1, Hp), jnp.float32),       # hidden-state carry
            pltpu.VMEM((1, 2 * Hp), jnp.float32),   # packed [x, h] staging row
        ],
    )

    # Explicit VMEM budget (inputs x2 buffers + out blocks x2 + scratch), with headroom.
    in_bytes = sum(int(a.size) * a.dtype.itemsize
                   for a in (pp["emb"], pp["w_gate"], pp["b_gate"],
                             pp["w_out"], pp["b_out"])) + int(h0.size) * 4
    out_bytes = chunk * Vp * 4 + Hp * 4
    scratch_bytes = Hp * 4 + 2 * Hp * 4
    budget = 2 * (in_bytes + out_bytes) + scratch_bytes
    vmem_limit = int(max(1 << 20, min(100 << 20, int(budget * 1.5) + (1 << 20))))

    logp_p, h_last = pl.pallas_call(
        kernel,
        out_shape=(jax.ShapeDtypeStruct((Tp, Vp), jnp.float32),
                   jax.ShapeDtypeStruct((1, Hp), jnp.float32)),
        grid_spec=grid_spec,
        compiler_params=pltpu.CompilerParams(
            dimension_semantics=("arbitrary",),      # sequential recurrence over chunks
            vmem_limit_bytes=vmem_limit),
    )(toks_p, pp["emb"], h0, pp["w_gate"], pp["b_gate"], pp["w_out"], pp["b_out"])

    return logp_p[:T, :V], h_last[:, :H].reshape(1, 1, H)


def decoder_forward(token, hidden, pp):
    """Single step — matches PyTorch Decoder.forward(input, hidden)."""
    logp, h_new = decode(jnp.asarray(token, jnp.int32).reshape(1), hidden, pp)
    return logp, h_new                               # (1, V), (1, 1, H)


def decode_reference(tokens, hidden, pp):
    """Pure-JAX reference mirroring the PyTorch forward on the same bf16 params."""
    H, V, Hp = pp["H"], pp["V"], pp["Hp"]
    toks = jnp.clip(jnp.asarray(tokens, jnp.int32).reshape(-1), 0, V - 1)
    h = jnp.zeros((1, Hp), jnp.float32).at[:, :H].set(
        jnp.asarray(hidden, jnp.float32).reshape(1, H))
    logps = []
    for i in range(int(toks.shape[0])):
        x = jnp.maximum(pp["emb"][toks[i]].reshape(1, Hp), 0.0)
        gi = jnp.dot(x.astype(jnp.bfloat16), pp["ref_w_ih"],
                     preferred_element_type=jnp.float32) + pp["ref_b_ih"]
        gh = jnp.dot(h.astype(jnp.bfloat16), pp["ref_w_hh"],
                     preferred_element_type=jnp.float32) + pp["ref_b_hh"]
        r = jax.nn.sigmoid(gi[:, :Hp] + gh[:, :Hp])
        z = jax.nn.sigmoid(gi[:, Hp:2 * Hp] + gh[:, Hp:2 * Hp])
        n = jnp.tanh(gi[:, 2 * Hp:] + r * gh[:, 2 * Hp:])
        h = (1.0 - z) * n + z * h
        logits = jnp.dot(h.astype(jnp.bfloat16), pp["w_out"],
                         preferred_element_type=jnp.float32) + pp["b_out"]
        m = jnp.max(logits, axis=-1, keepdims=True)
        s = logits - m
        logps.append(s - jnp.log(jnp.sum(jnp.exp(s), axis=-1, keepdims=True)))
    return jnp.concatenate(logps, axis=0)[:, :V], h[:, :H].reshape(1, 1, H)


def init_params(key, hidden_size, output_size):
    """Deterministic init matching PyTorch module parameter shapes (f32)."""
    H, V = hidden_size, output_size
    ks = jax.random.split(key, 7)
    k = 1.0 / np.sqrt(H)
    u = lambda kk, shape: jax.random.uniform(kk, shape, jnp.float32, -k, k)
    return {
        "emb":   jax.random.normal(ks[0], (V, H), jnp.float32),  # nn.Embedding: N(0,1)
        "w_ih":  u(ks[1], (3 * H, H)),
        "w_hh":  u(ks[2], (3 * H, H)),
        "b_ih":  u(ks[3], (3 * H,)),
        "b_hh":  u(ks[4], (3 * H,)),
        "w_out": u(ks[5], (V, H)),
        "b_out": u(ks[6], (V,)),
    }


def prepare_params(params, hidden_size, output_size):
    """One-time transpose + lane-pad + gate fusion + bf16 cast (out of hot path)."""
    H, V = hidden_size, output_size
    Hp = _round_up(H, 128)
    Vp = _round_up(V, 128)
    Vr = _round_up(V, 8)

    emb = jnp.zeros((Vr, Hp), jnp.float32).at[:V, :H].set(params["emb"])

    # Per-gate padded, transposed blocks (PyTorch gate order r, z, n).
    wih_g, whh_g, bih_g, bhh_g = [], [], [], []
    for g in range(3):
        wih_g.append(jnp.zeros((Hp, Hp), jnp.float32)
                     .at[:H, :H].set(params["w_ih"][g * H:(g + 1) * H, :].T))
        whh_g.append(jnp.zeros((Hp, Hp), jnp.float32)
                     .at[:H, :H].set(params["w_hh"][g * H:(g + 1) * H, :].T))
        bih_g.append(jnp.zeros((Hp,), jnp.float32)
                     .at[:H].set(params["b_ih"][g * H:(g + 1) * H]))
        bhh_g.append(jnp.zeros((Hp,), jnp.float32)
                     .at[:H].set(params["b_hh"][g * H:(g + 1) * H]))

    # Fused gate matrix:  [x, h] (1,2Hp) @ w_gate (2Hp,4Hp)
    #   columns = [r_pre | z_pre | gi_n | gh_n], single fused bias.
    zero = jnp.zeros((Hp, Hp), jnp.float32)
    top = jnp.concatenate([wih_g[0], wih_g[1], wih_g[2], zero], axis=1)      # x rows
    bot = jnp.concatenate([whh_g[0], whh_g[1], zero,     whh_g[2]], axis=1)  # h rows
    w_gate = jnp.concatenate([top, bot], axis=0)                             # (2Hp, 4Hp)
    b_gate = jnp.concatenate([bih_g[0] + bhh_g[0], bih_g[1] + bhh_g[1],
                              bih_g[2], bhh_g[2]]).reshape(1, 4 * Hp)

    w_out = jnp.zeros((Hp, Vp), jnp.float32).at[:H, :V].set(params["w_out"].T)
    b_out = jnp.full((1, Vp), -1e30, jnp.float32).at[0, :V].set(params["b_out"])

    # Unfused padded copies, only for the pure-JAX reference.
    w_ih = jnp.concatenate(wih_g, axis=1)
    w_hh = jnp.concatenate(whh_g, axis=1)
    b_ih = jnp.concatenate(bih_g).reshape(1, 3 * Hp)
    b_hh = jnp.concatenate(bhh_g).reshape(1, 3 * Hp)

    return {
        "H": H, "V": V, "Hp": Hp, "Vp": Vp, "Vr": Vr,
        "emb": emb,                                   # f32, VMEM-resident gather
        "w_gate": w_gate.astype(jnp.bfloat16),
        "b_gate": b_gate,
        "w_out": w_out.astype(jnp.bfloat16),
        "b_out": b_out,
        "ref_w_ih": w_ih.astype(jnp.bfloat16),
        "ref_w_hh": w_hh.astype(jnp.bfloat16),
        "ref_b_ih": b_ih, "ref_b_hh": b_hh,
    }


if __name__ == "__main__":
    hidden_size, output_size, T = 32, 16, 6

    key = jax.random.PRNGKey(0)
    kp, kh, kt = jax.random.split(key, 3)

    raw = init_params(kp, hidden_size, output_size)
    pp = prepare_params(raw, hidden_size, output_size)

    hidden = jax.random.normal(kh, (1, 1, hidden_size), jnp.float32)
    tokens = jax.random.randint(kt, (T,), 0, output_size, jnp.int32)

    # Fused multi-step decode: one pallas_call, one chunk per grid step.
    logp, h_last = decode(tokens, hidden, pp)
    jax.block_until_ready((logp, h_last))

    logp_ref, h_ref = decode_reference(tokens, hidden, pp)
    assert logp.shape == (T, output_size) and h_last.shape == (1, 1, hidden_size)
    np.testing.assert_allclose(np.asarray(logp), np.asarray(logp_ref),
                               rtol=2e-2, atol=2e-2)
    np.testing.assert_allclose(np.asarray(h_last), np.asarray(h_ref),
                               rtol=2e-2, atol=2e-2)

    # Single-step call matching the PyTorch module's forward(input, hidden).
    logp1, h1 = decoder_forward(tokens[0], hidden, pp)
    jax.block_until_ready((logp1, h1))
    logp1_ref, h1_ref = decode_reference(tokens[:1], hidden, pp)
    assert logp1.shape == (1, output_size) and h1.shape == (1, 1, hidden_size)
    np.testing.assert_allclose(np.asarray(logp1), np.asarray(logp1_ref),
                               rtol=2e-2, atol=2e-2)
    np.testing.assert_allclose(np.asarray(h1), np.asarray(h1_ref),
                               rtol=2e-2, atol=2e-2)

    print("KERNEL_OK")
</pallas_src>

<mosaic_0001>
module attributes {stable_mosaic.version = 11 : i64} {
  func.func @kernel(%arg0: i32, %arg1: memref<8xi32, #tpu.memory_space<smem>>, %arg2: memref<16x128xf32, #tpu.memory_space<vmem>>, %arg3: memref<1x128xf32, #tpu.memory_space<vmem>>, %arg4: memref<256x512xbf16, #tpu.memory_space<vmem>>, %arg5: memref<1x512xf32, #tpu.memory_space<vmem>>, %arg6: memref<128x128xbf16, #tpu.memory_space<vmem>>, %arg7: memref<1x128xf32, #tpu.memory_space<vmem>>, %arg8: memref<8x128xf32, #tpu.memory_space<vmem>>, %arg9: memref<1x128xf32, #tpu.memory_space<vmem>>, %arg10: memref<1x128xf32, #tpu.memory_space<vmem>>, %arg11: memref<1x256xf32, #tpu.memory_space<vmem>>) attributes {dimension_semantics = [#tpu.dimension_semantics<arbitrary>], iteration_bounds = array<i64: 1>, scalar_prefetch = 1 : i64, scratch_operands = 2 : i64, tpu.core_type = #tpu.core_type<tc>, window_params = [{pipeline_mode = #tpu.pipeline_mode<synchronous>, transform_indices = @transform_0, window_bounds = array<i64: 16, 128>}, {pipeline_mode = #tpu.pipeline_mode<synchronous>, transform_indices = @transform_1, window_bounds = array<i64: 1, 128>}, {pipeline_mode = #tpu.pipeline_mode<synchronous>, transform_indices = @transform_2, window_bounds = array<i64: 256, 512>}, {pipeline_mode = #tpu.pipeline_mode<synchronous>, transform_indices = @transform_3, window_bounds = array<i64: 1, 512>}, {pipeline_mode = #tpu.pipeline_mode<synchronous>, transform_indices = @transform_4, window_bounds = array<i64: 128, 128>}, {pipeline_mode = #tpu.pipeline_mode<synchronous>, transform_indices = @transform_5, window_bounds = array<i64: 1, 128>}, {transform_indices = @transform_6, window_bounds = array<i64: 8, 128>}, {pipeline_mode = #tpu.pipeline_mode<synchronous>, transform_indices = @transform_7, window_bounds = array<i64: 1, 128>}]} {
    %c0_i32 = arith.constant 0 : i32
    %0 = arith.cmpi eq, %arg0, %c0_i32 : i32
    %1 = arith.extui %0 : i1 to i32
    %c0_i32_0 = arith.constant 0 : i32
    %2 = arith.cmpi ne, %1, %c0_i32_0 : i32
    scf.if %2 {
      %c0_214 = arith.constant 0 : index
      %c0_215 = arith.constant 0 : index
      %521 = vector.load %arg3[%c0_214, %c0_215] : memref<1x128xf32, #tpu.memory_space<vmem>>, vector<1x128xf32>
      %c0_216 = arith.constant 0 : index
      %c0_217 = arith.constant 0 : index
      %522 = vector.load %arg10[%c0_216, %c0_217] : memref<1x128xf32, #tpu.memory_space<vmem>>, vector<1x128xf32>
      tpu.vector_store %arg10[%c0_216, %c0_217], %521 {strides = array<i32>} : memref<1x128xf32, #tpu.memory_space<vmem>>, vector<1x128xf32>,
    } else {
    }
    %c8_i32 = arith.constant 8 : i32
    %3 = arith.muli %arg0, %c8_i32 : i32
    %c0 = arith.constant 0 : index
    %c0_1 = arith.constant 0 : index
    %4 = vector.load %arg10[%c0, %c0_1] : memref<1x128xf32, #tpu.memory_space<vmem>>, vector<1x128xf32>
    %c0_i32_2 = arith.constant 0 : i32
    %5 = arith.addi %3, %c0_i32_2 : i32
    %6 = arith.index_cast %5 : i32 to index
    %7 = memref.load %arg1[%6] : memref<8xi32, #tpu.memory_space<smem>>
    %8 = arith.index_cast %7 : i32 to index
    %c0_3 = arith.constant 0 : index
    %9 = vector.load %arg2[%8, %c0_3] : memref<16x128xf32, #tpu.memory_space<vmem>>, vector<1x128xf32>
    %cst = arith.constant 0.000000e+00 : f32
    %10 = vector.broadcast %cst : f32 to vector<1x128xf32>
    %11 = arith.maximumf %9, %10 : vector<1x128xf32>
    %c0_4 = arith.constant 0 : index
    %c0_5 = arith.constant 0 : index
    %12 = vector.load %arg11[%c0_4, %c0_5] : memref<1x256xf32, #tpu.memory_space<vmem>>, vector<1x128xf32>
    tpu.vector_store %arg11[%c0_4, %c0_5], %11 {strides = array<i32>} : memref<1x256xf32, #tpu.memory_space<vmem>>, vector<1x128xf32>,
    %c0_6 = arith.constant 0 : index
    %c128 = arith.constant 128 : index
    %13 = vector.load %arg11[%c0_6, %c128] : memref<1x256xf32, #tpu.memory_space<vmem>>, vector<1x128xf32>
    tpu.vector_store %arg11[%c0_6, %c128], %4 {strides = array<i32>} : memref<1x256xf32, #tpu.memory_space<vmem>>, vector<1x128xf32>,
    %c0_7 = arith.constant 0 : index
    %c0_8 = arith.constant 0 : index
    %14 = vector.load %arg11[%c0_7, %c0_8] : memref<1x256xf32, #tpu.memory_space<vmem>>, vector<1x256xf32>
    %15 = arith.truncf %14 : vector<1x256xf32> to vector<1x256xbf16>
    %c0_9 = arith.constant 0 : index
    %c0_10 = arith.constant 0 : index
    %16 = vector.load %arg4[%c0_9, %c0_10] : memref<256x512xbf16, #tpu.memory_space<vmem>>, vector<256x512xbf16>
    %cst_11 = arith.constant dense<0.000000e+00> : vector<1x512xf32>
    %17 = tpu.matmul %15, %16, %cst_11 {dimension_numbers = #tpu.dot_dimension_numbers<[1], [0], [0], [1], [0, 0, 1, 1], [], []>} : vector<1x256xbf16>, vector<256x512xbf16>, vector<1x512xf32> -> vector<1x512xf32>
    %c0_12 = arith.constant 0 : index
    %c0_13 = arith.constant 0 : index
    %18 = vector.load %arg5[%c0_12, %c0_13] : memref<1x512xf32, #tpu.memory_space<vmem>>, vector<1x512xf32>
    %19 = arith.addf %17, %18 : vector<1x512xf32>
    %20 = vector.extract_strided_slice %19 {offsets = [0, 0], sizes = [1, 128], strides = [1, 1]} : vector<1x512xf32> to vector<1x128xf32>
    %21 = arith.negf %20 : vector<1x128xf32>
    %22 = math.exp %21 : vector<1x128xf32>
    %cst_14 = arith.constant 1.000000e+00 : f32
    %23 = vector.broadcast %cst_14 : f32 to vector<1x128xf32>
    %24 = arith.addf %23, %22 : vector<1x128xf32>
    %25 = arith.divf %23, %24 : vector<1x128xf32>
    %26 = vector.extract_strided_slice %19 {offsets = [0, 128], sizes = [1, 128], strides = [1, 1]} : vector<1x512xf32> to vector<1x128xf32>
    %27 = arith.negf %26 : vector<1x128xf32>
    %28 = math.exp %27 : vector<1x128xf32>
    %cst_15 = arith.constant 1.000000e+00 : f32
    %29 = vector.broadcast %cst_15 : f32 to vector<1x128xf32>
    %30 = arith.addf %29, %28 : vector<1x128xf32>
    %31 = arith.divf %29, %30 : vector<1x128xf32>
    %32 = vector.extract_strided_slice %19 {offsets = [0, 256], sizes = [1, 128], strides = [1, 1]} : vector<1x512xf32> to vector<1x128xf32>
    %33 = vector.extract_strided_slice %19 {offsets = [0, 384], sizes = [1, 128], strides = [1, 1]} : vector<1x512xf32> to vector<1x128xf32>
    %34 = arith.mulf %25, %33 : vector<1x128xf32>
    %35 = arith.addf %32, %34 : vector<1x128xf32>
    %36 = math.tanh %35 : vector<1x128xf32>
    %cst_16 = arith.constant 1.000000e+00 : f32
    %37 = vector.broadcast %cst_16 : f32 to vector<1x128xf32>
    %38 = arith.subf %37, %31 : vector<1x128xf32>
    %39 = arith.mulf %38, %36 : vector<1x128xf32>
    %40 = arith.mulf %31, %4 : vector<1x128xf32>
    %41 = arith.addf %39, %40 : vector<1x128xf32>
    %42 = arith.addi %3, %c0_i32_2 : i32
    %c6_i32 = arith.constant 6 : i32
    %43 = arith.cmpi slt, %42, %c6_i32 : i32
    %44 = arith.extui %43 : i1 to i32
    %45 = arith.sitofp %44 : i32 to f32
    %46 = vector.broadcast %45 : f32 to vector<1x128xf32>
    %47 = arith.mulf %46, %41 : vector<1x128xf32>
    %cst_17 = arith.constant 1.000000e+00 : f32
    %48 = arith.subf %cst_17, %45 : f32
    %49 = vector.broadcast %48 : f32 to vector<1x128xf32>
    %50 = arith.mulf %49, %4 : vector<1x128xf32>
    %51 = arith.addf %47, %50 : vector<1x128xf32>
    %52 = arith.truncf %51 : vector<1x128xf32> to vector<1x128xbf16>
    %c0_18 = arith.constant 0 : index
    %c0_19 = arith.constant 0 : index
    %53 = vector.load %arg6[%c0_18, %c0_19] : memref<128x128xbf16, #tpu.memory_space<vmem>>, vector<128x128xbf16>
    %cst_20 = arith.constant dense<0.000000e+00> : vector<1x128xf32>
    %54 = tpu.matmul %52, %53, %cst_20 {dimension_numbers = #tpu.dot_dimension_numbers<[1], [0], [0], [1], [0, 0, 1, 1], [], []>} : vector<1x128xbf16>, vector<128x128xbf16>, vector<1x128xf32> -> vector<1x128xf32>
    %c0_21 = arith.constant 0 : index
    %c0_22 = arith.constant 0 : index
    %55 = vector.load %arg7[%c0_21, %c0_22] : memref<1x128xf32, #tpu.memory_space<vmem>>, vector<1x128xf32>
    %56 = arith.addf %54, %55 : vector<1x128xf32>
    %cst_23 = arith.constant dense<0xFF800000> : vector<1xf32>
    %57 = vector.multi_reduction <maximumf>, %56, %cst_23 [1] : vector<1x128xf32> to vector<1xf32>
    %58 = vector.shape_cast %57 : vector<1xf32> to vector<1x1xf32>
    %59 = vector.broadcast %58 : vector<1x1xf32> to vector<1x128xf32>
    %60 = arith.subf %56, %59 : vector<1x128xf32>
    %61 = math.exp %60 : vector<1x128xf32>
    %cst_24 = arith.constant dense<0.000000e+00> : vector<1xf32>
    %62 = vector.multi_reduction <add>, %61, %cst_24 [1] : vector<1x128xf32> to vector<1xf32>
    %63 = vector.shape_cast %62 : vector<1xf32> to vector<1x1xf32>
    %64 = math.log %63 : vector<1x1xf32>
    %65 = vector.broadcast %64 : vector<1x1xf32> to vector<1x128xf32>
    %66 = arith.subf %60, %65 : vector<1x128xf32>
    %67 = arith.index_cast %c0_i32_2 : i32 to index
    %c0_25 = arith.constant 0 : index
    %68 = vector.load %arg8[%67, %c0_25] : memref<8x128xf32, #tpu.memory_space<vmem>>, vector<1x128xf32>
    tpu.vector_store %arg8[%67, %c0_25], %66 {strides = array<i32>} : memref<8x128xf32, #tpu.memory_space<vmem>>, vector<1x128xf32>,
    %c1_i32 = arith.constant 1 : i32
    %69 = arith.addi %3, %c1_i32 : i32
    %70 = arith.index_cast %69 : i32 to index
    %71 = memref.load %arg1[%70] : memref<8xi32, #tpu.memory_space<smem>>
    %72 = arith.index_cast %71 : i32 to index
    %c0_26 = arith.constant 0 : index
    %73 = vector.load %arg2[%72, %c0_26] : memref<16x128xf32, #tpu.memory_space<vmem>>, vector<1x128xf32>
    %cst_27 = arith.constant 0.000000e+00 : f32
    %74 = vector.broadcast %cst_27 : f32 to vector<1x128xf32>
    %75 = arith.maximumf %73, %74 : vector<1x128xf32>
    %c0_28 = arith.constant 0 : index
    %c0_29 = arith.constant 0 : index
    %76 = vector.load %arg11[%c0_28, %c0_29] : memref<1x256xf32, #tpu.memory_space<vmem>>, vector<1x128xf32>
    tpu.vector_store %arg11[%c0_28, %c0_29], %75 {strides = array<i32>} : memref<1x256xf32, #tpu.memory_space<vmem>>, vector<1x128xf32>,
    %c0_30 = arith.constant 0 : index
    %c128_31 = arith.constant 128 : index
    %77 = vector.load %arg11[%c0_30, %c128_31] : memref<1x256xf32, #tpu.memory_space<vmem>>, vector<1x128xf32>
    tpu.vector_store %arg11[%c0_30, %c128_31], %51 {strides = array<i32>} : memref<1x256xf32, #tpu.memory_space<vmem>>, vector<1x128xf32>,
    %c0_32 = arith.constant 0 : index
    %c0_33 = arith.constant 0 : index
    %78 = vector.load %arg11[%c0_32, %c0_33] : memref<1x256xf32, #tpu.memory_space<vmem>>, vector<1x256xf32>
    %79 = arith.truncf %78 : vector<1x256xf32> to vector<1x256xbf16>
    %c0_34 = arith.constant 0 : index
    %c0_35 = arith.constant 0 : index
    %80 = vector.load %arg4[%c0_34, %c0_35] : memref<256x512xbf16, #tpu.memory_space<vmem>>, vector<256x512xbf16>
    %cst_36 = arith.constant dense<0.000000e+00> : vector<1x512xf32>
    %81 = tpu.matmul %79, %80, %cst_36 {dimension_numbers = #tpu.dot_dimension_numbers<[1], [0], [0], [1], [0, 0, 1, 1], [], []>} : vector<1x256xbf16>, vector<256x512xbf16>, vector<1x512xf32> -> vector<1x512xf32>
    %c0_37 = arith.constant 0 : index
    %c0_38 = arith.constant 0 : index
    %82 = vector.load %arg5[%c0_37, %c0_38] : memref<1x512xf32, #tpu.memory_space<vmem>>, vector<1x512xf32>
    %83 = arith.addf %81, %82 : vector<1x512xf32>
    %84 = vector.extract_strided_slice %83 {offsets = [0, 0], sizes = [1, 128], strides = [1, 1]} : vector<1x512xf32> to vector<1x128xf32>
    %85 = arith.negf %84 : vector<1x128xf32>
    %86 = math.exp %85 : vector<1x128xf32>
    %cst_39 = arith.constant 1.000000e+00 : f32
    %87 = vector.broadcast %cst_39 : f32 to vector<1x128xf32>
    %88 = arith.addf %87, %86 : vector<1x128xf32>
    %89 = arith.divf %87, %88 : vector<1x128xf32>
    %90 = vector.extract_strided_slice %83 {offsets = [0, 128], sizes = [1, 128], strides = [1, 1]} : vector<1x512xf32> to vector<1x128xf32>
    %91 = arith.negf %90 : vector<1x128xf32>
    %92 = math.exp %91 : vector<1x128xf32>
    %cst_40 = arith.constant 1.000000e+00 : f32
    %93 = vector.broadcast %cst_40 : f32 to vector<1x128xf32>
    %94 = arith.addf %93, %92 : vector<1x128xf32>
    %95 = arith.divf %93, %94 : vector<1x128xf32>
    %96 = vector.extract_strided_slice %83 {offsets = [0, 256], sizes = [1, 128], strides = [1, 1]} : vector<1x512xf32> to vector<1x128xf32>
    %97 = vector.extract_strided_slice %83 {offsets = [0, 384], sizes = [1, 128], strides = [1, 1]} : vector<1x512xf32> to vector<1x128xf32>
    %98 = arith.mulf %89, %97 : vector<1x128xf32>
    %99 = arith.addf %96, %98 : vector<1x128xf32>
    %100 = math.tanh %99 : vector<1x128xf32>
    %cst_41 = arith.constant 1.000000e+00 : f32
    %101 = vector.broadcast %cst_41 : f32 to vector<1x128xf32>
    %102 = arith.subf %101, %95 : vector<1x128xf32>
    %103 = arith.mulf %102, %100 : vector<1x128xf32>
    %104 = arith.mulf %95, %51 : vector<1x128xf32>
    %105 = arith.addf %103, %104 : vector<1x128xf32>
    %106 = arith.addi %3, %c1_i32 : i32
    %c6_i32_42 = arith.constant 6 : i32
    %107 = arith.cmpi slt, %106, %c6_i32_42 : i32
    %108 = arith.extui %107 : i1 to i32
    %109 = arith.sitofp %108 : i32 to f32
    %110 = vector.broadcast %109 : f32 to vector<1x128xf32>
    %111 = arith.mulf %110, %105 : vector<1x128xf32>
    %cst_43 = arith.constant 1.000000e+00 : f32
    %112 = arith.subf %cst_43, %109 : f32
    %113 = vector.broadcast %112 : f32 to vector<1x128xf32>
    %114 = arith.mulf %113, %51 : vector<1x128xf32>
    %115 = arith.addf %111, %114 : vector<1x128xf32>
    %116 = arith.truncf %115 : vector<1x128xf32> to vector<1x128xbf16>
    %c0_44 = arith.constant 0 : index
    %c0_45 = arith.constant 0 : index
    %117 = vector.load %arg6[%c0_44, %c0_45] : memref<128x128xbf16, #tpu.memory_space<vmem>>, vector<128x128xbf16>
    %cst_46 = arith.constant dense<0.000000e+00> : vector<1x128xf32>
    %118 = tpu.matmul %116, %117, %cst_46 {dimension_numbers = #tpu.dot_dimension_numbers<[1], [0], [0], [1], [0, 0, 1, 1], [], []>} : vector<1x128xbf16>, vector<128x128xbf16>, vector<1x128xf32> -> vector<1x128xf32>
    %c0_47 = arith.constant 0 : index
    %c0_48 = arith.constant 0 : index
    %119 = vector.load %arg7[%c0_47, %c0_48] : memref<1x128xf32, #tpu.memory_space<vmem>>, vector<1x128xf32>
    %120 = arith.addf %118, %119 : vector<1x128xf32>
    %cst_49 = arith.constant dense<0xFF800000> : vector<1xf32>
    %121 = vector.multi_reduction <maximumf>, %120, %cst_49 [1] : vector<1x128xf32> to vector<1xf32>
    %122 = vector.shape_cast %121 : vector<1xf32> to vector<1x1xf32>
    %123 = vector.broadcast %122 : vector<1x1xf32> to vector<1x128xf32>
    %124 = arith.subf %120, %123 : vector<1x128xf32>
    %125 = math.exp %124 : vector<1x128xf32>
    %cst_50 = arith.constant dense<0.000000e+00> : vector<1xf32>
    %126 = vector.multi_reduction <add>, %125, %cst_50 [1] : vector<1x128xf32> to vector<1xf32>
    %127 = vector.shape_cast %126 : vector<1xf32> to vector<1x1xf32>
    %128 = math.log %127 : vector<1x1xf32>
    %129 = vector.broadcast %128 : vector<1x1xf32> to vector<1x128xf32>
    %130 = arith.subf %124, %129 : vector<1x128xf32>
    %131 = arith.index_cast %c1_i32 : i32 to index
    %c0_51 = arith.constant 0 : index
    %132 = vector.load %arg8[%131, %c0_51] : memref<8x128xf32, #tpu.memory_space<vmem>>, vector<1x128xf32>
    tpu.vector_store %arg8[%131, %c0_51], %130 {strides = array<i32>} : memref<8x128xf32, #tpu.memory_space<vmem>>, vector<1x128xf32>,
    %c2_i32 = arith.constant 2 : i32
    %133 = arith.addi %3, %c2_i32 : i32
    %134 = arith.index_cast %133 : i32 to index
    %135 = memref.load %arg1[%134] : memref<8xi32, #tpu.memory_space<smem>>
    %136 = arith.index_cast %135 : i32 to index
    %c0_52 = arith.constant 0 : index
    %137 = vector.load %arg2[%136, %c0_52] : memref<16x128xf32, #tpu.memory_space<vmem>>, vector<1x128xf32>
    %cst_53 = arith.constant 0.000000e+00 : f32
    %138 = vector.broadcast %cst_53 : f32 to vector<1x128xf32>
    %139 = arith.maximumf %137, %138 : vector<1x128xf32>
    %c0_54 = arith.constant 0 : index
    %c0_55 = arith.constant 0 : index
    %140 = vector.load %arg11[%c0_54, %c0_55] : memref<1x256xf32, #tpu.memory_space<vmem>>, vector<1x128xf32>
    tpu.vector_store %arg11[%c0_54, %c0_55], %139 {strides = array<i32>} : memref<1x256xf32, #tpu.memory_space<vmem>>, vector<1x128xf32>,
    %c0_56 = arith.constant 0 : index
    %c128_57 = arith.constant 128 : index
    %141 = vector.load %arg11[%c0_56, %c128_57] : memref<1x256xf32, #tpu.memory_space<vmem>>, vector<1x128xf32>
    tpu.vector_store %arg11[%c0_56, %c128_57], %115 {strides = array<i32>} : memref<1x256xf32, #tpu.memory_space<vmem>>, vector<1x128xf32>,
    %c0_58 = arith.constant 0 : index
    %c0_59 = arith.constant 0 : index
    %142 = vector.load %arg11[%c0_58, %c0_59] : memref<1x256xf32, #tpu.memory_space<vmem>>, vector<1x256xf32>
    %143 = arith.truncf %142 : vector<1x256xf32> to vector<1x256xbf16>
    %c0_60 = arith.constant 0 : index
    %c0_61 = arith.constant 0 : index
    %144 = vector.load %arg4[%c0_60, %c0_61] : memref<256x512xbf16, #tpu.memory_space<vmem>>, vector<256x512xbf16>
    %cst_62 = arith.constant dense<0.000000e+00> : vector<1x512xf32>
    %145 = tpu.matmul %143, %144, %cst_62 {dimension_numbers = #tpu.dot_dimension_numbers<[1], [0], [0], [1], [0, 0, 1, 1], [], []>} : vector<1x256xbf16>, vector<256x512xbf16>, vector<1x512xf32> -> vector<1x512xf32>
    %c0_63 = arith.constant 0 : index
    %c0_64 = arith.constant 0 : index
    %146 = vector.load %arg5[%c0_63, %c0_64] : memref<1x512xf32, #tpu.memory_space<vmem>>, vector<1x512xf32>
    %147 = arith.addf %145, %146 : vector<1x512xf32>
    %148 = vector.extract_strided_slice %147 {offsets = [0, 0], sizes = [1, 128], strides = [1, 1]} : vector<1x512xf32> to vector<1x128xf32>
    %149 = arith.negf %148 : vector<1x128xf32>
    %150 = math.exp %149 : vector<1x128xf32>
    %cst_65 = arith.constant 1.000000e+00 : f32
    %151 = vector.broadcast %cst_65 : f32 to vector<1x128xf32>
    %152 = arith.addf %151, %150 : vector<1x128xf32>
    %153 = arith.divf %151, %152 : vector<1x128xf32>
    %154 = vector.extract_strided_slice %147 {offsets = [0, 128], sizes = [1, 128], strides = [1, 1]} : vector<1x512xf32> to vector<1x128xf32>
    %155 = arith.negf %154 : vector<1x128xf32>
    %156 = math.exp %155 : vector<1x128xf32>
    %cst_66 = arith.constant 1.000000e+00 : f32
    %157 = vector.broadcast %cst_66 : f32 to vector<1x128xf32>
    %158 = arith.addf %157, %156 : vector<1x128xf32>
    %159 = arith.divf %157, %158 : vector<1x128xf32>
    %160 = vector.extract_strided_slice %147 {offsets = [0, 256], sizes = [1, 128], strides = [1, 1]} : vector<1x512xf32> to vector<1x128xf32>
    %161 = vector.extract_strided_slice %147 {offsets = [0, 384], sizes = [1, 128], strides = [1, 1]} : vector<1x512xf32> to vector<1x128xf32>
    %162 = arith.mulf %153, %161 : vector<1x128xf32>
    %163 = arith.addf %160, %162 : vector<1x128xf32>
    %164 = math.tanh %163 : vector<1x128xf32>
    %cst_67 = arith.constant 1.000000e+00 : f32
    %165 = vector.broadcast %cst_67 : f32 to vector<1x128xf32>
    %166 = arith.subf %165, %159 : vector<1x128xf32>
    %167 = arith.mulf %166, %164 : vector<1x128xf32>
    %168 = arith.mulf %159, %115 : vector<1x128xf32>
    %169 = arith.addf %167, %168 : vector<1x128xf32>
    %170 = arith.addi %3, %c2_i32 : i32
    %c6_i32_68 = arith.constant 6 : i32
    %171 = arith.cmpi slt, %170, %c6_i32_68 : i32
    %172 = arith.extui %171 : i1 to i32
    %173 = arith.sitofp %172 : i32 to f32
    %174 = vector.broadcast %173 : f32 to vector<1x128xf32>
    %175 = arith.mulf %174, %169 : vector<1x128xf32>
    %cst_69 = arith.constant 1.000000e+00 : f32
    %176 = arith.subf %cst_69, %173 : f32
    %177 = vector.broadcast %176 : f32 to vector<1x128xf32>
    %178 = arith.mulf %177, %115 : vector<1x128xf32>
    %179 = arith.addf %175, %178 : vector<1x128xf32>
    %180 = arith.truncf %179 : vector<1x128xf32> to vector<1x128xbf16>
    %c0_70 = arith.constant 0 : index
    %c0_71 = arith.constant 0 : index
    %181 = vector.load %arg6[%c0_70, %c0_71] : memref<128x128xbf16, #tpu.memory_space<vmem>>, vector<128x128xbf16>
    %cst_72 = arith.constant dense<0.000000e+00> : vector<1x128xf32>
    %182 = tpu.matmul %180, %181, %cst_72 {dimension_numbers = #tpu.dot_dimension_numbers<[1], [0], [0], [1], [0, 0, 1, 1], [], []>} : vector<1x128xbf16>, vector<128x128xbf16>, vector<1x128xf32> -> vector<1x128xf32>
    %c0_73 = arith.constant 0 : index
    %c0_74 = arith.constant 0 : index
    %183 = vector.load %arg7[%c0_73, %c0_74] : memref<1x128xf32, #tpu.memory_space<vmem>>, vector<1x128xf32>
    %184 = arith.addf %182, %183 : vector<1x128xf32>
    %cst_75 = arith.constant dense<0xFF800000> : vector<1xf32>
    %185 = vector.multi_reduction <maximumf>, %184, %cst_75 [1] : vector<1x128xf32> to vector<1xf32>
    %186 = vector.shape_cast %185 : vector<1xf32> to vector<1x1xf32>
    %187 = vector.broadcast %186 : vector<1x1xf32> to vector<1x128xf32>
    %188 = arith.subf %184, %187 : vector<1x128xf32>
    %189 = math.exp %188 : vector<1x128xf32>
    %cst_76 = arith.constant dense<0.000000e+00> : vector<1xf32>
    %190 = vector.multi_reduction <add>, %189, %cst_76 [1] : vector<1x128xf32> to vector<1xf32>
    %191 = vector.shape_cast %190 : vector<1xf32> to vector<1x1xf32>
    %192 = math.log %191 : vector<1x1xf32>
    %193 = vector.broadcast %192 : vector<1x1xf32> to vector<1x128xf32>
    %194 = arith.subf %188, %193 : vector<1x128xf32>
    %195 = arith.index_cast %c2_i32 : i32 to index
    %c0_77 = arith.constant 0 : index
    %196 = vector.load %arg8[%195, %c0_77] : memref<8x128xf32, #tpu.memory_space<vmem>>, vector<1x128xf32>
    tpu.vector_store %arg8[%195, %c0_77], %194 {strides = array<i32>} : memref<8x128xf32, #tpu.memory_space<vmem>>, vector<1x128xf32>,
    %c3_i32 = arith.constant 3 : i32
    %197 = arith.addi %3, %c3_i32 : i32
    %198 = arith.index_cast %197 : i32 to index
    %199 = memref.load %arg1[%198] : memref<8xi32, #tpu.memory_space<smem>>
    %200 = arith.index_cast %199 : i32 to index
    %c0_78 = arith.constant 0 : index
    %201 = vector.load %arg2[%200, %c0_78] : memref<16x128xf32, #tpu.memory_space<vmem>>, vector<1x128xf32>
    %cst_79 = arith.constant 0.000000e+00 : f32
    %202 = vector.broadcast %cst_79 : f32 to vector<1x128xf32>
    %203 = arith.maximumf %201, %202 : vector<1x128xf32>
    %c0_80 = arith.constant 0 : index
    %c0_81 = arith.constant 0 : index
    %204 = vector.load %arg11[%c0_80, %c0_81] : memref<1x256xf32, #tpu.memory_space<vmem>>, vector<1x128xf32>
    tpu.vector_store %arg11[%c0_80, %c0_81], %203 {strides = array<i32>} : memref<1x256xf32, #tpu.memory_space<vmem>>, vector<1x128xf32>,
    %c0_82 = arith.constant 0 : index
    %c128_83 = arith.constant 128 : index
    %205 = vector.load %arg11[%c0_82, %c128_83] : memref<1x256xf32, #tpu.memory_space<vmem>>, vector<1x128xf32>
    tpu.vector_store %arg11[%c0_82, %c128_83], %179 {strides = array<i32>} : memref<1x256xf32, #tpu.memory_space<vmem>>, vector<1x128xf32>,
    %c0_84 = arith.constant 0 : index
    %c0_85 = arith.constant 0 : index
    %206 = vector.load %arg11[%c0_84, %c0_85] : memref<1x256xf32, #tpu.memory_space<vmem>>, vector<1x256xf32>
    %207 = arith.truncf %206 : vector<1x256xf32> to vector<1x256xbf16>
    %c0_86 = arith.constant 0 : index
    %c0_87 = arith.constant 0 : index
    %208 = vector.load %arg4[%c0_86, %c0_87] : memref<256x512xbf16, #tpu.memory_space<vmem>>, vector<256x512xbf16>
    %cst_88 = arith.constant dense<0.000000e+00> : vector<1x512xf32>
    %209 = tpu.matmul %207, %208, %cst_88 {dimension_numbers = #tpu.dot_dimension_numbers<[1], [0], [0], [1], [0, 0, 1, 1], [], []>} : vector<1x256xbf16>, vector<256x512xbf16>, vector<1x512xf32> -> vector<1x512xf32>
    %c0_89 = arith.constant 0 : index
    %c0_90 = arith.constant 0 : index
    %210 = vector.load %arg5[%c0_89, %c0_90] : memref<1x512xf32, #tpu.memory_space<vmem>>, vector<1x512xf32>
    %211 = arith.addf %209, %210 : vector<1x512xf32>
    %212 = vector.extract_strided_slice %211 {offsets = [0, 0], sizes = [1, 128], strides = [1, 1]} : vector<1x512xf32> to vector<1x128xf32>
    %213 = arith.negf %212 : vector<1x128xf32>
    %214 = math.exp %213 : vector<1x128xf32>
    %cst_91 = arith.constant 1.000000e+00 : f32
    %215 = vector.broadcast %cst_91 : f32 to vector<1x128xf32>
    %216 = arith.addf %215, %214 : vector<1x128xf32>
    %217 = arith.divf %215, %216 : vector<1x128xf32>
    %218 = vector.extract_strided_slice %211 {offsets = [0, 128], sizes = [1, 128], strides = [1, 1]} : vector<1x512xf32> to vector<1x128xf32>
    %219 = arith.negf %218 : vector<1x128xf32>
    %220 = math.exp %219 : vector<1x128xf32>
    %cst_92 = arith.constant 1.000000e+00 : f32
    %221 = vector.broadcast %cst_92 : f32 to vector<1x128xf32>
    %222 = arith.addf %221, %220 : vector<1x128xf32>
    %223 = arith.divf %221, %222 : vector<1x128xf32>
    %224 = vector.extract_strided_slice %211 {offsets = [0, 256], sizes = [1, 128], strides = [1, 1]} : vector<1x512xf32> to vector<1x128xf32>
    %225 = vector.extract_strided_slice %211 {offsets = [0, 384], sizes = [1, 128], strides = [1, 1]} : vector<1x512xf32> to vector<1x128xf32>
    %226 = arith.mulf %217, %225 : vector<1x128xf32>
    %227 = arith.addf %224, %226 : vector<1x128xf32>
    %228 = math.tanh %227 : vector<1x128xf32>
    %cst_93 = arith.constant 1.000000e+00 : f32
    %229 = vector.broadcast %cst_93 : f32 to vector<1x128xf32>
    %230 = arith.subf %229, %223 : vector<1x128xf32>
    %231 = arith.mulf %230, %228 : vector<1x128xf32>
    %232 = arith.mulf %223, %179 : vector<1x128xf32>
    %233 = arith.addf %231, %232 : vector<1x128xf32>
    %234 = arith.addi %3, %c3_i32 : i32
    %c6_i32_94 = arith.constant 6 : i32
    %235 = arith.cmpi slt, %234, %c6_i32_94 : i32
    %236 = arith.extui %235 : i1 to i32
    %237 = arith.sitofp %236 : i32 to f32
    %238 = vector.broadcast %237 : f32 to vector<1x128xf32>
    %239 = arith.mulf %238, %233 : vector<1x128xf32>
    %cst_95 = arith.constant 1.000000e+00 : f32
    %240 = arith.subf %cst_95, %237 : f32
    %241 = vector.broadcast %240 : f32 to vector<1x128xf32>
    %242 = arith.mulf %241, %179 : vector<1x128xf32>
    %243 = arith.addf %239, %242 : vector<1x128xf32>
    %244 = arith.truncf %243 : vector<1x128xf32> to vector<1x128xbf16>
    %c0_96 = arith.constant 0 : index
    %c0_97 = arith.constant 0 : index
    %245 = vector.load %arg6[%c0_96, %c0_97] : memref<128x128xbf16, #tpu.memory_space<vmem>>, vector<128x128xbf16>
    %cst_98 = arith.constant dense<0.000000e+00> : vector<1x128xf32>
    %246 = tpu.matmul %244, %245, %cst_98 {dimension_numbers = #tpu.dot_dimension_numbers<[1], [0], [0], [1], [0, 0, 1, 1], [], []>} : vector<1x128xbf16>, vector<128x128xbf16>, vector<1x128xf32> -> vector<1x128xf32>
    %c0_99 = arith.constant 0 : index
    %c0_100 = arith.constant 0 : index
    %247 = vector.load %arg7[%c0_99, %c0_100] : memref<1x128xf32, #tpu.memory_space<vmem>>, vector<1x128xf32>
    %248 = arith.addf %246, %247 : vector<1x128xf32>
    %cst_101 = arith.constant dense<0xFF800000> : vector<1xf32>
    %249 = vector.multi_reduction <maximumf>, %248, %cst_101 [1] : vector<1x128xf32> to vector<1xf32>
    %250 = vector.shape_cast %249 : vector<1xf32> to vector<1x1xf32>
    %251 = vector.broadcast %250 : vector<1x1xf32> to vector<1x128xf32>
    %252 = arith.subf %248, %251 : vector<1x128xf32>
    %253 = math.exp %252 : vector<1x128xf32>
    %cst_102 = arith.constant dense<0.000000e+00> : vector<1xf32>
    %254 = vector.multi_reduction <add>, %253, %cst_102 [1] : vector<1x128xf32> to vector<1xf32>
    %255 = vector.shape_cast %254 : vector<1xf32> to vector<1x1xf32>
    %256 = math.log %255 : vector<1x1xf32>
    %257 = vector.broadcast %256 : vector<1x1xf32> to vector<1x128xf32>
    %258 = arith.subf %252, %257 : vector<1x128xf32>
    %259 = arith.index_cast %c3_i32 : i32 to index
    %c0_103 = arith.constant 0 : index
    %260 = vector.load %arg8[%259, %c0_103] : memref<8x128xf32, #tpu.memory_space<vmem>>, vector<1x128xf32>
    tpu.vector_store %arg8[%259, %c0_103], %258 {strides = array<i32>} : memref<8x128xf32, #tpu.memory_space<vmem>>, vector<1x128xf32>,
    %c4_i32 = arith.constant 4 : i32
    %261 = arith.addi %3, %c4_i32 : i32
    %262 = arith.index_cast %261 : i32 to index
    %263 = memref.load %arg1[%262] : memref<8xi32, #tpu.memory_space<smem>>
    %264 = arith.index_cast %263 : i32 to index
    %c0_104 = arith.constant 0 : index
    %265 = vector.load %arg2[%264, %c0_104] : memref<16x128xf32, #tpu.memory_space<vmem>>, vector<1x128xf32>
    %cst_105 = arith.constant 0.000000e+00 : f32
    %266 = vector.broadcast %cst_105 : f32 to vector<1x128xf32>
    %267 = arith.maximumf %265, %266 : vector<1x128xf32>
    %c0_106 = arith.constant 0 : index
    %c0_107 = arith.constant 0 : index
    %268 = vector.load %arg11[%c0_106, %c0_107] : memref<1x256xf32, #tpu.memory_space<vmem>>, vector<1x128xf32>
    tpu.vector_store %arg11[%c0_106, %c0_107], %267 {strides = array<i32>} : memref<1x256xf32, #tpu.memory_space<vmem>>, vector<1x128xf32>,
    %c0_108 = arith.constant 0 : index
    %c128_109 = arith.constant 128 : index
    %269 = vector.load %arg11[%c0_108, %c128_109] : memref<1x256xf32, #tpu.memory_space<vmem>>, vector<1x128xf32>
    tpu.vector_store %arg11[%c0_108, %c128_109], %243 {strides = array<i32>} : memref<1x256xf32, #tpu.memory_space<vmem>>, vector<1x128xf32>,
    %c0_110 = arith.constant 0 : index
    %c0_111 = arith.constant 0 : index
    %270 = vector.load %arg11[%c0_110, %c0_111] : memref<1x256xf32, #tpu.memory_space<vmem>>, vector<1x256xf32>
    %271 = arith.truncf %270 : vector<1x256xf32> to vector<1x256xbf16>
    %c0_112 = arith.constant 0 : index
    %c0_113 = arith.constant 0 : index
    %272 = vector.load %arg4[%c0_112, %c0_113] : memref<256x512xbf16, #tpu.memory_space<vmem>>, vector<256x512xbf16>
    %cst_114 = arith.constant dense<0.000000e+00> : vector<1x512xf32>
    %273 = tpu.matmul %271, %272, %cst_114 {dimension_numbers = #tpu.dot_dimension_numbers<[1], [0], [0], [1], [0, 0, 1, 1], [], []>} : vector<1x256xbf16>, vector<256x512xbf16>, vector<1x512xf32> -> vector<1x512xf32>
    %c0_115 = arith.constant 0 : index
    %c0_116 = arith.constant 0 : index
    %274 = vector.load %arg5[%c0_115, %c0_116] : memref<1x512xf32, #tpu.memory_space<vmem>>, vector<1x512xf32>
    %275 = arith.addf %273, %274 : vector<1x512xf32>
    %276 = vector.extract_strided_slice %275 {offsets = [0, 0], sizes = [1, 128], strides = [1, 1]} : vector<1x512xf32> to vector<1x128xf32>
    %277 = arith.negf %276 : vector<1x128xf32>
    %278 = math.exp %277 : vector<1x128xf32>
    %cst_117 = arith.constant 1.000000e+00 : f32
    %279 = vector.broadcast %cst_117 : f32 to vector<1x128xf32>
    %280 = arith.addf %279, %278 : vector<1x128xf32>
    %281 = arith.divf %279, %280 : vector<1x128xf32>
    %282 = vector.extract_strided_slice %275 {offsets = [0, 128], sizes = [1, 128], strides = [1, 1]} : vector<1x512xf32> to vector<1x128xf32>
    %283 = arith.negf %282 : vector<1x128xf32>
    %284 = math.exp %283 : vector<1x128xf32>
    %cst_118 = arith.constant 1.000000e+00 : f32
    %285 = vector.broadcast %cst_118 : f32 to vector<1x128xf32>
    %286 = arith.addf %285, %284 : vector<1x128xf32>
    %287 = arith.divf %285, %286 : vector<1x128xf32>
    %288 = vector.extract_strided_slice %275 {offsets = [0, 256], sizes = [1, 128], strides = [1, 1]} : vector<1x512xf32> to vector<1x128xf32>
    %289 = vector.extract_strided_slice %275 {offsets = [0, 384], sizes = [1, 128], strides = [1, 1]} : vector<1x512xf32> to vector<1x128xf32>
    %290 = arith.mulf %281, %289 : vector<1x128xf32>
    %291 = arith.addf %288, %290 : vector<1x128xf32>
    %292 = math.tanh %291 : vector<1x128xf32>
    %cst_119 = arith.constant 1.000000e+00 : f32
    %293 = vector.broadcast %cst_119 : f32 to vector<1x128xf32>
    %294 = arith.subf %293, %287 : vector<1x128xf32>
    %295 = arith.mulf %294, %292 : vector<1x128xf32>
    %296 = arith.mulf %287, %243 : vector<1x128xf32>
    %297 = arith.addf %295, %296 : vector<1x128xf32>
    %298 = arith.addi %3, %c4_i32 : i32
    %c6_i32_120 = arith.constant 6 : i32
    %299 = arith.cmpi slt, %298, %c6_i32_120 : i32
    %300 = arith.extui %299 : i1 to i32
    %301 = arith.sitofp %300 : i32 to f32
    %302 = vector.broadcast %301 : f32 to vector<1x128xf32>
    %303 = arith.mulf %302, %297 : vector<1x128xf32>
    %cst_121 = arith.constant 1.000000e+00 : f32
    %304 = arith.subf %cst_121, %301 : f32
    %305 = vector.broadcast %304 : f32 to vector<1x128xf32>
    %306 = arith.mulf %305, %243 : vector<1x128xf32>
    %307 = arith.addf %303, %306 : vector<1x128xf32>
    %308 = arith.truncf %307 : vector<1x128xf32> to vector<1x128xbf16>
    %c0_122 = arith.constant 0 : index
    %c0_123 = arith.constant 0 : index
    %309 = vector.load %arg6[%c0_122, %c0_123] : memref<128x128xbf16, #tpu.memory_space<vmem>>, vector<128x128xbf16>
    %cst_124 = arith.constant dense<0.000000e+00> : vector<1x128xf32>
    %310 = tpu.matmul %308, %309, %cst_124 {dimension_numbers = #tpu.dot_dimension_numbers<[1], [0], [0], [1], [0, 0, 1, 1], [], []>} : vector<1x128xbf16>, vector<128x128xbf16>, vector<1x128xf32> -> vector<1x128xf32>
    %c0_125 = arith.constant 0 : index
    %c0_126 = arith.constant 0 : index
    %311 = vector.load %arg7[%c0_125, %c0_126] : memref<1x128xf32, #tpu.memory_space<vmem>>, vector<1x128xf32>
    %312 = arith.addf %310, %311 : vector<1x128xf32>
    %cst_127 = arith.constant dense<0xFF800000> : vector<1xf32>
    %313 = vector.multi_reduction <maximumf>, %312, %cst_127 [1] : vector<1x128xf32> to vector<1xf32>
    %314 = vector.shape_cast %313 : vector<1xf32> to vector<1x1xf32>
    %315 = vector.broadcast %314 : vector<1x1xf32> to vector<1x128xf32>
    %316 = arith.subf %312, %315 : vector<1x128xf32>
    %317 = math.exp %316 : vector<1x128xf32>
    %cst_128 = arith.constant dense<0.000000e+00> : vector<1xf32>
    %318 = vector.multi_reduction <add>, %317, %cst_128 [1] : vector<1x128xf32> to vector<1xf32>
    %319 = vector.shape_cast %318 : vector<1xf32> to vector<1x1xf32>
    %320 = math.log %319 : vector<1x1xf32>
    %321 = vector.broadcast %320 : vector<1x1xf32> to vector<1x128xf32>
    %322 = arith.subf %316, %321 : vector<1x128xf32>
    %323 = arith.index_cast %c4_i32 : i32 to index
    %c0_129 = arith.constant 0 : index
    %324 = vector.load %arg8[%323, %c0_129] : memref<8x128xf32, #tpu.memory_space<vmem>>, vector<1x128xf32>
    tpu.vector_store %arg8[%323, %c0_129], %322 {strides = array<i32>} : memref<8x128xf32, #tpu.memory_space<vmem>>, vector<1x128xf32>,
    %c5_i32 = arith.constant 5 : i32
    %325 = arith.addi %3, %c5_i32 : i32
    %326 = arith.index_cast %325 : i32 to index
    %327 = memref.load %arg1[%326] : memref<8xi32, #tpu.memory_space<smem>>
    %328 = arith.index_cast %327 : i32 to index
    %c0_130 = arith.constant 0 : index
    %329 = vector.load %arg2[%328, %c0_130] : memref<16x128xf32, #tpu.memory_space<vmem>>, vector<1x128xf32>
    %cst_131 = arith.constant 0.000000e+00 : f32
    %330 = vector.broadcast %cst_131 : f32 to vector<1x128xf32>
    %331 = arith.maximumf %329, %330 : vector<1x128xf32>
    %c0_132 = arith.constant 0 : index
    %c0_133 = arith.constant 0 : index
    %332 = vector.load %arg11[%c0_132, %c0_133] : memref<1x256xf32, #tpu.memory_space<vmem>>, vector<1x128xf32>
    tpu.vector_store %arg11[%c0_132, %c0_133], %331 {strides = array<i32>} : memref<1x256xf32, #tpu.memory_space<vmem>>, vector<1x128xf32>,
    %c0_134 = arith.constant 0 : index
    %c128_135 = arith.constant 128 : index
    %333 = vector.load %arg11[%c0_134, %c128_135] : memref<1x256xf32, #tpu.memory_space<vmem>>, vector<1x128xf32>
    tpu.vector_store %arg11[%c0_134, %c128_135], %307 {strides = array<i32>} : memref<1x256xf32, #tpu.memory_space<vmem>>, vector<1x128xf32>,
    %c0_136 = arith.constant 0 : index
    %c0_137 = arith.constant 0 : index
    %334 = vector.load %arg11[%c0_136, %c0_137] : memref<1x256xf32, #tpu.memory_space<vmem>>, vector<1x256xf32>
    %335 = arith.truncf %334 : vector<1x256xf32> to vector<1x256xbf16>
    %c0_138 = arith.constant 0 : index
    %c0_139 = arith.constant 0 : index
    %336 = vector.load %arg4[%c0_138, %c0_139] : memref<256x512xbf16, #tpu.memory_space<vmem>>, vector<256x512xbf16>
    %cst_140 = arith.constant dense<0.000000e+00> : vector<1x512xf32>
    %337 = tpu.matmul %335, %336, %cst_140 {dimension_numbers = #tpu.dot_dimension_numbers<[1], [0], [0], [1], [0, 0, 1, 1], [], []>} : vector<1x256xbf16>, vector<256x512xbf16>, vector<1x512xf32> -> vector<1x512xf32>
    %c0_141 = arith.constant 0 : index
    %c0_142 = arith.constant 0 : index
    %338 = vector.load %arg5[%c0_141, %c0_142] : memref<1x512xf32, #tpu.memory_space<vmem>>, vector<1x512xf32>
    %339 = arith.addf %337, %338 : vector<1x512xf32>
    %340 = vector.extract_strided_slice %339 {offsets = [0, 0], sizes = [1, 128], strides = [1, 1]} : vector<1x512xf32> to vector<1x128xf32>
    %341 = arith.negf %340 : vector<1x128xf32>
    %342 = math.exp %341 : vector<1x128xf32>
    %cst_143 = arith.constant 1.000000e+00 : f32
    %343 = vector.broadcast %cst_143 : f32 to vector<1x128xf32>
    %344 = arith.addf %343, %342 : vector<1x128xf32>
    %345 = arith.divf %343, %344 : vector<1x128xf32>
    %346 = vector.extract_strided_slice %339 {offsets = [0, 128], sizes = [1, 128], strides = [1, 1]} : vector<1x512xf32> to vector<1x128xf32>
    %347 = arith.negf %346 : vector<1x128xf32>
    %348 = math.exp %347 : vector<1x128xf32>
    %cst_144 = arith.constant 1.000000e+00 : f32
    %349 = vector.broadcast %cst_144 : f32 to vector<1x128xf32>
    %350 = arith.addf %349, %348 : vector<1x128xf32>
    %351 = arith.divf %349, %350 : vector<1x128xf32>
    %352 = vector.extract_strided_slice %339 {offsets = [0, 256], sizes = [1, 128], strides = [1, 1]} : vector<1x512xf32> to vector<1x128xf32>
    %353 = vector.extract_strided_slice %339 {offsets = [0, 384], sizes = [1, 128], strides = [1, 1]} : vector<1x512xf32> to vector<1x128xf32>
    %354 = arith.mulf %345, %353 : vector<1x128xf32>
    %355 = arith.addf %352, %354 : vector<1x128xf32>
    %356 = math.tanh %355 : vector<1x128xf32>
    %cst_145 = arith.constant 1.000000e+00 : f32
    %357 = vector.broadcast %cst_145 : f32 to vector<1x128xf32>
    %358 = arith.subf %357, %351 : vector<1x128xf32>
    %359 = arith.mulf %358, %356 : vector<1x128xf32>
    %360 = arith.mulf %351, %307 : vector<1x128xf32>
    %361 = arith.addf %359, %360 : vector<1x128xf32>
    %362 = arith.addi %3, %c5_i32 : i32
    %c6_i32_146 = arith.constant 6 : i32
    %363 = arith.cmpi slt, %362, %c6_i32_146 : i32
    %364 = arith.extui %363 : i1 to i32
    %365 = arith.sitofp %364 : i32 to f32
    %366 = vector.broadcast %365 : f32 to vector<1x128xf32>
    %367 = arith.mulf %366, %361 : vector<1x128xf32>
    %cst_147 = arith.constant 1.000000e+00 : f32
    %368 = arith.subf %cst_147, %365 : f32
    %369 = vector.broadcast %368 : f32 to vector<1x128xf32>
    %370 = arith.mulf %369, %307 : vector<1x128xf32>
    %371 = arith.addf %367, %370 : vector<1x128xf32>
    %372 = arith.truncf %371 : vector<1x128xf32> to vector<1x128xbf16>
    %c0_148 = arith.constant 0 : index
    %c0_149 = arith.constant 0 : index
    %373 = vector.load %arg6[%c0_148, %c0_149] : memref<128x128xbf16, #tpu.memory_space<vmem>>, vector<128x128xbf16>
    %cst_150 = arith.constant dense<0.000000e+00> : vector<1x128xf32>
    %374 = tpu.matmul %372, %373, %cst_150 {dimension_numbers = #tpu.dot_dimension_numbers<[1], [0], [0], [1], [0, 0, 1, 1], [], []>} : vector<1x128xbf16>, vector<128x128xbf16>, vector<1x128xf32> -> vector<1x128xf32>
    %c0_151 = arith.constant 0 : index
    %c0_152 = arith.constant 0 : index
    %375 = vector.load %arg7[%c0_151, %c0_152] : memref<1x128xf32, #tpu.memory_space<vmem>>, vector<1x128xf32>
    %376 = arith.addf %374, %375 : vector<1x128xf32>
    %cst_153 = arith.constant dense<0xFF800000> : vector<1xf32>
    %377 = vector.multi_reduction <maximumf>, %376, %cst_153 [1] : vector<1x128xf32> to vector<1xf32>
    %378 = vector.shape_cast %377 : vector<1xf32> to vector<1x1xf32>
    %379 = vector.broadcast %378 : vector<1x1xf32> to vector<1x128xf32>
    %380 = arith.subf %376, %379 : vector<1x128xf32>
    %381 = math.exp %380 : vector<1x128xf32>
    %cst_154 = arith.constant dense<0.000000e+00> : vector<1xf32>
    %382 = vector.multi_reduction <add>, %381, %cst_154 [1] : vector<1x128xf32> to vector<1xf32>
    %383 = vector.shape_cast %382 : vector<1xf32> to vector<1x1xf32>
    %384 = math.log %383 : vector<1x1xf32>
    %385 = vector.broadcast %384 : vector<1x1xf32> to vector<1x128xf32>
    %386 = arith.subf %380, %385 : vector<1x128xf32>
    %387 = arith.index_cast %c5_i32 : i32 to index
    %c0_155 = arith.constant 0 : index
    %388 = vector.load %arg8[%387, %c0_155] : memref<8x128xf32, #tpu.memory_space<vmem>>, vector<1x128xf32>
    tpu.vector_store %arg8[%387, %c0_155], %386 {strides = array<i32>} : memref<8x128xf32, #tpu.memory_space<vmem>>, vector<1x128xf32>,
    %c6_i32_156 = arith.constant 6 : i32
    %389 = arith.addi %3, %c6_i32_156 : i32
    %390 = arith.index_cast %389 : i32 to index
    %391 = memref.load %arg1[%390] : memref<8xi32, #tpu.memory_space<smem>>
    %392 = arith.index_cast %391 : i32 to index
    %c0_157 = arith.constant 0 : index
    %393 = vector.load %arg2[%392, %c0_157] : memref<16x128xf32, #tpu.memory_space<vmem>>, vector<1x128xf32>
    %cst_158 = arith.constant 0.000000e+00 : f32
    %394 = vector.broadcast %cst_158 : f32 to vector<1x128xf32>
    %395 = arith.maximumf %393, %394 : vector<1x128xf32>
    %c0_159 = arith.constant 0 : index
    %c0_160 = arith.constant 0 : index
    %396 = vector.load %arg11[%c0_159, %c0_160] : memref<1x256xf32, #tpu.memory_space<vmem>>, vector<1x128xf32>
    tpu.vector_store %arg11[%c0_159, %c0_160], %395 {strides = array<i32>} : memref<1x256xf32, #tpu.memory_space<vmem>>, vector<1x128xf32>,
    %c0_161 = arith.constant 0 : index
    %c128_162 = arith.constant 128 : index
    %397 = vector.load %arg11[%c0_161, %c128_162] : memref<1x256xf32, #tpu.memory_space<vmem>>, vector<1x128xf32>
    tpu.vector_store %arg11[%c0_161, %c128_162], %371 {strides = array<i32>} : memref<1x256xf32, #tpu.memory_space<vmem>>, vector<1x128xf32>,
    %c0_163 = arith.constant 0 : index
    %c0_164 = arith.constant 0 : index
    %398 = vector.load %arg11[%c0_163, %c0_164] : memref<1x256xf32, #tpu.memory_space<vmem>>, vector<1x256xf32>
    %399 = arith.truncf %398 : vector<1x256xf32> to vector<1x256xbf16>
    %c0_165 = arith.constant 0 : index
    %c0_166 = arith.constant 0 : index
    %400 = vector.load %arg4[%c0_165, %c0_166] : memref<256x512xbf16, #tpu.memory_space<vmem>>, vector<256x512xbf16>
    %cst_167 = arith.constant dense<0.000000e+00> : vector<1x512xf32>
    %401 = tpu.matmul %399, %400, %cst_167 {dimension_numbers = #tpu.dot_dimension_numbers<[1], [0], [0], [1], [0, 0, 1, 1], [], []>} : vector<1x256xbf16>, vector<256x512xbf16>, vector<1x512xf32> -> vector<1x512xf32>
    %c0_168 = arith.constant 0 : index
    %c0_169 = arith.constant 0 : index
    %402 = vector.load %arg5[%c0_168, %c0_169] : memref<1x512xf32, #tpu.memory_space<vmem>>, vector<1x512xf32>
    %403 = arith.addf %401, %402 : vector<1x512xf32>
    %404 = vector.extract_strided_slice %403 {offsets = [0, 0], sizes = [1, 128], strides = [1, 1]} : vector<1x512xf32> to vector<1x128xf32>
    %405 = arith.negf %404 : vector<1x128xf32>
    %406 = math.exp %405 : vector<1x128xf32>
    %cst_170 = arith.constant 1.000000e+00 : f32
    %407 = vector.broadcast %cst_170 : f32 to vector<1x128xf32>
    %408 = arith.addf %407, %406 : vector<1x128xf32>
    %409 = arith.divf %407, %408 : vector<1x128xf32>
    %410 = vector.extract_strided_slice %403 {offsets = [0, 128], sizes = [1, 128], strides = [1, 1]} : vector<1x512xf32> to vector<1x128xf32>
    %411 = arith.negf %410 : vector<1x128xf32>
    %412 = math.exp %411 : vector<1x128xf32>
    %cst_171 = arith.constant 1.000000e+00 : f32
    %413 = vector.broadcast %cst_171 : f32 to vector<1x128xf32>
    %414 = arith.addf %413, %412 : vector<1x128xf32>
    %415 = arith.divf %413, %414 : vector<1x128xf32>
    %416 = vector.extract_strided_slice %403 {offsets = [0, 256], sizes = [1, 128], strides = [1, 1]} : vector<1x512xf32> to vector<1x128xf32>
    %417 = vector.extract_strided_slice %403 {offsets = [0, 384], sizes = [1, 128], strides = [1, 1]} : vector<1x512xf32> to vector<1x128xf32>
    %418 = arith.mulf %409, %417 : vector<1x128xf32>
    %419 = arith.addf %416, %418 : vector<1x128xf32>
    %420 = math.tanh %419 : vector<1x128xf32>
    %cst_172 = arith.constant 1.000000e+00 : f32
    %421 = vector.broadcast %cst_172 : f32 to vector<1x128xf32>
    %422 = arith.subf %421, %415 : vector<1x128xf32>
    %423 = arith.mulf %422, %420 : vector<1x128xf32>
    %424 = arith.mulf %415, %371 : vector<1x128xf32>
    %425 = arith.addf %423, %424 : vector<1x128xf32>
    %426 = arith.addi %3, %c6_i32_156 : i32
    %c6_i32_173 = arith.constant 6 : i32
    %427 = arith.cmpi slt, %426, %c6_i32_173 : i32
    %428 = arith.extui %427 : i1 to i32
    %429 = arith.sitofp %428 : i32 to f32
    %430 = vector.broadcast %429 : f32 to vector<1x128xf32>
    %431 = arith.mulf %430, %425 : vector<1x128xf32>
    %cst_174 = arith.constant 1.000000e+00 : f32
    %432 = arith.subf %cst_174, %429 : f32
    %433 = vector.broadcast %432 : f32 to vector<1x128xf32>
    %434 = arith.mulf %433, %371 : vector<1x128xf32>
    %435 = arith.addf %431, %434 : vector<1x128xf32>
    %436 = arith.truncf %435 : vector<1x128xf32> to vector<1x128xbf16>
    %c0_175 = arith.constant 0 : index
    %c0_176 = arith.constant 0 : index
    %437 = vector.load %arg6[%c0_175, %c0_176] : memref<128x128xbf16, #tpu.memory_space<vmem>>, vector<128x128xbf16>
    %cst_177 = arith.constant dense<0.000000e+00> : vector<1x128xf32>
    %438 = tpu.matmul %436, %437, %cst_177 {dimension_numbers = #tpu.dot_dimension_numbers<[1], [0], [0], [1], [0, 0, 1, 1], [], []>} : vector<1x128xbf16>, vector<128x128xbf16>, vector<1x128xf32> -> vector<1x128xf32>
    %c0_178 = arith.constant 0 : index
    %c0_179 = arith.constant 0 : index
    %439 = vector.load %arg7[%c0_178, %c0_179] : memref<1x128xf32, #tpu.memory_space<vmem>>, vector<1x128xf32>
    %440 = arith.addf %438, %439 : vector<1x128xf32>
    %cst_180 = arith.constant dense<0xFF800000> : vector<1xf32>
    %441 = vector.multi_reduction <maximumf>, %440, %cst_180 [1] : vector<1x128xf32> to vector<1xf32>
    %442 = vector.shape_cast %441 : vector<1xf32> to vector<1x1xf32>
    %443 = vector.broadcast %442 : vector<1x1xf32> to vector<1x128xf32>
    %444 = arith.subf %440, %443 : vector<1x128xf32>
    %445 = math.exp %444 : vector<1x128xf32>
    %cst_181 = arith.constant dense<0.000000e+00> : vector<1xf32>
    %446 = vector.multi_reduction <add>, %445, %cst_181 [1] : vector<1x128xf32> to vector<1xf32>
    %447 = vector.shape_cast %446 : vector<1xf32> to vector<1x1xf32>
    %448 = math.log %447 : vector<1x1xf32>
    %449 = vector.broadcast %448 : vector<1x1xf32> to vector<1x128xf32>
    %450 = arith.subf %444, %449 : vector<1x128xf32>
    %451 = arith.index_cast %c6_i32_156 : i32 to index
    %c0_182 = arith.constant 0 : index
    %452 = vector.load %arg8[%451, %c0_182] : memref<8x128xf32, #tpu.memory_space<vmem>>, vector<1x128xf32>
    tpu.vector_store %arg8[%451, %c0_182], %450 {strides = array<i32>} : memref<8x128xf32, #tpu.memory_space<vmem>>, vector<1x128xf32>,
    %c7_i32 = arith.constant 7 : i32
    %453 = arith.addi %3, %c7_i32 : i32
    %454 = arith.index_cast %453 : i32 to index
    %455 = memref.load %arg1[%454] : memref<8xi32, #tpu.memory_space<smem>>
    %456 = arith.index_cast %455 : i32 to index
    %c0_183 = arith.constant 0 : index
    %457 = vector.load %arg2[%456, %c0_183] : memref<16x128xf32, #tpu.memory_space<vmem>>, vector<1x128xf32>
    %cst_184 = arith.constant 0.000000e+00 : f32
    %458 = vector.broadcast %cst_184 : f32 to vector<1x128xf32>
    %459 = arith.maximumf %457, %458 : vector<1x128xf32>
    %c0_185 = arith.constant 0 : index
    %c0_186 = arith.constant 0 : index
    %460 = vector.load %arg11[%c0_185, %c0_186] : memref<1x256xf32, #tpu.memory_space<vmem>>, vector<1x128xf32>
    tpu.vector_store %arg11[%c0_185, %c0_186], %459 {strides = array<i32>} : memref<1x256xf32, #tpu.memory_space<vmem>>, vector<1x128xf32>,
    %c0_187 = arith.constant 0 : index
    %c128_188 = arith.constant 128 : index
    %461 = vector.load %arg11[%c0_187, %c128_188] : memref<1x256xf32, #tpu.memory_space<vmem>>, vector<1x128xf32>
    tpu.vector_store %arg11[%c0_187, %c128_188], %435 {strides = array<i32>} : memref<1x256xf32, #tpu.memory_space<vmem>>, vector<1x128xf32>,
    %c0_189 = arith.constant 0 : index
    %c0_190 = arith.constant 0 : index
    %462 = vector.load %arg11[%c0_189, %c0_190] : memref<1x256xf32, #tpu.memory_space<vmem>>, vector<1x256xf32>
    %463 = arith.truncf %462 : vector<1x256xf32> to vector<1x256xbf16>
    %c0_191 = arith.constant 0 : index
    %c0_192 = arith.constant 0 : index
    %464 = vector.load %arg4[%c0_191, %c0_192] : memref<256x512xbf16, #tpu.memory_space<vmem>>, vector<256x512xbf16>
    %cst_193 = arith.constant dense<0.000000e+00> : vector<1x512xf32>
    %465 = tpu.matmul %463, %464, %cst_193 {dimension_numbers = #tpu.dot_dimension_numbers<[1], [0], [0], [1], [0, 0, 1, 1], [], []>} : vector<1x256xbf16>, vector<256x512xbf16>, vector<1x512xf32> -> vector<1x512xf32>
    %c0_194 = arith.constant 0 : index
    %c0_195 = arith.constant 0 : index
    %466 = vector.load %arg5[%c0_194, %c0_195] : memref<1x512xf32, #tpu.memory_space<vmem>>, vector<1x512xf32>
    %467 = arith.addf %465, %466 : vector<1x512xf32>
    %468 = vector.extract_strided_slice %467 {offsets = [0, 0], sizes = [1, 128], strides = [1, 1]} : vector<1x512xf32> to vector<1x128xf32>
    %469 = arith.negf %468 : vector<1x128xf32>
    %470 = math.exp %469 : vector<1x128xf32>
    %cst_196 = arith.constant 1.000000e+00 : f32
    %471 = vector.broadcast %cst_196 : f32 to vector<1x128xf32>
    %472 = arith.addf %471, %470 : vector<1x128xf32>
    %473 = arith.divf %471, %472 : vector<1x128xf32>
    %474 = vector.extract_strided_slice %467 {offsets = [0, 128], sizes = [1, 128], strides = [1, 1]} : vector<1x512xf32> to vector<1x128xf32>
    %475 = arith.negf %474 : vector<1x128xf32>
    %476 = math.exp %475 : vector<1x128xf32>
    %cst_197 = arith.constant 1.000000e+00 : f32
    %477 = vector.broadcast %cst_197 : f32 to vector<1x128xf32>
    %478 = arith.addf %477, %476 : vector<1x128xf32>
    %479 = arith.divf %477, %478 : vector<1x128xf32>
    %480 = vector.extract_strided_slice %467 {offsets = [0, 256], sizes = [1, 128], strides = [1, 1]} : vector<1x512xf32> to vector<1x128xf32>
    %481 = vector.extract_strided_slice %467 {offsets = [0, 384], sizes = [1, 128], strides = [1, 1]} : vector<1x512xf32> to vector<1x128xf32>
    %482 = arith.mulf %473, %481 : vector<1x128xf32>
    %483 = arith.addf %480, %482 : vector<1x128xf32>
    %484 = math.tanh %483 : vector<1x128xf32>
    %cst_198 = arith.constant 1.000000e+00 : f32
    %485 = vector.broadcast %cst_198 : f32 to vector<1x128xf32>
    %486 = arith.subf %485, %479 : vector<1x128xf32>
    %487 = arith.mulf %486, %484 : vector<1x128xf32>
    %488 = arith.mulf %479, %435 : vector<1x128xf32>
    %489 = arith.addf %487, %488 : vector<1x128xf32>
    %490 = arith.addi %3, %c7_i32 : i32
    %c6_i32_199 = arith.constant 6 : i32
    %491 = arith.cmpi slt, %490, %c6_i32_199 : i32
    %492 = arith.extui %491 : i1 to i32
    %493 = arith.sitofp %492 : i32 to f32
    %494 = vector.broadcast %493 : f32 to vector<1x128xf32>
    %495 = arith.mulf %494, %489 : vector<1x128xf32>
    %cst_200 = arith.constant 1.000000e+00 : f32
    %496 = arith.subf %cst_200, %493 : f32
    %497 = vector.broadcast %496 : f32 to vector<1x128xf32>
    %498 = arith.mulf %497, %435 : vector<1x128xf32>
    %499 = arith.addf %495, %498 : vector<1x128xf32>
    %500 = arith.truncf %499 : vector<1x128xf32> to vector<1x128xbf16>
    %c0_201 = arith.constant 0 : index
    %c0_202 = arith.constant 0 : index
    %501 = vector.load %arg6[%c0_201, %c0_202] : memref<128x128xbf16, #tpu.memory_space<vmem>>, vector<128x128xbf16>
    %cst_203 = arith.constant dense<0.000000e+00> : vector<1x128xf32>
    %502 = tpu.matmul %500, %501, %cst_203 {dimension_numbers = #tpu.dot_dimension_numbers<[1], [0], [0], [1], [0, 0, 1, 1], [], []>} : vector<1x128xbf16>, vector<128x128xbf16>, vector<1x128xf32> -> vector<1x128xf32>
    %c0_204 = arith.constant 0 : index
    %c0_205 = arith.constant 0 : index
    %503 = vector.load %arg7[%c0_204, %c0_205] : memref<1x128xf32, #tpu.memory_space<vmem>>, vector<1x128xf32>
    %504 = arith.addf %502, %503 : vector<1x128xf32>
    %cst_206 = arith.constant dense<0xFF800000> : vector<1xf32>
    %505 = vector.multi_reduction <maximumf>, %504, %cst_206 [1] : vector<1x128xf32> to vector<1xf32>
    %506 = vector.shape_cast %505 : vector<1xf32> to vector<1x1xf32>
    %507 = vector.broadcast %506 : vector<1x1xf32> to vector<1x128xf32>
    %508 = arith.subf %504, %507 : vector<1x128xf32>
    %509 = math.exp %508 : vector<1x128xf32>
    %cst_207 = arith.constant dense<0.000000e+00> : vector<1xf32>
    %510 = vector.multi_reduction <add>, %509, %cst_207 [1] : vector<1x128xf32> to vector<1xf32>
    %511 = vector.shape_cast %510 : vector<1xf32> to vector<1x1xf32>
    %512 = math.log %511 : vector<1x1xf32>
    %513 = vector.broadcast %512 : vector<1x1xf32> to vector<1x128xf32>
    %514 = arith.subf %508, %513 : vector<1x128xf32>
    %515 = arith.index_cast %c7_i32 : i32 to index
    %c0_208 = arith.constant 0 : index
    %516 = vector.load %arg8[%515, %c0_208] : memref<8x128xf32, #tpu.memory_space<vmem>>, vector<1x128xf32>
    tpu.vector_store %arg8[%515, %c0_208], %514 {strides = array<i32>} : memref<8x128xf32, #tpu.memory_space<vmem>>, vector<1x128xf32>,
    %c8_i32_209 = arith.constant 8 : i32
    %c0_210 = arith.constant 0 : index
    %c0_211 = arith.constant 0 : index
    %517 = vector.load %arg10[%c0_210, %c0_211] : memref<1x128xf32, #tpu.memory_space<vmem>>, vector<1x128xf32>
    tpu.vector_store %arg10[%c0_210, %c0_211], %499 {strides = array<i32>} : memref<1x128xf32, #tpu.memory_space<vmem>>, vector<1x128xf32>,
    %c0_i32_212 = arith.constant 0 : i32
    %518 = arith.cmpi eq, %arg0, %c0_i32_212 : i32
    %519 = arith.extui %518 : i1 to i32
    %c0_i32_213 = arith.constant 0 : i32
    %520 = arith.cmpi ne, %519, %c0_i32_213 : i32
    scf.if %520 {
      %c0_214 = arith.constant 0 : index
      %c0_215 = arith.constant 0 : index
      %521 = vector.load %arg9[%c0_214, %c0_215] : memref<1x128xf32, #tpu.memory_space<vmem>>, vector<1x128xf32>
      tpu.vector_store %arg9[%c0_214, %c0_215], %499 {strides = array<i32>} : memref<1x128xf32, #tpu.memory_space<vmem>>, vector<1x128xf32>,
    } else {
    }
    return
  }
  func.func @transform_0(%arg0: i32, %arg1: memref<8xi32, #tpu.memory_space<smem>>) -> (i32, i32) {
    %c0_i32 = arith.constant 0 : i32
    %c0_i32_0 = arith.constant 0 : i32
    %c0_i32_1 = arith.constant 0 : i32
    return %c0_i32, %c0_i32_0 : i32, i32
  }
  func.func @transform_1(%arg0: i32, %arg1: memref<8xi32, #tpu.memory_space<smem>>) -> (i32, i32) {
    %c0_i32 = arith.constant 0 : i32
    %c0_i32_0 = arith.constant 0 : i32
    %c0_i32_1 = arith.constant 0 : i32
    return %c0_i32, %c0_i32_0 : i32, i32
  }
  func.func @transform_2(%arg0: i32, %arg1: memref<8xi32, #tpu.memory_space<smem>>) -> (i32, i32) {
    %c0_i32 = arith.constant 0 : i32
    %c0_i32_0 = arith.constant 0 : i32
    %c0_i32_1 = arith.constant 0 : i32
    return %c0_i32, %c0_i32_0 : i32, i32
  }
  func.func @transform_3(%arg0: i32, %arg1: memref<8xi32, #tpu.memory_space<smem>>) -> (i32, i32) {
    %c0_i32 = arith.constant 0 : i32
    %c0_i32_0 = arith.constant 0 : i32
    %c0_i32_1 = arith.constant 0 : i32
    return %c0_i32, %c0_i32_0 : i32, i32
  }
  func.func @transform_4(%arg0: i32, %arg1: memref<8xi32, #tpu.memory_space<smem>>) -> (i32, i32) {
    %c0_i32 = arith.constant 0 : i32
    %c0_i32_0 = arith.constant 0 : i32
    %c0_i32_1 = arith.constant 0 : i32
    return %c0_i32, %c0_i32_0 : i32, i32
  }
  func.func @transform_5(%arg0: i32, %arg1: memref<8xi32, #tpu.memory_space<smem>>) -> (i32, i32) {
    %c0_i32 = arith.constant 0 : i32
    %c0_i32_0 = arith.constant 0 : i32
    %c0_i32_1 = arith.constant 0 : i32
    return %c0_i32, %c0_i32_0 : i32, i32
  }
  func.func @transform_6(%arg0: i32, %arg1: memref<8xi32, #tpu.memory_space<smem>>) -> (i32, i32) {
    %c0_i32 = arith.constant 0 : i32
    %c0_i32_0 = arith.constant 0 : i32
    return %arg0, %c0_i32 : i32, i32
  }
  func.func @transform_7(%arg0: i32, %arg1: memref<8xi32, #tpu.memory_space<smem>>) -> (i32, i32) {
    %c0_i32 = arith.constant 0 : i32
    %c0_i32_0 = arith.constant 0 : i32
    %c0_i32_1 = arith.constant 0 : i32
    return %c0_i32, %c0_i32_0 : i32, i32
  }
}

</mosaic_0001>

<bundles_post_ra>
// kernel: tpu_custom_call.1
= control target key start
LH: loop header
LB: loop body
LE: loop exit
PB: predicated region body
PF: predicated region fallthrough
CT: control target
= control target key end

     0   :  { %s8332_s0 = inlined_call_operand.hbm [shape: s32[8], index: 0, kind: input, shape index: {}]   ;;  %s8333_s1 = inlined_call_operand.hbm [shape: f32[16,128], index: 1, kind: input, shape index: {}]   ;;  %s8334_s2 = inlined_call_operand.vmem [shape: f32[1,128], index: 2, kind: input, shape index: {}]   ;;  %s8335_s3 = inlined_call_operand.hbm [shape: bf16[256,512], index: 3, kind: input, shape index: {}]   ;;  %s8336_s4 = inlined_call_operand.vmem [shape: f32[1,512], index: 4, kind: input, shape index: {}]   ;;  %s8337_s5 = inlined_call_operand.hbm [shape: bf16[128,128], index: 5, kind: input, shape index: {}]   ;;  %s8338_s6 = inlined_call_operand.vmem [shape: f32[1,128], index: 6, kind: input, shape index: {}]   ;;  %s8339_s7 = inlined_call_operand.hbm [shape: f32[8,128], index: 7, kind: output, shape index: {0}]   ;;  %s8340_s8 = inlined_call_operand.hbm [shape: f32[1,128], index: 8, kind: output, shape index: {1}]  }
   0x1   :  { %s6802_s29 = scalar_lea.hbm %s8332_s0, 16 }
   0x2   :  { %p6803_p0 = scmp.ne.s32.totalorder %s8332_s0, %s6802_s29  ;;  %p6806_p1 = scmp.lt.u32.totalorder %s6802_s29, %s8332_s0 }
   0x4   :  { %p6808_p2 = pnand %p6806_p1, %p6803_p0 }
   0x6   :  { %6811 = shalt.err (!%p6808_p2)  }
   0x7   :  { %s6932_s12 = smov [#allocation5]  }
   0x8   :  { %15 = dma.hbm_to_smem %s8332_s0, 16, %s6932_s12, [#allocation4] }
   0x9   :  { %6922 = dma.done.wait [#allocation4], 16 }
   0xa   :  { %6923 = vsyncadd [#allocation4], 4294967280 }
   0xb   :  { %17 = sfence }
   0xc   :  { %18 = vsyncpa [#allocation7], 0 }
   0xd   :  { %19 = vsyncpa [#allocation10], 0 }
   0xe   :  { %20 = vsyncpa [#allocation8], 0 }
   0xf   :  { %21 = vsyncpa [#allocation14], 0  ;;  %s6933_s15 = smov [#allocation9]   ;;  %s6812_s19 = scalar_lea.hbm %s8335_s3, 8192 }
  0x10   :  { %s41_s16 = sshll.u32 %s6933_s15, 4  ;;  %p6813_p3 = scmp.ne.s32.totalorder %s8335_s3, %s6812_s19  ;;  %s42_s16 = int_to_ptr.vmem [resolvable:$true] %s41_s16 }
  0x11   :  { %p6816_p4 = scmp.lt.u32.totalorder %s6812_s19, %s8335_s3 }
  0x13   :  { %p6818_p5 = pnand %p6816_p4, %p6813_p3 }
  0x15   :  { %6821 = shalt.err (!%p6818_p5)
}
  0x16   :  { %s6822_s23 = scalar_lea.vmem %s42_s16, 8192  ;;  %p6827_p7 = scmp.lt.s32.totalorder %s42_s16, %s42_s16 }
  0x17   :  { %p6823_p6 = scmp.ne.s32.totalorder %s42_s16, %s6822_s23  ;;  %p6828_p8 = scmp.lt.s32.totalorder %s6822_s23, %s6822_s23 }
  0x19   :  { %p6829_p9 = por %p6828_p8, %p6827_p7 }
  0x1b   :  { %p6830_p10 = pnand %p6829_p9, %p6823_p6 }
  0x1d   :  { %6833 = shalt.err (!%p6830_p10)
}
  0x1e   :  { %s6934_s24 = smov 256   ;;  %s6935_s25 = smov 16  }
  0x1f   :  { %47 = dma.hbm_to_vmem [thread:$0]  %s8335_s3, 8192, %s42_s16, [#allocation10], %s6934_s24, %s6934_s24, %s6935_s25  }
  0x20   :  { %s6936_s28 = smov [#allocation6]   ;;  %s6834_s10 = scalar_lea.hbm %s8333_s1, 256 }
  0x21   :  { %s27_s29 = sshll.u32 %s6936_s28, 4  ;;  %p6835_p11 = scmp.ne.s32.totalorder %s8333_s1, %s6834_s10  ;;  %s28_s29 = int_to_ptr.vmem [resolvable:$true] %s27_s29 }
  0x22   :  { %p6838_p12 = scmp.lt.u32.totalorder %s6834_s10, %s8333_s1 }
  0x24   :  { %p6840_p13 = pnand %p6838_p12, %p6835_p11 }
  0x26   :  { %6843 = shalt.err (!%p6840_p13)
}
  0x27   :  { %s6844_s15 = scalar_lea.vmem %s28_s29, 256  ;;  %p6849_p1 = scmp.lt.s32.totalorder %s28_s29, %s28_s29 }
  0x28   :  { %p6845_p0 = scmp.ne.s32.totalorder %s28_s29, %s6844_s15  ;;  %p6850_p2 = scmp.lt.s32.totalorder %s6844_s15, %s6844_s15 }
  0x2a   :  { %p6851_p3 = por %p6850_p2, %p6849_p1 }
  0x2c   :  { %p6852_p4 = pnand %p6851_p3, %p6845_p0 }
  0x2e   :  { %6855 = shalt.err (!%p6852_p4)
}
  0x2f   :  { %s6937_s3 = smov 128   ;;  %s6938_s16 = smov 8  }
  0x30   :  { %33 = dma.hbm_to_vmem [thread:$0]  %s8333_s1, 256, %s28_s29, [#allocation7], %s6937_s3, %s6937_s3, %s6938_s16  }
  0x31   :  { %s6939_s19 = smov [#allocation11]   ;;  %s6856_s0 = scalar_lea.hbm %s8337_s5, 1024 }
  0x32   :  { %s55_s20 = sshll.u32 %s6939_s19, 4  ;;  %p6857_p5 = scmp.ne.s32.totalorder %s8337_s5, %s6856_s0  ;;  %s56_s20 = int_to_ptr.vmem [resolvable:$true] %s55_s20 }
  0x33   :  { %p6860_p6 = scmp.lt.u32.totalorder %s6856_s0, %s8337_s5 }
  0x35   :  { %p6862_p7 = pnand %p6860_p6, %p6857_p5 }
  0x37   :  { %6865 = shalt.err (!%p6862_p7)
}
  0x38   :  { %s6866_s27 = scalar_lea.vmem %s56_s20, 1024  ;;  %p6871_p9 = scmp.lt.s32.totalorder %s56_s20, %s56_s20 }
  0x39   :  { %p6867_p8 = scmp.ne.s32.totalorder %s56_s20, %s6866_s27  ;;  %p6872_p10 = scmp.lt.s32.totalorder %s6866_s27, %s6866_s27 }
  0x3b   :  { %p6873_p11 = por %p6872_p10, %p6871_p9 }
  0x3d   :  { %p6874_p12 = pnand %p6873_p11, %p6867_p8 }
  0x3f   :  { %6877 = shalt.err (!%p6874_p12)
}
  0x40   :  { %s6940_s1 = smov 64   ;;  %s6941_s28 = smov 4  }
  0x41   :  { %61 = dma.hbm_to_vmem [thread:$0]  %s8337_s5, 1024, %s56_s20, [#allocation10], %s6940_s1, %s6940_s1, %s6941_s28  }
  0x42   :  { %6924 = dma.done.wait [#allocation7], 256  }
  0x43   :  { %6925 = vsyncadd [#allocation7], 4294967040 }
  0x44   :  { %6926 = dma.done.wait [#allocation10], 9216  }
  0x45   :  { %6927 = vsyncadd [#allocation10], 4294958080  ;;  %v7039_v0 = vld [vmem:[#allocation9 + $0x4] ss:$16 sps:$4 sm:$0xff]   ;;  %v7041_v1 = vld [vmem:[#allocation9] ss:$16 sps:$4 sm:$0xff]   ;;  %v86_v34 = vlaneseq }
  0x46   :  { %512 = vmatprep.subr.bf16.mxu0 %v7039_v0  ;;  %v7044_v2 = vld [vmem:[#allocation9 + $0x24] ss:$16 sps:$4 sm:$0xff]   ;;  %v7047_v3 = vld [vmem:[#allocation9 + $0x20] ss:$16 sps:$4 sm:$0xff]   ;;  %v6240_v7 = vld [vmem:[#allocation9 + $0xc] ss:$16 sps:$4 sm:$0xff]  }
  0x47   :  { %513 = vmatpush1.bf16.msra.mxu0 %v7041_v1  ;;  %v7050_v4 = vld [vmem:[#allocation9 + $0x44] ss:$16 sps:$4 sm:$0xff]   ;;  %v7053_v5 = vld [vmem:[#allocation9 + $0x40] ss:$16 sps:$4 sm:$0xff]   ;;  %v6242_v8 = vld [vmem:[#allocation9 + $0x8] ss:$16 sps:$4 sm:$0xff]   ;;  %553 = vmatprep.subr.bf16.mxu1 %v6240_v7 }
  0x48   :  { %514 = vmatprep.subr.bf16.mxu0 %v7044_v2  ;;  %v7055_v6 = vld [vmem:[#allocation9 + $0x64] ss:$16 sps:$4 sm:$0xff]   ;;  %v7058_v9 = vld [vmem:[#allocation9 + $0x60] ss:$16 sps:$4 sm:$0xff]   ;;  %554 = vmatpush1.bf16.msra.mxu1 %v6242_v8  ;;  %v6246_v10 = vld [vmem:[#allocation9 + $0x2c] ss:$16 sps:$4 sm:$0xff]  }
  0x49   :  { %v6248_v11 = vld [vmem:[#allocation9 + $0x28] ss:$16 sps:$4 sm:$0xff]   ;;  %v7062_v12 = vld [vmem:[#allocation9 + $0x84] ss:$16 sps:$4 sm:$0xff]   ;;  %555 = vmatprep.subr.bf16.mxu1 %v6246_v10  ;;  %v7064_v13 = vld [vmem:[#allocation9 + $0x80] ss:$16 sps:$4 sm:$0xff]  }
  0x4a   :  { %v6252_v14 = vld [vmem:[#allocation9 + $0x4c] ss:$16 sps:$4 sm:$0xff]   ;;  %v7067_v15 = vld [vmem:[#allocation9 + $0xa4] ss:$16 sps:$4 sm:$0xff]   ;;  %v6254_v16 = vld [vmem:[#allocation9 + $0x48] ss:$16 sps:$4 sm:$0xff]  }
  0x4b   :  { %515 = vmatpush1.bf16.msra.mxu0 %v7047_v3  ;;  %v6258_v17 = vld [vmem:[#allocation9 + $0x6c] ss:$16 sps:$4 sm:$0xff]   ;;  %v7070_v18 = vld [vmem:[#allocation9 + $0xa0] ss:$16 sps:$4 sm:$0xff]   ;;  %v7073_v19 = vld [vmem:[#allocation9 + $0xc4] ss:$16 sps:$4 sm:$0xff]  }
  0x4c   :  { %516 = vmatprep.subr.bf16.mxu0 %v7050_v4  ;;  %556 = vmatpush1.bf16.msra.mxu1 %v6248_v11  ;;  %v6260_v20 = vld [vmem:[#allocation9 + $0x68] ss:$16 sps:$4 sm:$0xff]   ;;  %v6264_v21 = vld [vmem:[#allocation9 + $0x8c] ss:$16 sps:$4 sm:$0xff]   ;;  %v7076_v22 = vld [vmem:[#allocation9 + $0xc0] ss:$16 sps:$4 sm:$0xff]  }
  0x4d   :  { %557 = vmatprep.subr.bf16.mxu1 %v6252_v14  ;;  %v7079_v23 = vld [vmem:[#allocation9 + $0xe4] ss:$16 sps:$4 sm:$0xff]   ;;  %v6266_v24 = vld [vmem:[#allocation9 + $0x88] ss:$16 sps:$4 sm:$0xff]   ;;  %v6270_v25 = vld [vmem:[#allocation9 + $0xac] ss:$16 sps:$4 sm:$0xff]  }
  0x4e   :  { %s7082_s5 = sld [smem:[#allocation5]]  ;;  %v7084_v26 = vld [vmem:[#allocation9 + $0xe0] ss:$16 sps:$4 sm:$0xff]   ;;  %v7087_v27 = vld [vmem:[#allocation9 + $0x104] ss:$16 sps:$4 sm:$0xff]   ;;  %vm7106_vm0 = vcmp.lt.s32.totalorder %v86_v34, 128 }
  0x4f   :  { %517 = vmatpush1.bf16.msra.mxu0 %v7053_v5  ;;  %v6272_v28 = vld [vmem:[#allocation9 + $0xa8] ss:$16 sps:$4 sm:$0xff]   ;;  %v6276_v29 = vld [vmem:[#allocation9 + $0xcc] ss:$16 sps:$4 sm:$0xff]   ;;  %v7090_v30 = vld [vmem:[#allocation9 + $0x100] ss:$16 sps:$4 sm:$0xff]  }
  0x50   :  { %518 = vmatprep.subr.bf16.mxu0 %v7055_v6  ;;  %558 = vmatpush1.bf16.msra.mxu1 %v6254_v16  ;;  %v7093_v31 = vld [vmem:[#allocation9 + $0x124] ss:$16 sps:$4 sm:$0xff]   ;;  %v6278_v32 = vld [vmem:[#allocation9 + $0xc8] ss:$16 sps:$4 sm:$0xff]   ;;  %v6282_v33 = vld [vmem:[#allocation9 + $0xec] ss:$16 sps:$4 sm:$0xff]  }
  0x51   :  { %559 = vmatprep.subr.bf16.mxu1 %v6258_v17  ;;  %v7096_v35 = vld [vmem:[#allocation9 + $0x120] ss:$16 sps:$4 sm:$0xff]   ;;  %v7098_v36 = vld [vmem:[#allocation9 + $0x144] ss:$16 sps:$4 sm:$0xff]   ;;  %v6284_v37 = vld [vmem:[#allocation9 + $0xe8] ss:$16 sps:$4 sm:$0xff]  }
  0x52   :  { %v6288_v38 = vld [vmem:[#allocation9 + $0x10c] ss:$16 sps:$4 sm:$0xff]   ;;  %v78_v39 = vld [vmem:[%s8334_s2] sm:$0x1]  ;;  %v7110_v43 = vld [vmem:[#allocation9 + $0x140] ss:$16 sps:$4 sm:$0xff]  }
  0x53   :  { %519 = vmatpush1.bf16.msra.mxu0 %v7058_v9  ;;  %79 = vst [vmem:[#allocation2] sm:$0x1] %v78_v39  ;;  %v7112_v44 = vld [vmem:[#allocation9 + $0x164] ss:$16 sps:$4 sm:$0xff]   ;;  %v7114_v45 = vshrl.u32 %v86_v34, 7  ;;  %v147_v51 = vld [vmem:[#allocation9 + $0x148] sm:$0xff] }
  0x54   :  { %520 = vmatprep.subr.bf16.mxu0 %v7062_v12  ;;  %560 = vmatpush1.bf16.msra.mxu1 %v6260_v20  ;;  %s83_s11 = scalar_lea.vmem [#allocation6], %s7082_s5  ;;  %v6290_v46 = vld [vmem:[#allocation9 + $0x108] ss:$16 sps:$4 sm:$0xff]   ;;  %v6294_v47 = vld [vmem:[#allocation9 + $0x12c] ss:$16 sps:$4 sm:$0xff]   ;;  %s5451_s2 = sld [smem:[#allocation5 + $0x1]] }
  0x55   :  { %561 = vmatprep.subr.bf16.mxu1 %v6264_v21  ;;  %v84_v40 = vld [vmem:[%s83_s11] sm:$0x1]  ;;  %v7120_v48 = vld [vmem:[#allocation9 + $0x160] ss:$16 sps:$4 sm:$0xff]   ;;  %v6296_v49 = vld [vmem:[#allocation9 + $0x128] ss:$16 sps:$4 sm:$0xff]  }
  0x56   :  { %v85_v42 = vmax.f32 %v84_v40, 0.0  ;;  %v7122_v50 = vld [vmem:[#allocation9 + $0x184] ss:$16 sps:$4 sm:$0xff]   ;;  %v149_v52 = vld [vmem:[#allocation9 + $0x158] sm:$0xff]  ;;  %v7125_v53 = vsub.s32 1, %v7114_v45  ;;  %v7160_v17 = vsub.s32 0, %v7114_v45 }
  0x57   :  { %521 = vmatpush1.bf16.msra.mxu0 %v7064_v13  ;;  %v6300_v54 = vld [vmem:[#allocation9 + $0x14c] ss:$16 sps:$4 sm:$0xff]   ;;  %v7134_v56 = vld [vmem:[#allocation9 + $0x180] ss:$16 sps:$4 sm:$0xff]   ;;  %v7136_v57 = vld [vmem:[#allocation9 + $0x1a4] ss:$16 sps:$4 sm:$0xff]   ;;  %v7141_v59 = vcombine.low %v147_v51, %v149_v52 }
  0x58   :  { %522 = vmatprep.subr.bf16.mxu0 %v7067_v15  ;;  %562 = vmatpush1.bf16.msra.mxu1 %v6266_v24  ;;  %90 = vst.msk [vmem:[#allocation3] sm:$0x1] %vm7106_vm0, %v85_v42  ;;  %v7138_v58 = vld [vmem:[#allocation9 + $0x16c] ss:$16 sps:$4 sm:$0xff]   ;;  %v7144_v60 = vld [vmem:[#allocation9 + $0x1a0] ss:$16 sps:$4 sm:$0xff]  }
  0x59   :  { %563 = vmatprep.subr.bf16.mxu1 %v6270_v25  ;;  %v7146_v61 = vld [vmem:[#allocation9 + $0x168] ss:$16 sps:$4 sm:$0xff]   ;;  %v7148_v62 = vld [vmem:[#allocation9 + $0x1c4] ss:$16 sps:$4 sm:$0xff]   ;;  %v7152_v7 = vld [vmem:[#allocation9 + $0x18c] ss:$16 sps:$4 sm:$0xff]  }
  0x5a   :  { %v7128_v55 = vld [vmem:[#allocation2] sm:$0x1]  ;;  %v6293_v10 = vld [vmem:[#allocation9 + $0x1c0] ss:$16 sps:$4 sm:$0xff]   ;;  %v7157_v11 = vld [vmem:[#allocation9 + $0x188] ss:$16 sps:$4 sm:$0xff]  }
  0x5b   :  { %523 = vmatpush1.bf16.msra.mxu0 %v7070_v18  ;;  %91 = vst.msk [vmem:[#allocation3 + $0x1] sm:$0x1] %vm7106_vm0, %v7128_v55  ;;  %v6297_v14 = vld [vmem:[#allocation9 + $0x1e4] ss:$16 sps:$4 sm:$0xff]   ;;  %v7162_v20 = vld [vmem:[#allocation9 + $0x1ac] ss:$16 sps:$4 sm:$0xff]  }
  0x5c   :  { %524 = vmatprep.subr.bf16.mxu0 %v7073_v19  ;;  %564 = vmatpush1.bf16.msra.mxu1 %v6272_v28  ;;  %v6299_v21 = vld [vmem:[#allocation9 + $0x1e0] ss:$16 sps:$4 sm:$0xff]   ;;  %v7168_v24 = vld [vmem:[#allocation9 + $0x1a8] ss:$16 sps:$4 sm:$0xff]   ;;  %v7171_v28 = vld [vmem:[#allocation9 + $0x1cc] ss:$16 sps:$4 sm:$0xff]  }
  0x5d   :  { %565 = vmatprep.subr.bf16.mxu1 %v6276_v29  ;;  %v7175_v29 = vld [vmem:[#allocation9 + $0x1c8] ss:$16 sps:$4 sm:$0xff]   ;;  %vm6943_vm1 = vmmov 0   ;;  %s744_s12 = scalar_lea.vmem [#allocation6], %s5451_s2  ;;  %s5526_s15 = sld [smem:[#allocation5 + $0x2]]  ;;  %vm728_vm2 = vcmask 1040384  }
  0x5e   :  { %v7181_v34 = vld [vmem:[#allocation9 + $0x1e8] ss:$16 sps:$4 sm:$0xff]   ;;  %s5601_s20 = sld [smem:[#allocation5 + $0x3]]  ;;  %s5676_s25 = sld [smem:[#allocation5 + $0x4]] }
  0x5f   :  { %525 = vmatpush1.bf16.msra.mxu0 %v7076_v22  ;;  %s5751_s30 = sld [smem:[#allocation5 + $0x5]]  ;;  %s5901_s17 = sld [smem:[#allocation5 + $0x7]] }
  0x60   :  { %526 = vmatprep.subr.bf16.mxu0 %v7079_v23  ;;  %566 = vmatpush1.bf16.msra.mxu1 %v6278_v32 }
  0x61   :  { %567 = vmatprep.subr.bf16.mxu1 %v6282_v33  ;;  %v7177_v33 = vld [vmem:[#allocation9 + $0x1ec] ss:$16 sps:$4 sm:$0xff]  }
  0x62   :  { %v92_v63 = vld [vmem:[#allocation3] sm:$0x3] }
  0x63   :  { %527 = vmatpush1.bf16.msra.mxu0 %v7084_v26  ;;  %v101_v8 = vrot.slane %v92_v63, %v7125_v53  ;;  %v97_v25 = vrot.slane %v92_v63, %v7160_v17  ;;  %s1400_s3 = scalar_lea.vmem [#allocation6], %s5526_s15 }
  0x64   :  { %528 = vmatprep.subr.bf16.mxu0 %v7087_v27  ;;  %568 = vmatpush1.bf16.msra.mxu1 %v6284_v37  ;;  %s2056_s21 = scalar_lea.vmem [#allocation6], %s5601_s20  ;;  %s2712_s26 = scalar_lea.vmem [#allocation6], %s5676_s25 }
  0x65   :  { %569 = vmatprep.subr.bf16.mxu1 %v6288_v38  ;;  %v105_v16 = vpack.c.bf16 %v101_v8, %v101_v8  ;;  %v104_v32 = vpack.c.bf16 %v97_v25, %v97_v25  ;;  %s3368_s5 = scalar_lea.vmem [#allocation6], %s5751_s30  ;;  %s4680_s18 = scalar_lea.vmem [#allocation6], %s5901_s17 }
  0x67   :  { %529 = vmatpush1.bf16.msra.mxu0 %v7090_v30  ;;  %544 = vmatprep.mubr.bf16.mxu0 %v105_v16 }
  0x68   :  { %530 = vmatprep.subr.bf16.mxu0 %v7093_v31  ;;  %570 = vmatpush1.bf16.msra.mxu1 %v6290_v46 }
  0x69   :  { %571 = vmatprep.subr.bf16.mxu1 %v6294_v47  ;;  %585 = vmatprep.mubr.bf16.mxu1 %v105_v16  ;;  %v7234_v47 = vsub.s32 3, %v7114_v45  ;;  %v620_v16 = vmul.f32 0.0, %v7128_v55 }
  0x6b   :  { %531 = vmatpush1.bf16.msra.mxu0 %v7096_v35 }
  0x6c   :  { %532 = vmatprep.subr.bf16.mxu0 %v7098_v36  ;;  %572 = vmatpush1.bf16.msra.mxu1 %v6296_v49 }
  0x6d   :  { %573 = vmatprep.subr.bf16.mxu1 %v6300_v54 }
  0x6f   :  { %533 = vmatpush1.bf16.msra.mxu0 %v7110_v43 }
  0x70   :  { %534 = vmatprep.subr.bf16.mxu0 %v7112_v44  ;;  %574 = vmatpush1.bf16.msra.mxu1 %v7141_v59 }
  0x71   :  { %575 = vmatprep.subr.bf16.mxu1 %v7138_v58 }
  0x73   :  { %535 = vmatpush1.bf16.msra.mxu0 %v7120_v48 }
  0x74   :  { %536 = vmatprep.subr.bf16.mxu0 %v7122_v50  ;;  %576 = vmatpush1.bf16.msra.mxu1 %v7146_v61 }
  0x75   :  { %577 = vmatprep.subr.bf16.mxu1 %v7152_v7 }
  0x77   :  { %537 = vmatpush1.bf16.msra.mxu0 %v7134_v56 }
  0x78   :  { %538 = vmatprep.subr.bf16.mxu0 %v7136_v57  ;;  %578 = vmatpush1.bf16.msra.mxu1 %v7157_v11 }
  0x79   :  { %579 = vmatprep.subr.bf16.mxu1 %v7162_v20 }
  0x7b   :  { %539 = vmatpush1.bf16.msra.mxu0 %v7144_v60 }
  0x7c   :  { %540 = vmatprep.subr.bf16.mxu0 %v7148_v62  ;;  %580 = vmatpush1.bf16.msra.mxu1 %v7168_v24 }
  0x7d   :  { %581 = vmatprep.subr.bf16.mxu1 %v7171_v28 }
  0x7f   :  { %541 = vmatpush1.bf16.msra.mxu0 %v6293_v10 }
  0x80   :  { %542 = vmatprep.subr.bf16.mxu0 %v6297_v14  ;;  %582 = vmatpush1.bf16.msra.mxu1 %v7175_v29 }
  0x81   :  { %583 = vmatprep.subr.bf16.mxu1 %v7177_v33 }
  0x83   :  { %543 = vmatpush1.bf16.msra.mxu0 %v6299_v21 }
  0x84   :  { %584 = vmatpush1.bf16.msra.mxu1 %v7181_v34 }
  0x85   :  { %1169 = vmatprep.subr.bf16.mxu1 %v7039_v0  ;;  %v6317_v0 = vld [vmem:[#allocation11] sm:$0xff]  }
  0x86   :  { %545 = vmatmul.mubr.bf16.vlgmr.msra.gmra.mrb[0].mxu0 %v104_v32 }
  0x87   :  { %586 = vmatmul.mubr.bf16.vlgmr.msra.gmra.mrb[0].mxu1 %v104_v32 }
  0x88   :  { %1170 = vmatpush1.bf16.msra.mxu1 %v7041_v1  ;;  %v8341_v1 = vmov 0.0  }
  0x89   :  { %1171 = vmatprep.subr.bf16.mxu1 %v7044_v2  ;;  %6048 = vmatprep.subr.bf16.mxu0 %v8341_v1  ;;  %v6318_v2 = vld [vmem:[#allocation11 + $0x8] sm:$0xff]  }
  0x8a   :  { %6049 = vmatpush3.bf16.msra.mxu0 %v6317_v0  ;;  %6064 = vmatprep.mubr.msk.bf16.mxu0 %vm6943_vm1, %v8341_v1  ;;  %v6782_v0 = vld [vmem:[#allocation9 + $0x8] ss:$16 sps:$4 sm:$0xff]  }
  0x8b   :  { %6050 = vmatprep.subr.bf16.mxu0 %v8341_v1 }
  0x8c   :  { %1172 = vmatpush1.bf16.msra.mxu1 %v7047_v3  ;;  %v6319_v3 = vld [vmem:[#allocation11 + $0x10] sm:$0xff]  }
  0x8d   :  { %1173 = vmatprep.subr.bf16.mxu1 %v7050_v4  ;;  %v6320_v4 = vld [vmem:[#allocation11 + $0x18] sm:$0xff]  }
  0x8e   :  { %6051 = vmatpush3.bf16.msra.mxu0 %v6318_v2  ;;  %v6783_v2 = vld [vmem:[#allocation9 + $0x2c] ss:$16 sps:$4 sm:$0xff]  }
  0x8f   :  { %6052 = vmatprep.subr.bf16.mxu0 %v8341_v1 }
  0x90   :  { %1174 = vmatpush1.bf16.msra.mxu1 %v7053_v5  ;;  %v6321_v5 = vld [vmem:[#allocation11 + $0x20] sm:$0xff]  }
  0x91   :  { %1175 = vmatprep.subr.bf16.mxu1 %v7055_v6  ;;  %v6322_v6 = vld [vmem:[#allocation11 + $0x28] sm:$0xff]  }
  0x92   :  { %6053 = vmatpush3.bf16.msra.mxu0 %v6319_v3  ;;  %v6784_v3 = vld [vmem:[#allocation9 + $0x28] ss:$16 sps:$4 sm:$0xff]  }
  0x93   :  { %6054 = vmatprep.subr.bf16.mxu0 %v8341_v1 }
  0x94   :  { %1176 = vmatpush1.bf16.msra.mxu1 %v7058_v9  ;;  %v6323_v9 = vld [vmem:[#allocation11 + $0x30] sm:$0xff]  }
  0x95   :  { %1177 = vmatprep.subr.bf16.mxu1 %v7062_v12  ;;  %v6324_v12 = vld [vmem:[#allocation11 + $0x38] sm:$0xff]  }
  0x96   :  { %6055 = vmatpush3.bf16.msra.mxu0 %v6320_v4 }
  0x97   :  { %6056 = vmatprep.subr.bf16.mxu0 %v8341_v1 }
  0x98   :  { %1178 = vmatpush1.bf16.msra.mxu1 %v7064_v13  ;;  %v745_v13 = vld [vmem:[%s744_s12] sm:$0x1]  ;;  %s5826_s12 = sld [smem:[#allocation5 + $0x6]] }
  0x99   :  { %1179 = vmatprep.subr.bf16.mxu1 %v7067_v15  ;;  %v6781_v15 = vld [vmem:[#allocation9 + $0xc] ss:$16 sps:$4 sm:$0xff]  }
  0x9a   :  { %6057 = vmatpush3.bf16.msra.mxu0 %v6321_v5  ;;  %v6785_v5 = vld [vmem:[#allocation9 + $0x4c] ss:$16 sps:$4 sm:$0xff]  }
  0x9b   :  { %6058 = vmatprep.subr.bf16.mxu0 %v8341_v1 }
  0x9c   :  { %1180 = vmatpush1.bf16.msra.mxu1 %v7070_v18  ;;  %v746_v18 = vmax.f32 %v745_v13, 0.0  ;;  %v6786_v13 = vld [vmem:[#allocation9 + $0x48] ss:$16 sps:$4 sm:$0xff]  }
  0x9d   :  { %1181 = vmatprep.subr.bf16.mxu1 %v7073_v19  ;;  %v170_v19 = vld [vmem:[%s8336_s4] sm:$0xf] }
  0x9e   :  { %6059 = vmatpush3.bf16.msra.mxu0 %v6322_v6  ;;  %747 = vst.msk [vmem:[#allocation3] sm:$0x1] %vm7106_vm0, %v746_v18  ;;  %v507_v49 = vrot.slane %v170_v19, %v7234_v47  ;;  %v6788_v18 = vld [vmem:[#allocation9 + $0x68] ss:$16 sps:$4 sm:$0xff]   ;;  %s4024_s13 = scalar_lea.vmem [#allocation6], %s5826_s12 }
  0x9f   :  { %6060 = vmatprep.subr.bf16.mxu0 %v8341_v1 }
  0xa0   :  { %1182 = vmatpush1.bf16.msra.mxu1 %v7076_v22  ;;  %v495_v22 = vrot.slane %v170_v19, %v7160_v17 }
  0xa1   :  { %1183 = vmatprep.subr.bf16.mxu1 %v7079_v23 }
  0xa2   :  { %6061 = vmatpush3.bf16.msra.mxu0 %v6323_v9 }
  0xa3   :  { %6062 = vmatprep.subr.bf16.mxu0 %v8341_v1 }
  0xa4   :  { %1184 = vmatpush1.bf16.msra.mxu1 %v7084_v26  ;;  %v499_v26 = vrot.slane %v170_v19, %v7125_v53 }
  0xa5   :  { %1185 = vmatprep.subr.bf16.mxu1 %v7087_v27 }
  0xa6   :  { %6063 = vmatpush3.bf16.msra.mxu0 %v6324_v12 }
  0xa7   :  { %1210 = vmatprep.subr.bf16.mxu0 %v6781_v15  ;;  %v6787_v15 = vld [vmem:[#allocation9 + $0x6c] ss:$16 sps:$4 sm:$0xff]  }
  0xa8   :  { %1186 = vmatpush1.bf16.msra.mxu1 %v7090_v30 }
  0xa9   :  { %1187 = vmatprep.subr.bf16.mxu1 %v7093_v31 }
  0xac   :  { %1188 = vmatpush1.bf16.msra.mxu1 %v7096_v35 }
  0xad   :  { %1189 = vmatprep.subr.bf16.mxu1 %v7098_v36 }
  0xb0   :  { %1190 = vmatpush1.bf16.msra.mxu1 %v7110_v43 }
  0xb1   :  { %1191 = vmatprep.subr.bf16.mxu1 %v7112_v44 }
  0xb4   :  { %1192 = vmatpush1.bf16.msra.mxu1 %v7120_v48  ;;  %v7237_v48 = vsub.s32 2, %v7114_v45 }
  0xb5   :  { %1193 = vmatprep.subr.bf16.mxu1 %v7122_v50 }
  0xb6   :  { %v503_v52 = vrot.slane %v170_v19, %v7237_v48  ;;  %v6789_v19 = vld [vmem:[#allocation9 + $0x8c] ss:$16 sps:$4 sm:$0xff]  }
  0xb8   :  { %1194 = vmatpush1.bf16.msra.mxu1 %v7134_v56 }
  0xb9   :  { %1195 = vmatprep.subr.bf16.mxu1 %v7136_v57 }
  0xbc   :  { %1196 = vmatpush1.bf16.msra.mxu1 %v7144_v60 }
  0xbd   :  { %1197 = vmatprep.subr.bf16.mxu1 %v7148_v62 }
  0xc0   :  { %1198 = vmatpush1.bf16.msra.mxu1 %v6293_v10 }
  0xc1   :  { %1199 = vmatprep.subr.bf16.mxu1 %v6297_v14 }
  0xc4   :  { %1200 = vmatpush1.bf16.msra.mxu1 %v6299_v21 }
  0xc5   :  { %6068 = vmatprep.subr.bf16.mxu1 %v8341_v1 }
 0x159   :  { %v546_v23 = vpop.f32.mrb[0].mxu0 }
 0x15a   :  { %v547_v27 = vadd.f32 %v546_v23, %v495_v22  ;;  %v548_v30 = vpop.f32.mrb[1].mxu0  ;;  %v587_v39 = vpop.f32.mrb[0].mxu1  ;;  %v6790_v22 = vld [vmem:[#allocation9 + $0x88] ss:$16 sps:$4 sm:$0xff]   ;;  %v6791_v23 = vld [vmem:[#allocation9 + $0xac] ss:$16 sps:$4 sm:$0xff]  }
 0x15b   :  { %v550_v31 = vpop.f32.mrb[2].mxu0  ;;  %v549_v37 = vadd.f32 %v548_v30, %v499_v26  ;;  %v589_v40 = vpop.f32.mrb[1].mxu1  ;;  %v588_v57 = vadd.f32 %v587_v39, %v503_v52  ;;  %v6792_v26 = vld [vmem:[#allocation9 + $0xa8] ss:$16 sps:$4 sm:$0xff]   ;;  %v6351_v52 = vld [vmem:[#allocation11 + $0x10] sm:$0xff]  }
 0x15c   :  { %v5441_v35 = vmul.f32 -1.442695, %v547_v27  ;;  %v551_v36 = vpop.f32.mrb[3].mxu0  ;;  %v591_v42 = vpop.f32.mrb[2].mxu1  ;;  %v590_v54 = vadd.f32 %v589_v40, %v507_v49  ;;  %v6793_v27 = vld [vmem:[#allocation9 + $0xcc] ss:$16 sps:$4 sm:$0xff]  }
 0x15d   :  { %v5442_v38 = vmul.f32 -1.442695, %v549_v37  ;;  %v592_v43 = vpop.f32.mrb[3].mxu1  ;;  %v6794_v30 = vld [vmem:[#allocation9 + $0xc8] ss:$16 sps:$4 sm:$0xff]  }
 0x15e   :  { %6669 = vpow2.f32 %v5441_v35  ;;  %v6795_v31 = vld [vmem:[#allocation9 + $0xec] ss:$16 sps:$4 sm:$0xff]   ;;  %v6796_v35 = vld [vmem:[#allocation9 + $0xe8] ss:$16 sps:$4 sm:$0xff]   ;;  %v7292_v42 = vld [vmem:[#allocation9 + $0x80] ss:$16 sps:$4 sm:$0xff]  }
 0x15f   :  { %6671 = vpow2.f32 %v5442_v38  ;;  %v6797_v36 = vld [vmem:[#allocation9 + $0x10c] ss:$16 sps:$4 sm:$0xff]   ;;  %v6798_v37 = vld [vmem:[#allocation9 + $0x108] ss:$16 sps:$4 sm:$0xff]   ;;  %v7296_v43 = vld [vmem:[#allocation9 + $0xa4] ss:$16 sps:$4 sm:$0xff]  }
 0x160   :  { %v6799_v38 = vld [vmem:[#allocation9 + $0x12c] ss:$16 sps:$4 sm:$0xff]   ;;  %v6800_v39 = vld [vmem:[#allocation9 + $0x128] ss:$16 sps:$4 sm:$0xff]   ;;  %v7305_v49 = vld [vmem:[#allocation9 + $0xc0] ss:$16 sps:$4 sm:$0xff]  }
 0x161   :  { %v6801_v40 = vld [vmem:[#allocation9 + $0x14c] ss:$16 sps:$4 sm:$0xff]  }
 0x168   :  { %v6670_v44 = vpop.eup %6669 }
 0x169   :  { %v597_v46 = vadd.f32 1.0, %v6670_v44  ;;  %v6672_v50 = vpop.eup %6671  ;;  %v7299_v44 = vld [vmem:[#allocation9 + $0xa0] ss:$16 sps:$4 sm:$0xff]  }
 0x16a   :  { %v603_v51 = vadd.f32 1.0, %v6672_v50  ;;  %v7309_v50 = vld [vmem:[#allocation9 + $0xe4] ss:$16 sps:$4 sm:$0xff]  }
 0x16b   :  { %6673 = vrcp.f32 %v597_v46  ;;  %v7302_v46 = vld [vmem:[#allocation9 + $0xc4] ss:$16 sps:$4 sm:$0xff]  }
 0x16c   :  { %6675 = vrcp.f32 %v603_v51  ;;  %v7311_v51 = vld [vmem:[#allocation9 + $0xe0] ss:$16 sps:$4 sm:$0xff]  }
 0x175   :  { %v6674_v56 = vpop.eup %6673 }
 0x176   :  { %v606_v60 = vmul.f32 %v6674_v56, %v590_v54  ;;  %v6676_v63 = vpop.eup %6675  ;;  %v7316_v54 = vld [vmem:[#allocation9 + $0x104] ss:$16 sps:$4 sm:$0xff]   ;;  %v7318_v56 = vld [vmem:[#allocation9 + $0x100] ss:$16 sps:$4 sm:$0xff]  }
 0x177   :  { %v609_v8 = vsub.f32 1.0, %v6676_v63  ;;  %v611_v14 = vmul.f32 %v6676_v63, %v7128_v55  ;;  %v6359_v63 = vld [vmem:[#allocation11 + $0x20] sm:$0xff]  }
 0x178   :  { %v607_v62 = vadd.f32 %v606_v60, %v588_v57  ;;  %v6355_v57 = vld [vmem:[#allocation11 + $0x18] sm:$0xff]   ;;  %v7323_v60 = vld [vmem:[#allocation9 + $0x124] ss:$16 sps:$4 sm:$0xff]  }
 0x17a   :  { %6677 = vtanh.f32 %v607_v62  ;;  %v7325_v62 = vld [vmem:[#allocation9 + $0x120] ss:$16 sps:$4 sm:$0xff]  }
 0x184   :  { %v6678_v10 = vpop.eup %6677 }
 0x185   :  { %v610_v45 = vmul.f32 %v6678_v10, %v609_v8  ;;  %v7330_v8 = vld [vmem:[#allocation9 + $0x144] ss:$16 sps:$4 sm:$0xff]   ;;  %v7332_v10 = vld [vmem:[#allocation9 + $0x140] ss:$16 sps:$4 sm:$0xff]  }
 0x187   :  { %v612_v21 = vadd.f32 %v611_v14, %v610_v45  ;;  %v6363_v14 = vld [vmem:[#allocation11 + $0x28] sm:$0xff]   ;;  %v7337_v45 = vld [vmem:[#allocation9 + $0x164] ss:$16 sps:$4 sm:$0xff]  }
 0x189   :  { %v7243_v25 = vadd.f32 %v620_v16, %v612_v21  ;;  %v7339_v16 = vld [vmem:[#allocation9 + $0x160] ss:$16 sps:$4 sm:$0xff]  }
 0x18a   :  { %v6367_v21 = vld [vmem:[#allocation11 + $0x30] sm:$0xff]  }
 0x18b   :  { %v622_v32 = vpack.c.bf16 %v7243_v25, %v7243_v25  ;;  %748 = vst.msk [vmem:[#allocation3 + $0x1] sm:$0x1] %vm7106_vm0, %v7243_v25 }
 0x18d   :  { %6065 = vmatmul.mubr.bf16.vlgmr.msra.gmra.mrb[4].mxu0 %v622_v32  ;;  %v7343_v32 = vld [vmem:[#allocation9 + $0x180] ss:$16 sps:$4 sm:$0xff]  }
 0x18e   :  { %1211 = vmatpush1.bf16.msra.mxu0 %v6782_v0  ;;  %v7345_v0 = vld [vmem:[#allocation9 + $0x184] ss:$16 sps:$4 sm:$0xff]  }
 0x18f   :  { %1212 = vmatprep.subr.bf16.mxu0 %v6783_v2  ;;  %v6371_v2 = vld [vmem:[#allocation11 + $0x38] sm:$0xff]  }
 0x192   :  { %1213 = vmatpush1.bf16.msra.mxu0 %v6784_v3  ;;  %v749_v4 = vld [vmem:[#allocation3] sm:$0x3]  ;;  %v7348_v3 = vld [vmem:[#allocation9 + $0x1a4] ss:$16 sps:$4 sm:$0xff]  }
 0x193   :  { %1214 = vmatprep.subr.bf16.mxu0 %v6785_v5  ;;  %v758_v55 = vrot.slane %v749_v4, %v7125_v53  ;;  %v754_v6 = vrot.slane %v749_v4, %v7160_v17  ;;  %v7351_v4 = vld [vmem:[#allocation9 + $0xc] ss:$16 sps:$4 sm:$0xff]   ;;  %v7354_v5 = vld [vmem:[#allocation9 + $0x1a0] ss:$16 sps:$4 sm:$0xff]  }
 0x195   :  { %v762_v9 = vpack.c.bf16 %v758_v55, %v758_v55  ;;  %v761_v12 = vpack.c.bf16 %v754_v6, %v754_v6  ;;  %v1401_v55 = vld [vmem:[%s1400_s3] sm:$0x1] }
 0x196   :  { %1215 = vmatpush1.bf16.msra.mxu0 %v6786_v13  ;;  %v1402_v6 = vmax.f32 %v1401_v55, 0.0  ;;  %v7367_v13 = vld [vmem:[#allocation9 + $0x1e0] ss:$16 sps:$4 sm:$0xff]  }
 0x197   :  { %1201 = vmatprep.mubr.bf16.mxu1 %v762_v9  ;;  %1242 = vmatprep.mubr.bf16.mxu0 %v762_v9  ;;  %v7361_v9 = vld [vmem:[#allocation9 + $0x1c0] ss:$16 sps:$4 sm:$0xff]  }
 0x198   :  { %1202 = vmatmul.mubr.bf16.vlgmr.msra.gmra.mrb[4].mxu1 %v761_v12  ;;  %1216 = vmatprep.subr.bf16.mxu0 %v6787_v15  ;;  %1403 = vst.msk [vmem:[#allocation3] sm:$0x1] %vm7106_vm0, %v1402_v6  ;;  %v7369_v15 = vld [vmem:[#allocation9 + $0x1e4] ss:$16 sps:$4 sm:$0xff]  }
 0x199   :  { %6084 = vmatprep.mubr.msk.bf16.mxu1 %vm6943_vm1, %v8341_v1 }
 0x19a   :  { %1217 = vmatpush1.bf16.msra.mxu0 %v6788_v18  ;;  %v639_v18 = vld [vmem:[%s8338_s6] sm:$0x1] }
 0x19b   :  { %1218 = vmatprep.subr.bf16.mxu0 %v6789_v19 }
 0x19e   :  { %1219 = vmatpush1.bf16.msra.mxu0 %v6790_v22 }
 0x19f   :  { %1220 = vmatprep.subr.bf16.mxu0 %v6791_v23 }
 0x1a2   :  { %1221 = vmatpush1.bf16.msra.mxu0 %v6792_v26 }
 0x1a3   :  { %1222 = vmatprep.subr.bf16.mxu0 %v6793_v27 }
 0x1a6   :  { %1223 = vmatpush1.bf16.msra.mxu0 %v6794_v30 }
 0x1a7   :  { %1224 = vmatprep.subr.bf16.mxu0 %v6795_v31 }
 0x1aa   :  { %1225 = vmatpush1.bf16.msra.mxu0 %v6796_v35 }
 0x1ab   :  { %1226 = vmatprep.subr.bf16.mxu0 %v6797_v36 }
 0x1ae   :  { %1227 = vmatpush1.bf16.msra.mxu0 %v6798_v37 }
 0x1af   :  { %1228 = vmatprep.subr.bf16.mxu0 %v6799_v38  ;;  %v827_v38 = vld [vmem:[%s8336_s4] sm:$0xf] }
 0x1b0   :  { %v1160_v6 = vrot.slane %v827_v38, %v7237_v48 }
 0x1b2   :  { %1229 = vmatpush1.bf16.msra.mxu0 %v6800_v39  ;;  %v1152_v39 = vrot.slane %v827_v38, %v7160_v17 }
 0x1b3   :  { %1230 = vmatprep.subr.bf16.mxu0 %v6801_v40 }
 0x1b6   :  { %1231 = vmatpush1.bf16.msra.mxu0 %v7141_v59  ;;  %v7267_v59 = vld [vmem:[#allocation9] ss:$16 sps:$4 sm:$0xff]  }
 0x1b7   :  { %1232 = vmatprep.subr.bf16.mxu0 %v7138_v58  ;;  %v7265_v58 = vld [vmem:[#allocation9 + $0x4] ss:$16 sps:$4 sm:$0xff]  }
 0x1ba   :  { %1233 = vmatpush1.bf16.msra.mxu0 %v7146_v61  ;;  %v7271_v61 = vld [vmem:[#allocation9 + $0x24] ss:$16 sps:$4 sm:$0xff]  }
 0x1bb   :  { %1234 = vmatprep.subr.bf16.mxu0 %v7152_v7  ;;  %v7273_v7 = vld [vmem:[#allocation9 + $0x20] ss:$16 sps:$4 sm:$0xff]  }
 0x1be   :  { %1235 = vmatpush1.bf16.msra.mxu0 %v7157_v11  ;;  %v7275_v11 = vld [vmem:[#allocation9 + $0x44] ss:$16 sps:$4 sm:$0xff]  }
 0x1bf   :  { %1236 = vmatprep.subr.bf16.mxu0 %v7162_v20  ;;  %v7279_v20 = vld [vmem:[#allocation9 + $0x40] ss:$16 sps:$4 sm:$0xff]  }
 0x1c2   :  { %1237 = vmatpush1.bf16.msra.mxu0 %v7168_v24  ;;  %v7282_v24 = vld [vmem:[#allocation9 + $0x64] ss:$16 sps:$4 sm:$0xff]  }
 0x1c3   :  { %1238 = vmatprep.subr.bf16.mxu0 %v7171_v28  ;;  %v6343_v28 = vld [vmem:[#allocation11] sm:$0xff]  }
 0x1c4   :  { %6069 = vmatpush3.bf16.msra.mxu1 %v6343_v28 }
 0x1c5   :  { %6070 = vmatprep.subr.bf16.mxu1 %v8341_v1 }
 0x1c6   :  { %1239 = vmatpush1.bf16.msra.mxu0 %v7175_v29  ;;  %v6347_v29 = vld [vmem:[#allocation11 + $0x8] sm:$0xff]  }
 0x1c7   :  { %1240 = vmatprep.subr.bf16.mxu0 %v7177_v33  ;;  %v7285_v33 = vld [vmem:[#allocation9 + $0x60] ss:$16 sps:$4 sm:$0xff]  }
 0x1c8   :  { %6071 = vmatpush3.bf16.msra.mxu1 %v6347_v29  ;;  %v1156_v29 = vrot.slane %v827_v38, %v7125_v53 }
 0x1c9   :  { %6072 = vmatprep.subr.bf16.mxu1 %v8341_v1 }
 0x1ca   :  { %1241 = vmatpush1.bf16.msra.mxu0 %v7181_v34  ;;  %v7289_v34 = vld [vmem:[#allocation9 + $0x84] ss:$16 sps:$4 sm:$0xff]  }
 0x1cb   :  { %1825 = vmatprep.subr.bf16.mxu0 %v7265_v58 }
 0x1cc   :  { %6073 = vmatpush3.bf16.msra.mxu1 %v6351_v52 }
 0x1cd   :  { %1243 = vmatmul.mubr.bf16.vlgmr.msra.gmra.mrb[8].mxu0 %v761_v12  ;;  %6074 = vmatprep.subr.bf16.mxu1 %v8341_v1  ;;  %v7363_v12 = vld [vmem:[#allocation9 + $0x1c4] ss:$16 sps:$4 sm:$0xff]  }
 0x1ce   :  { %1826 = vmatpush1.bf16.msra.mxu0 %v7267_v59 }
 0x1cf   :  { %1827 = vmatprep.subr.bf16.mxu0 %v7271_v61 }
 0x1d0   :  { %6075 = vmatpush3.bf16.msra.mxu1 %v6355_v57 }
 0x1d1   :  { %6076 = vmatprep.subr.bf16.mxu1 %v8341_v1 }
 0x1d2   :  { %1828 = vmatpush1.bf16.msra.mxu0 %v7273_v7 }
 0x1d3   :  { %1829 = vmatprep.subr.bf16.mxu0 %v7275_v11 }
 0x1d4   :  { %6077 = vmatpush3.bf16.msra.mxu1 %v6359_v63 }
 0x1d5   :  { %6078 = vmatprep.subr.bf16.mxu1 %v8341_v1 }
 0x1d6   :  { %1830 = vmatpush1.bf16.msra.mxu0 %v7279_v20 }
 0x1d7   :  { %1831 = vmatprep.subr.bf16.mxu0 %v7282_v24 }
 0x1d8   :  { %6079 = vmatpush3.bf16.msra.mxu1 %v6363_v14 }
 0x1d9   :  { %6080 = vmatprep.subr.bf16.mxu1 %v8341_v1 }
 0x1da   :  { %1832 = vmatpush1.bf16.msra.mxu0 %v7285_v33 }
 0x1db   :  { %1833 = vmatprep.subr.bf16.mxu0 %v7289_v34 }
 0x1dc   :  { %6081 = vmatpush3.bf16.msra.mxu1 %v6367_v21 }
 0x1dd   :  { %6082 = vmatprep.subr.bf16.mxu1 %v8341_v1 }
 0x1de   :  { %1834 = vmatpush1.bf16.msra.mxu0 %v7292_v42 }
 0x1df   :  { %1835 = vmatprep.subr.bf16.mxu0 %v7296_v43 }
 0x1e0   :  { %6083 = vmatpush3.bf16.msra.mxu1 %v6371_v2  ;;  %v1164_v2 = vrot.slane %v827_v38, %v7234_v47  ;;  %v1277_v38 = vmul.f32 0.0, %v7243_v25 }
 0x1e1   :  { %1866 = vmatprep.subr.bf16.mxu1 %v7351_v4 }
 0x1e2   :  { %1836 = vmatpush1.bf16.msra.mxu0 %v7299_v44 }
 0x1e3   :  { %1837 = vmatprep.subr.bf16.mxu0 %v7302_v46 }
 0x1e6   :  { %1838 = vmatpush1.bf16.msra.mxu0 %v7305_v49 }
 0x1e7   :  { %1839 = vmatprep.subr.bf16.mxu0 %v7309_v50 }
 0x1ea   :  { %1840 = vmatpush1.bf16.msra.mxu0 %v7311_v51 }
 0x1eb   :  { %1841 = vmatprep.subr.bf16.mxu0 %v7316_v54 }
 0x1ee   :  { %1842 = vmatpush1.bf16.msra.mxu0 %v7318_v56 }
 0x1ef   :  { %1843 = vmatprep.subr.bf16.mxu0 %v7323_v60 }
 0x1f2   :  { %1844 = vmatpush1.bf16.msra.mxu0 %v7325_v62 }
 0x1f3   :  { %1845 = vmatprep.subr.bf16.mxu0 %v7330_v8 }
 0x1f6   :  { %1846 = vmatpush1.bf16.msra.mxu0 %v7332_v10 }
 0x1f7   :  { %1847 = vmatprep.subr.bf16.mxu0 %v7337_v45 }
 0x1fa   :  { %1848 = vmatpush1.bf16.msra.mxu0 %v7339_v16 }
 0x1fb   :  { %1849 = vmatprep.subr.bf16.mxu0 %v7345_v0 }
 0x1fe   :  { %1850 = vmatpush1.bf16.msra.mxu0 %v7343_v32 }
 0x1ff   :  { %1851 = vmatprep.subr.bf16.mxu0 %v7348_v3 }
 0x202   :  { %1852 = vmatpush1.bf16.msra.mxu0 %v7354_v5 }
 0x203   :  { %1853 = vmatprep.subr.bf16.mxu0 %v7363_v12 }
 0x206   :  { %1854 = vmatpush1.bf16.msra.mxu0 %v7361_v9 }
 0x207   :  { %1855 = vmatprep.subr.bf16.mxu0 %v7369_v15 }
 0x20a   :  { %1856 = vmatpush1.bf16.msra.mxu0 %v7367_v13 }
 0x20b   :  { %6088 = vmatprep.subr.bf16.mxu0 %v8341_v1 }
 0x260   :  { %v722_v19 = vpop.f32.mrb[4].mxu0 }
 0x261   :  { %v7377_v22 = vadd.f32 %v722_v19, %v639_v18  ;;  %v6066_v23 = vpop.f32.mrb[5].mxu0 }
 0x262   :  { %v725_v26 = vpop.f32.mrb[6].mxu0 }
 0x263   :  { %8373 = vst [vmem:[#allocation20_spill] sm:$0xff] %v7377_v22  ;;  %v6067_v27 = vpop.f32.mrb[7].mxu0  ;;  %v729_v30 = vsel %vm728_vm2, %v7377_v22, -inf  ;;  %v7469_v22 = vld [vmem:[#allocation9 + $0x18c] ss:$16 sps:$4 sm:$0xff]  }
 0x264   :  { %730 = vmax.xlane.f32.xlu0 %v729_v30  ;;  %8380 = vst [vmem:[#allocation27_spill] sm:$0xff] %v7469_v22 }
 0x26b   :  { %v1203_v31 = vpop.f32.mrb[4].mxu1 }
 0x26c   :  { %v1205_v35 = vpop.f32.mrb[5].mxu1  ;;  %v1204_v40 = vadd.f32 %v1203_v31, %v1152_v39 }
 0x26d   :  { %v1207_v36 = vpop.f32.mrb[6].mxu1  ;;  %v1206_v52 = vadd.f32 %v1205_v35, %v1156_v29 }
 0x26e   :  { %v1208_v37 = vpop.f32.mrb[7].mxu1  ;;  %v5516_v28 = vmul.f32 -1.442695, %v1204_v40 }
 0x26f   :  { %v5517_v57 = vmul.f32 -1.442695, %v1206_v52 }
 0x270   :  { %6679 = vpow2.f32 %v5516_v28 }
 0x271   :  { %6681 = vpow2.f32 %v5517_v57 }
 0x27a   :  { %v6680_v63 = vpop.eup %6679 }
 0x27b   :  { %v1254_v14 = vadd.f32 1.0, %v6680_v63  ;;  %v6682_v21 = vpop.eup %6681  ;;  %v7392_v63 = vld [vmem:[#allocation9 + $0x8] ss:$16 sps:$4 sm:$0xff]  }
 0x27c   :  { %v1260_v55 = vadd.f32 1.0, %v6682_v21  ;;  %v7399_v21 = vld [vmem:[#allocation9 + $0x2c] ss:$16 sps:$4 sm:$0xff]  }
 0x27d   :  { %6683 = vrcp.f32 %v1254_v14 }
 0x27e   :  { %6685 = vrcp.f32 %v1260_v55  ;;  %v7408_v55 = vld [vmem:[#allocation9 + $0x48] ss:$16 sps:$4 sm:$0xff]  }
 0x287   :  { %v6684_v27 = vpop.eup %6683 }
 0x288   :  { %v6686_v37 = vpop.eup %6685 }
 0x289   :  { %v1266_v39 = vsub.f32 1.0, %v6686_v37  ;;  %v1268_v28 = vmul.f32 %v6686_v37, %v7243_v25  ;;  %v7405_v25 = vld [vmem:[#allocation9 + $0x4c] ss:$16 sps:$4 sm:$0xff]   ;;  %v7430_v37 = vld [vmem:[#allocation9 + $0xa8] ss:$16 sps:$4 sm:$0xff]  }
 0x2a0   :  { %v1244_v18 = vpop.f32.mrb[8].mxu0 }
 0x2a1   :  { %v1246_v19 = vpop.f32.mrb[9].mxu0  ;;  %v1245_v31 = vadd.f32 %v1244_v18, %v1160_v6 }
 0x2a2   :  { %v1247_v23 = vadd.f32 %v1246_v19, %v1164_v2  ;;  %v1248_v26 = vpop.f32.mrb[10].mxu0  ;;  %v7402_v2 = vld [vmem:[#allocation9 + $0x28] ss:$16 sps:$4 sm:$0xff]  }
 0x2a3   :  { %v1249_v30 = vpop.f32.mrb[11].mxu0 }
 0x2a4   :  { %v1263_v35 = vmul.f32 %v6684_v27, %v1247_v23  ;;  %v7413_v23 = vld [vmem:[#allocation9 + $0x6c] ss:$16 sps:$4 sm:$0xff]   ;;  %v7416_v30 = vld [vmem:[#allocation9 + $0x68] ss:$16 sps:$4 sm:$0xff]  }
 0x2a6   :  { %v1264_v36 = vadd.f32 %v1263_v35, %v1245_v31  ;;  %v7418_v31 = vld [vmem:[#allocation9 + $0x8c] ss:$16 sps:$4 sm:$0xff]   ;;  %v7424_v35 = vld [vmem:[#allocation9 + $0x88] ss:$16 sps:$4 sm:$0xff]  }
 0x2a8   :  { %6687 = vtanh.f32 %v1264_v36  ;;  %v7427_v36 = vld [vmem:[#allocation9 + $0xac] ss:$16 sps:$4 sm:$0xff]  }
 0x2b2   :  { %v6688_v40 = vpop.eup %6687 }
 0x2b3   :  { %v1267_v29 = vmul.f32 %v6688_v40, %v1266_v39  ;;  %v7433_v39 = vld [vmem:[#allocation9 + $0xcc] ss:$16 sps:$4 sm:$0xff]   ;;  %v7436_v40 = vld [vmem:[#allocation9 + $0xc8] ss:$16 sps:$4 sm:$0xff]  }
 0x2b5   :  { %v1269_v52 = vadd.f32 %v1268_v28, %v1267_v29  ;;  %v7439_v28 = vld [vmem:[#allocation9 + $0xec] ss:$16 sps:$4 sm:$0xff]   ;;  %v7442_v29 = vld [vmem:[#allocation9 + $0xe8] ss:$16 sps:$4 sm:$0xff]  }
 0x2b7   :  { %v7390_v57 = vadd.f32 %v1277_v38, %v1269_v52  ;;  %v7445_v52 = vld [vmem:[#allocation9 + $0x10c] ss:$16 sps:$4 sm:$0xff]   ;;  %v7448_v38 = vld [vmem:[#allocation9 + $0x108] ss:$16 sps:$4 sm:$0xff]  }
 0x2b9   :  { %v1279_v14 = vpack.c.bf16 %v7390_v57, %v7390_v57  ;;  %1404 = vst.msk [vmem:[#allocation3 + $0x1] sm:$0x1] %vm7106_vm0, %v7390_v57 }
 0x2bb   :  { %6085 = vmatmul.mubr.bf16.vlgmr.msra.gmra.mrb[8].mxu1 %v1279_v14  ;;  %v7451_v14 = vld [vmem:[#allocation9 + $0x12c] ss:$16 sps:$4 sm:$0xff]  }
 0x2bc   :  { %1867 = vmatpush1.bf16.msra.mxu1 %v7392_v63  ;;  %8374 = vst [vmem:[#allocation21_spill] sm:$0xff] %v7451_v14 }
 0x2bd   :  { %1868 = vmatprep.subr.bf16.mxu1 %v7399_v21 }
 0x2c0   :  { %1869 = vmatpush1.bf16.msra.mxu1 %v7402_v2  ;;  %v1405_v6 = vld [vmem:[#allocation3] sm:$0x3] }
 0x2c1   :  { %1870 = vmatprep.subr.bf16.mxu1 %v7405_v25  ;;  %v1414_v18 = vrot.slane %v1405_v6, %v7125_v53  ;;  %v1410_v19 = vrot.slane %v1405_v6, %v7160_v17  ;;  %v7454_v6 = vld [vmem:[#allocation9 + $0x128] ss:$16 sps:$4 sm:$0xff]  }
 0x2c2   :  { %8375 = vst [vmem:[#allocation22_spill] sm:$0xff] %v7454_v6 }
 0x2c3   :  { %v1418_v26 = vpack.c.bf16 %v1414_v18, %v1414_v18  ;;  %v1417_v27 = vpack.c.bf16 %v1410_v19, %v1410_v19  ;;  %v7457_v18 = vld [vmem:[#allocation9 + $0x14c] ss:$16 sps:$4 sm:$0xff]   ;;  %v7460_v19 = vld [vmem:[#allocation9 + $0x148] ss:$16 sps:$4 sm:$0xff]  }
 0x2c4   :  { %1871 = vmatpush1.bf16.msra.mxu1 %v7408_v55  ;;  %8376 = vst [vmem:[#allocation23_spill] sm:$0xff] %v7457_v18  ;;  %8377 = vst [vmem:[#allocation24_spill] sm:$0xff] %v7460_v19 }
 0x2c5   :  { %1857 = vmatprep.mubr.bf16.mxu0 %v1418_v26  ;;  %1898 = vmatprep.mubr.bf16.mxu1 %v1418_v26  ;;  %v7463_v26 = vld [vmem:[#allocation9 + $0x16c] ss:$16 sps:$4 sm:$0xff]  }
 0x2c6   :  { %1858 = vmatmul.mubr.bf16.vlgmr.msra.gmra.mrb[12].mxu0 %v1417_v27  ;;  %1872 = vmatprep.subr.bf16.mxu1 %v7413_v23  ;;  %8378 = vst [vmem:[#allocation25_spill] sm:$0xff] %v7463_v26 }
 0x2c7   :  { %6104 = vmatprep.mubr.msk.bf16.mxu0 %vm6943_vm1, %v8341_v1  ;;  %v7466_v1 = vld [vmem:[#allocation9 + $0x168] ss:$16 sps:$4 sm:$0xff]  }
 0x2c8   :  { %1873 = vmatpush1.bf16.msra.mxu1 %v7416_v30  ;;  %8379 = vst [vmem:[#allocation26_spill] sm:$0xff] %v7466_v1 }
 0x2c9   :  { %1874 = vmatprep.subr.bf16.mxu1 %v7418_v31 }
 0x2cc   :  { %1875 = vmatpush1.bf16.msra.mxu1 %v7424_v35 }
 0x2cd   :  { %1876 = vmatprep.subr.bf16.mxu1 %v7427_v36 }
 0x2d0   :  { %1877 = vmatpush1.bf16.msra.mxu1 %v7430_v37 }
 0x2d1   :  { %1878 = vmatprep.subr.bf16.mxu1 %v7433_v39 }
 0x2d4   :  { %1879 = vmatpush1.bf16.msra.mxu1 %v7436_v40 }
 0x2d5   :  { %1880 = vmatprep.subr.bf16.mxu1 %v7439_v28 }
 0x2d8   :  { %1881 = vmatpush1.bf16.msra.mxu1 %v7442_v29 }
 0x2d9   :  { %1882 = vmatprep.subr.bf16.mxu1 %v7445_v52 }
 0x2dc   :  { %1883 = vmatpush1.bf16.msra.mxu1 %v7448_v38 }
 0x2dd   :  { %1884 = vmatprep.subr.bf16.mxu1 %v7451_v14  ;;  %v7472_v14 = vld [vmem:[#allocation9 + $0x188] ss:$16 sps:$4 sm:$0xff]  }
 0x2e0   :  { %1885 = vmatpush1.bf16.msra.mxu1 %v7454_v6  ;;  %v7475_v6 = vld [vmem:[#allocation9 + $0x1ac] ss:$16 sps:$4 sm:$0xff]  }
 0x2e1   :  { %1886 = vmatprep.subr.bf16.mxu1 %v7457_v18  ;;  %v7478_v18 = vld [vmem:[#allocation9 + $0x1a8] ss:$16 sps:$4 sm:$0xff]  }
 0x2e4   :  { %1887 = vmatpush1.bf16.msra.mxu1 %v7460_v19  ;;  %v7481_v19 = vld [vmem:[#allocation9 + $0x1cc] ss:$16 sps:$4 sm:$0xff]  }
 0x2e5   :  { %1888 = vmatprep.subr.bf16.mxu1 %v7463_v26  ;;  %v7484_v26 = vld [vmem:[#allocation9 + $0x1c8] ss:$16 sps:$4 sm:$0xff]  }
 0x2e8   :  { %1889 = vmatpush1.bf16.msra.mxu1 %v7466_v1  ;;  %v7487_v1 = vld [vmem:[#allocation9 + $0x1ec] ss:$16 sps:$4 sm:$0xff]  }
 0x2e9   :  { %1890 = vmatprep.subr.bf16.mxu1 %v7469_v22  ;;  %v7490_v22 = vld [vmem:[#allocation9 + $0x1e8] ss:$16 sps:$4 sm:$0xff]  }
 0x2ec   :  { %1891 = vmatpush1.bf16.msra.mxu1 %v7472_v14 }
 0x2ed   :  { %1892 = vmatprep.subr.bf16.mxu1 %v7475_v6 }
 0x2f0   :  { %1893 = vmatpush1.bf16.msra.mxu1 %v7478_v18 }
 0x2f1   :  { %1894 = vmatprep.subr.bf16.mxu1 %v7481_v19 }
 0x2f4   :  { %1895 = vmatpush1.bf16.msra.mxu1 %v7484_v26 }
 0x2f5   :  { %1896 = vmatprep.subr.bf16.mxu1 %v7487_v1 }
 0x2f8   :  { %1897 = vmatpush1.bf16.msra.mxu1 %v7490_v22 }
 0x2f9   :  { %2481 = vmatprep.subr.bf16.mxu1 %v7265_v58  ;;  %v6429_v58 = vld [vmem:[#allocation11] sm:$0xff]  }
 0x2fa   :  { %6089 = vmatpush3.bf16.msra.mxu0 %v6429_v58 }
 0x2fb   :  { %1899 = vmatmul.mubr.bf16.vlgmr.msra.gmra.mrb[12].mxu1 %v1417_v27 }
 0x2fc   :  { %2482 = vmatpush1.bf16.msra.mxu1 %v7267_v59  ;;  %v6430_v59 = vld [vmem:[#allocation11 + $0x8] sm:$0xff]  }
 0x2fd   :  { %2483 = vmatprep.subr.bf16.mxu1 %v7271_v61  ;;  %v8381_v61 = vmov 0.0  }
 0x2fe   :  { %6090 = vmatprep.subr.bf16.mxu0 %v8381_v61 }
 0x2ff   :  { %6091 = vmatpush3.bf16.msra.mxu0 %v6430_v59 }
 0x300   :  { %2484 = vmatpush1.bf16.msra.mxu1 %v7273_v7  ;;  %6092 = vmatprep.subr.bf16.mxu0 %v8381_v61  ;;  %v6431_v7 = vld [vmem:[#allocation11 + $0x10] sm:$0xff]  }
 0x301   :  { %2485 = vmatprep.subr.bf16.mxu1 %v7275_v11  ;;  %v6432_v11 = vld [vmem:[#allocation11 + $0x18] sm:$0xff]  }
 0x303   :  { %6093 = vmatpush3.bf16.msra.mxu0 %v6431_v7 }
 0x304   :  { %2486 = vmatpush1.bf16.msra.mxu1 %v7279_v20  ;;  %6094 = vmatprep.subr.bf16.mxu0 %v8381_v61  ;;  %v6433_v20 = vld [vmem:[#allocation11 + $0x20] sm:$0xff]  }
 0x305   :  { %2487 = vmatprep.subr.bf16.mxu1 %v7282_v24  ;;  %v6434_v24 = vld [vmem:[#allocation11 + $0x28] sm:$0xff]  }
 0x307   :  { %6095 = vmatpush3.bf16.msra.mxu0 %v6432_v11 }
 0x308   :  { %2488 = vmatpush1.bf16.msra.mxu1 %v7285_v33  ;;  %6096 = vmatprep.subr.bf16.mxu0 %v8381_v61  ;;  %v6435_v33 = vld [vmem:[#allocation11 + $0x30] sm:$0xff]  }
 0x309   :  { %2489 = vmatprep.subr.bf16.mxu1 %v7289_v34  ;;  %v6436_v34 = vld [vmem:[#allocation11 + $0x38] sm:$0xff]  }
 0x30b   :  { %6097 = vmatpush3.bf16.msra.mxu0 %v6433_v20 }
 0x30c   :  { %2490 = vmatpush1.bf16.msra.mxu1 %v7292_v42  ;;  %6098 = vmatprep.subr.bf16.mxu0 %v8381_v61  ;;  %v2057_v42 = vld [vmem:[%s2056_s21] sm:$0x1] }
 0x30d   :  { %2491 = vmatprep.subr.bf16.mxu1 %v7296_v43  ;;  %v2058_v43 = vmax.f32 %v2057_v42, 0.0 }
 0x30f   :  { %6099 = vmatpush3.bf16.msra.mxu0 %v6434_v24  ;;  %2059 = vst.msk [vmem:[#allocation3] sm:$0x1] %vm7106_vm0, %v2058_v43 }
 0x310   :  { %2492 = vmatpush1.bf16.msra.mxu1 %v7299_v44  ;;  %6100 = vmatprep.subr.bf16.mxu0 %v8381_v61  ;;  %v1296_v44 = vld [vmem:[%s8338_s6] sm:$0x1] }
 0x311   :  { %2493 = vmatprep.subr.bf16.mxu1 %v7302_v46 }
 0x313   :  { %6101 = vmatpush3.bf16.msra.mxu0 %v6435_v33 }
 0x314   :  { %2494 = vmatpush1.bf16.msra.mxu1 %v7305_v49  ;;  %6102 = vmatprep.subr.bf16.mxu0 %v8381_v61 }
 0x315   :  { %2495 = vmatprep.subr.bf16.mxu1 %v7309_v50 }
 0x317   :  { %6103 = vmatpush3.bf16.msra.mxu0 %v6436_v34 }
 0x318   :  { %2496 = vmatpush1.bf16.msra.mxu1 %v7311_v51  ;;  %2522 = vmatprep.subr.bf16.mxu0 %v7351_v4 }
 0x319   :  { %2497 = vmatprep.subr.bf16.mxu1 %v7316_v54 }
 0x31c   :  { %2498 = vmatpush1.bf16.msra.mxu1 %v7318_v56 }
 0x31d   :  { %2499 = vmatprep.subr.bf16.mxu1 %v7323_v60 }
 0x320   :  { %2500 = vmatpush1.bf16.msra.mxu1 %v7325_v62 }
 0x321   :  { %2501 = vmatprep.subr.bf16.mxu1 %v7330_v8 }
 0x324   :  { %2502 = vmatpush1.bf16.msra.mxu1 %v7332_v10 }
 0x325   :  { %2503 = vmatprep.subr.bf16.mxu1 %v7337_v45  ;;  %v1483_v45 = vld [vmem:[%s8336_s4] sm:$0xf] }
 0x326   :  { %v1816_v58 = vrot.slane %v1483_v45, %v7237_v48 }
 0x328   :  { %2504 = vmatpush1.bf16.msra.mxu1 %v7339_v16  ;;  %v1808_v16 = vrot.slane %v1483_v45, %v7160_v17 }
 0x329   :  { %2505 = vmatprep.subr.bf16.mxu1 %v7345_v0 }
 0x32c   :  { %2506 = vmatpush1.bf16.msra.mxu1 %v7343_v32 }
 0x32d   :  { %2507 = vmatprep.subr.bf16.mxu1 %v7348_v3  ;;  %v1812_v3 = vrot.slane %v1483_v45, %v7125_v53 }
 0x330   :  { %2508 = vmatpush1.bf16.msra.mxu1 %v7354_v5 }
 0x331   :  { %2509 = vmatprep.subr.bf16.mxu1 %v7363_v12 }
 0x334   :  { %2510 = vmatpush1.bf16.msra.mxu1 %v7361_v9 }
 0x335   :  { %2511 = vmatprep.subr.bf16.mxu1 %v7369_v15  ;;  %v1820_v15 = vrot.slane %v1483_v45, %v7234_v47 }
 0x338   :  { %2512 = vmatpush1.bf16.msra.mxu1 %v7367_v13 }
 0x339   :  { %6108 = vmatprep.subr.bf16.mxu1 %v8381_v61 }
 0x38e   :  { %v1379_v46 = vpop.f32.mrb[8].mxu1 }
 0x38f   :  { %v7540_v49 = vadd.f32 %v1379_v46, %v1296_v44  ;;  %v6086_v50 = vpop.f32.mrb[9].mxu1 }
 0x390   :  { %v1382_v51 = vpop.f32.mrb[10].mxu1 }
 0x391   :  { %8382 = vst [vmem:[#allocation28_spill] sm:$0xff] %v7540_v49  ;;  %v6087_v54 = vpop.f32.mrb[11].mxu1  ;;  %v1385_v56 = vsel %vm728_vm2, %v7540_v49, -inf  ;;  %v7795_v49 = vld [vmem:[#allocation9 + $0x16c] ss:$16 sps:$4 sm:$0xff]  }
 0x392   :  { %1386 = vmax.xlane.f32.xlu0 %v1385_v56 }
 0x399   :  { %v1859_v60 = vpop.f32.mrb[12].mxu0 }
 0x39a   :  { %v1861_v62 = vpop.f32.mrb[13].mxu0  ;;  %v1860_v32 = vadd.f32 %v1859_v60, %v1808_v16  ;;  %v1933_v60 = vmul.f32 0.0, %v7390_v57 }
 0x39b   :  { %v1863_v8 = vpop.f32.mrb[14].mxu0  ;;  %v1862_v4 = vadd.f32 %v1861_v62, %v1812_v3  ;;  %v6463_v3 = vld [vmem:[#allocation11 + $0x10] sm:$0xff]  }
 0x39c   :  { %v1864_v10 = vpop.f32.mrb[15].mxu0  ;;  %v5591_v0 = vmul.f32 -1.442695, %v1860_v32 }
 0x39d   :  { %v5592_v5 = vmul.f32 -1.442695, %v1862_v4  ;;  %v7646_v4 = vld [vmem:[#allocation9 + $0x104] ss:$16 sps:$4 sm:$0xff]  }
 0x39e   :  { %6689 = vpow2.f32 %v5591_v0  ;;  %v7641_v0 = vld [vmem:[#allocation9 + $0xe0] ss:$16 sps:$4 sm:$0xff]  }
 0x39f   :  { %6691 = vpow2.f32 %v5592_v5  ;;  %v7648_v5 = vld [vmem:[#allocation9 + $0x100] ss:$16 sps:$4 sm:$0xff]  }
 0x3a8   :  { %v6690_v9 = vpop.eup %6689 }
 0x3a9   :  { %v1910_v12 = vadd.f32 1.0, %v6690_v9  ;;  %v6692_v13 = vpop.eup %6691  ;;  %v6467_v9 = vld [vmem:[#allocation11 + $0x18] sm:$0xff]  }
 0x3aa   :  { %v1916_v27 = vadd.f32 1.0, %v6692_v13  ;;  %v7655_v13 = vld [vmem:[#allocation9 + $0x120] ss:$16 sps:$4 sm:$0xff]  }
 0x3ab   :  { %6693 = vrcp.f32 %v1910_v12  ;;  %v7653_v12 = vld [vmem:[#allocation9 + $0x124] ss:$16 sps:$4 sm:$0xff]  }
 0x3ac   :  { %6695 = vrcp.f32 %v1916_v27  ;;  %v7660_v27 = vld [vmem:[#allocation9 + $0x144] ss:$16 sps:$4 sm:$0xff]  }
 0x3b5   :  { %v6694_v24 = vpop.eup %6693 }
 0x3b6   :  { %v6696_v44 = vpop.eup %6695 }
 0x3b7   :  { %v1922_v46 = vsub.f32 1.0, %v6696_v44  ;;  %v1924_v51 = vmul.f32 %v6696_v44, %v7390_v57  ;;  %v7684_v44 = vld [vmem:[#allocation9 + $0x1a0] ss:$16 sps:$4 sm:$0xff]  }
 0x3ce   :  { %v1900_v59 = vpop.f32.mrb[12].mxu1 }
 0x3cf   :  { %v1902_v7 = vpop.f32.mrb[13].mxu1  ;;  %v1901_v34 = vadd.f32 %v1900_v59, %v1816_v58  ;;  %v7662_v58 = vld [vmem:[#allocation9 + $0x140] ss:$16 sps:$4 sm:$0xff]   ;;  %v6475_v59 = vld [vmem:[#allocation11 + $0x28] sm:$0xff]  }
 0x3d0   :  { %v1903_v11 = vadd.f32 %v1902_v7, %v1820_v15  ;;  %v1904_v20 = vpop.f32.mrb[14].mxu1  ;;  %v6471_v15 = vld [vmem:[#allocation11 + $0x20] sm:$0xff]  }
 0x3d1   :  { %v1905_v33 = vpop.f32.mrb[15].mxu1  ;;  %v7667_v7 = vld [vmem:[#allocation9 + $0x164] ss:$16 sps:$4 sm:$0xff]  }
 0x3d2   :  { %v1919_v42 = vmul.f32 %v6694_v24, %v1903_v11  ;;  %v7669_v11 = vld [vmem:[#allocation9 + $0x160] ss:$16 sps:$4 sm:$0xff]   ;;  %v7675_v33 = vld [vmem:[#allocation9 + $0x184] ss:$16 sps:$4 sm:$0xff]  }
 0x3d3   :  { %v6479_v20 = vld [vmem:[#allocation11 + $0x30] sm:$0xff]  }
 0x3d4   :  { %v1920_v43 = vadd.f32 %v1919_v42, %v1901_v34  ;;  %v7673_v24 = vld [vmem:[#allocation9 + $0x180] ss:$16 sps:$4 sm:$0xff]   ;;  %v6483_v34 = vld [vmem:[#allocation11 + $0x38] sm:$0xff]   ;;  %v7678_v42 = vld [vmem:[#allocation9 + $0x1a4] ss:$16 sps:$4 sm:$0xff]  }
 0x3d6   :  { %6697 = vtanh.f32 %v1920_v43  ;;  %v7681_v43 = vld [vmem:[#allocation9 + $0xc] ss:$16 sps:$4 sm:$0xff]  }
 0x3e0   :  { %v6698_v50 = vpop.eup %6697 }
 0x3e1   :  { %v1923_v54 = vmul.f32 %v6698_v50, %v1922_v46  ;;  %v2713_v46 = vld [vmem:[%s2712_s26] sm:$0x1] }
 0x3e2   :  { %v2714_v50 = vmax.f32 %v2713_v46, 0.0 }
 0x3e3   :  { %v1925_v56 = vadd.f32 %v1924_v51, %v1923_v54  ;;  %v7691_v51 = vld [vmem:[#allocation9 + $0x1c0] ss:$16 sps:$4 sm:$0xff]   ;;  %v7693_v54 = vld [vmem:[#allocation9 + $0x1c4] ss:$16 sps:$4 sm:$0xff]  }
 0x3e5   :  { %v7553_v62 = vadd.f32 %v1933_v60, %v1925_v56  ;;  %v7697_v56 = vld [vmem:[#allocation9 + $0x1e0] ss:$16 sps:$4 sm:$0xff]   ;;  %v7699_v60 = vld [vmem:[#allocation9 + $0x1e4] ss:$16 sps:$4 sm:$0xff]  }
 0x3e7   :  { %v1935_v8 = vpack.c.bf16 %v7553_v62, %v7553_v62  ;;  %2060 = vst.msk [vmem:[#allocation3 + $0x1] sm:$0x1] %vm7106_vm0, %v7553_v62 }
 0x3e9   :  { %6105 = vmatmul.mubr.bf16.vlgmr.msra.gmra.mrb[16].mxu0 %v1935_v8  ;;  %v1952_v8 = vld [vmem:[%s8338_s6] sm:$0x1] }
 0x3ea   :  { %2523 = vmatpush1.bf16.msra.mxu0 %v7392_v63  ;;  %v8383_v63 = vld [vmem:[#allocation21_spill] sm:$0xff] }
 0x3eb   :  { %2524 = vmatprep.subr.bf16.mxu0 %v7399_v21  ;;  %v8384_v21 = vld [vmem:[#allocation22_spill] sm:$0xff] }
 0x3ee   :  { %2525 = vmatpush1.bf16.msra.mxu0 %v7402_v2  ;;  %v2061_v10 = vld [vmem:[#allocation3] sm:$0x3]  ;;  %v8385_v2 = vld [vmem:[#allocation23_spill] sm:$0xff] }
 0x3ef   :  { %2526 = vmatprep.subr.bf16.mxu0 %v7405_v25  ;;  %v2070_v57 = vrot.slane %v2061_v10, %v7125_v53  ;;  %v2066_v45 = vrot.slane %v2061_v10, %v7160_v17  ;;  %v8386_v25 = vld [vmem:[#allocation24_spill] sm:$0xff]  ;;  %2715 = vst.msk [vmem:[#allocation3] sm:$0x1] %vm7106_vm0, %v2714_v50 }
 0x3f1   :  { %v2074_v16 = vpack.c.bf16 %v2070_v57, %v2070_v57  ;;  %v2073_v32 = vpack.c.bf16 %v2066_v45, %v2066_v45 }
 0x3f2   :  { %2527 = vmatpush1.bf16.msra.mxu0 %v7408_v55  ;;  %v8387_v55 = vld [vmem:[#allocation25_spill] sm:$0xff] }
 0x3f3   :  { %2513 = vmatprep.mubr.bf16.mxu1 %v2074_v16  ;;  %2554 = vmatprep.mubr.bf16.mxu0 %v2074_v16 }
 0x3f4   :  { %2514 = vmatmul.mubr.bf16.vlgmr.msra.gmra.mrb[16].mxu1 %v2073_v32  ;;  %2528 = vmatprep.subr.bf16.mxu0 %v7413_v23  ;;  %v8388_v23 = vld [vmem:[#allocation26_spill] sm:$0xff] }
 0x3f5   :  { %6124 = vmatprep.mubr.msk.bf16.mxu1 %vm6943_vm1, %v8381_v61 }
 0x3f6   :  { %2529 = vmatpush1.bf16.msra.mxu0 %v7416_v30  ;;  %v8389_v30 = vld [vmem:[#allocation27_spill] sm:$0xff] }
 0x3f7   :  { %2530 = vmatprep.subr.bf16.mxu0 %v7418_v31  ;;  %v7595_v31 = vld [vmem:[#allocation9 + $0x4] ss:$16 sps:$4 sm:$0xff]   ;;  %8396 = vst [vmem:[#allocation27_spill] sm:$0xff] %v7795_v49 }
 0x3fa   :  { %2531 = vmatpush1.bf16.msra.mxu0 %v7424_v35  ;;  %v7597_v35 = vld [vmem:[#allocation9] ss:$16 sps:$4 sm:$0xff]  }
 0x3fb   :  { %2532 = vmatprep.subr.bf16.mxu0 %v7427_v36  ;;  %v7601_v36 = vld [vmem:[#allocation9 + $0x24] ss:$16 sps:$4 sm:$0xff]  }
 0x3fe   :  { %2533 = vmatpush1.bf16.msra.mxu0 %v7430_v37  ;;  %v7603_v37 = vld [vmem:[#allocation9 + $0x20] ss:$16 sps:$4 sm:$0xff]  }
 0x3ff   :  { %2534 = vmatprep.subr.bf16.mxu0 %v7433_v39  ;;  %v7605_v39 = vld [vmem:[#allocation9 + $0x44] ss:$16 sps:$4 sm:$0xff]  }
 0x402   :  { %2535 = vmatpush1.bf16.msra.mxu0 %v7436_v40  ;;  %v6455_v40 = vld [vmem:[#allocation11] sm:$0xff]  }
 0x403   :  { %2536 = vmatprep.subr.bf16.mxu0 %v7439_v28  ;;  %6109 = vmatpush3.bf16.msra.mxu1 %v6455_v40  ;;  %v6459_v28 = vld [vmem:[#allocation11 + $0x8] sm:$0xff]  }
 0x404   :  { %6110 = vmatprep.subr.bf16.mxu1 %v8381_v61 }
 0x406   :  { %2537 = vmatpush1.bf16.msra.mxu0 %v7442_v29  ;;  %v7615_v29 = vld [vmem:[#allocation9 + $0x60] ss:$16 sps:$4 sm:$0xff]  }
 0x407   :  { %2538 = vmatprep.subr.bf16.mxu0 %v7445_v52  ;;  %v7619_v52 = vld [vmem:[#allocation9 + $0x84] ss:$16 sps:$4 sm:$0xff]   ;;  %6111 = vmatpush3.bf16.msra.mxu1 %v6459_v28 }
 0x408   :  { %6112 = vmatprep.subr.bf16.mxu1 %v8381_v61 }
 0x40a   :  { %2539 = vmatpush1.bf16.msra.mxu0 %v7448_v38  ;;  %v7622_v38 = vld [vmem:[#allocation9 + $0x80] ss:$16 sps:$4 sm:$0xff]  }
 0x40b   :  { %2540 = vmatprep.subr.bf16.mxu0 %v8383_v63  ;;  %6113 = vmatpush3.bf16.msra.mxu1 %v6463_v3 }
 0x40c   :  { %6114 = vmatprep.subr.bf16.mxu1 %v8381_v61 }
 0x40e   :  { %2541 = vmatpush1.bf16.msra.mxu0 %v8384_v21 }
 0x40f   :  { %2542 = vmatprep.subr.bf16.mxu0 %v8385_v2  ;;  %6115 = vmatpush3.bf16.msra.mxu1 %v6467_v9 }
 0x410   :  { %6116 = vmatprep.subr.bf16.mxu1 %v8381_v61 }
 0x412   :  { %2543 = vmatpush1.bf16.msra.mxu0 %v8386_v25 }
 0x413   :  { %2544 = vmatprep.subr.bf16.mxu0 %v8387_v55  ;;  %6117 = vmatpush3.bf16.msra.mxu1 %v6471_v15 }
 0x414   :  { %6118 = vmatprep.subr.bf16.mxu1 %v8381_v61 }
 0x416   :  { %2545 = vmatpush1.bf16.msra.mxu0 %v8388_v23  ;;  %v2139_v23 = vld [vmem:[%s8336_s4] sm:$0xf] }
 0x417   :  { %2546 = vmatprep.subr.bf16.mxu0 %v8389_v30  ;;  %6119 = vmatpush3.bf16.msra.mxu1 %v6475_v59  ;;  %v2464_v30 = vrot.slane %v2139_v23, %v7160_v17  ;;  %v2468_v3 = vrot.slane %v2139_v23, %v7125_v53  ;;  %v2476_v46 = vrot.slane %v2139_v23, %v7234_v47 }
 0x418   :  { %6120 = vmatprep.subr.bf16.mxu1 %v8381_v61 }
 0x41a   :  { %2547 = vmatpush1.bf16.msra.mxu0 %v7472_v14  ;;  %v7626_v14 = vld [vmem:[#allocation9 + $0xa4] ss:$16 sps:$4 sm:$0xff]  }
 0x41b   :  { %2548 = vmatprep.subr.bf16.mxu0 %v7475_v6  ;;  %v7629_v6 = vld [vmem:[#allocation9 + $0xa0] ss:$16 sps:$4 sm:$0xff]   ;;  %6121 = vmatpush3.bf16.msra.mxu1 %v6479_v20 }
 0x41c   :  { %6122 = vmatprep.subr.bf16.mxu1 %v8381_v61 }
 0x41e   :  { %2549 = vmatpush1.bf16.msra.mxu0 %v7478_v18  ;;  %v7632_v18 = vld [vmem:[#allocation9 + $0xc4] ss:$16 sps:$4 sm:$0xff]  }
 0x41f   :  { %2550 = vmatprep.subr.bf16.mxu0 %v7481_v19  ;;  %v7635_v19 = vld [vmem:[#allocation9 + $0xc0] ss:$16 sps:$4 sm:$0xff]   ;;  %6123 = vmatpush3.bf16.msra.mxu1 %v6483_v34 }
 0x420   :  { %3178 = vmatprep.subr.bf16.mxu1 %v7681_v43 }
 0x422   :  { %2551 = vmatpush1.bf16.msra.mxu0 %v7484_v26  ;;  %v7639_v26 = vld [vmem:[#allocation9 + $0xe4] ss:$16 sps:$4 sm:$0xff]  }
 0x423   :  { %2552 = vmatprep.subr.bf16.mxu0 %v7487_v1  ;;  %v7609_v1 = vld [vmem:[#allocation9 + $0x40] ss:$16 sps:$4 sm:$0xff]  }
 0x426   :  { %2553 = vmatpush1.bf16.msra.mxu0 %v7490_v22  ;;  %v7612_v22 = vld [vmem:[#allocation9 + $0x64] ss:$16 sps:$4 sm:$0xff]  }
 0x427   :  { %3137 = vmatprep.subr.bf16.mxu0 %v7595_v31 }
 0x429   :  { %2555 = vmatmul.mubr.bf16.vlgmr.msra.gmra.mrb[20].mxu0 %v2073_v32 }
 0x42a   :  { %3138 = vmatpush1.bf16.msra.mxu0 %v7597_v35 }
 0x42b   :  { %3139 = vmatprep.subr.bf16.mxu0 %v7601_v36 }
 0x42e   :  { %3140 = vmatpush1.bf16.msra.mxu0 %v7603_v37 }
 0x42f   :  { %3141 = vmatprep.subr.bf16.mxu0 %v7605_v39 }
 0x432   :  { %3142 = vmatpush1.bf16.msra.mxu0 %v7609_v1 }
 0x433   :  { %3143 = vmatprep.subr.bf16.mxu0 %v7612_v22 }
 0x436   :  { %3144 = vmatpush1.bf16.msra.mxu0 %v7615_v29 }
 0x437   :  { %3145 = vmatprep.subr.bf16.mxu0 %v7619_v52 }
 0x43a   :  { %3146 = vmatpush1.bf16.msra.mxu0 %v7622_v38 }
 0x43b   :  { %3147 = vmatprep.subr.bf16.mxu0 %v7626_v14 }
 0x43e   :  { %3148 = vmatpush1.bf16.msra.mxu0 %v7629_v6 }
 0x43f   :  { %3149 = vmatprep.subr.bf16.mxu0 %v7632_v18 }
 0x442   :  { %3150 = vmatpush1.bf16.msra.mxu0 %v7635_v19 }
 0x443   :  { %3151 = vmatprep.subr.bf16.mxu0 %v7639_v26 }
 0x446   :  { %3152 = vmatpush1.bf16.msra.mxu0 %v7641_v0 }
 0x447   :  { %3153 = vmatprep.subr.bf16.mxu0 %v7646_v4 }
 0x44a   :  { %3154 = vmatpush1.bf16.msra.mxu0 %v7648_v5 }
 0x44b   :  { %3155 = vmatprep.subr.bf16.mxu0 %v7653_v12 }
 0x44e   :  { %3156 = vmatpush1.bf16.msra.mxu0 %v7655_v13 }
 0x44f   :  { %3157 = vmatprep.subr.bf16.mxu0 %v7660_v27 }
 0x452   :  { %3158 = vmatpush1.bf16.msra.mxu0 %v7662_v58 }
 0x453   :  { %3159 = vmatprep.subr.bf16.mxu0 %v7667_v7 }
 0x456   :  { %3160 = vmatpush1.bf16.msra.mxu0 %v7669_v11 }
 0x457   :  { %3161 = vmatprep.subr.bf16.mxu0 %v7675_v33 }
 0x45a   :  { %3162 = vmatpush1.bf16.msra.mxu0 %v7673_v24 }
 0x45b   :  { %3163 = vmatprep.subr.bf16.mxu0 %v7678_v42 }
 0x45e   :  { %3164 = vmatpush1.bf16.msra.mxu0 %v7684_v44 }
 0x45f   :  { %3165 = vmatprep.subr.bf16.mxu0 %v7693_v54 }
 0x462   :  { %3166 = vmatpush1.bf16.msra.mxu0 %v7691_v51 }
 0x463   :  { %3167 = vmatprep.subr.bf16.mxu0 %v7699_v60 }
 0x466   :  { %3168 = vmatpush1.bf16.msra.mxu0 %v7697_v56 }
 0x467   :  { %6128 = vmatprep.subr.bf16.mxu0 %v8381_v61 }
 0x4bc   :  { %v2035_v10 = vpop.f32.mrb[16].mxu0 }
 0x4bd   :  { %v7707_v57 = vadd.f32 %v2035_v10, %v1952_v8  ;;  %v6106_v45 = vpop.f32.mrb[17].mxu0  ;;  %v2472_v8 = vrot.slane %v2139_v23, %v7237_v48  ;;  %v2589_v23 = vmul.f32 0.0, %v7553_v62 }
 0x4be   :  { %v2038_v16 = vpop.f32.mrb[18].mxu0 }
 0x4bf   :  { %8390 = vst [vmem:[#allocation21_spill] sm:$0xff] %v7707_v57  ;;  %v6107_v32 = vpop.f32.mrb[19].mxu0  ;;  %v2041_v63 = vsel %vm728_vm2, %v7707_v57, -inf  ;;  %v7798_v57 = vld [vmem:[#allocation9 + $0x168] ss:$16 sps:$4 sm:$0xff]  }
 0x4c0   :  { %2042 = vmax.xlane.f32.xlu1 %v2041_v63  ;;  %8397 = vst [vmem:[#allocation29_spill] sm:$0xff] %v7798_v57 }
 0x4c7   :  { %v2515_v21 = vpop.f32.mrb[16].mxu1 }
 0x4c8   :  { %v2517_v2 = vpop.f32.mrb[17].mxu1  ;;  %v2516_v40 = vadd.f32 %v2515_v21, %v2464_v30 }
 0x4c9   :  { %v2519_v25 = vpop.f32.mrb[18].mxu1  ;;  %v2518_v9 = vadd.f32 %v2517_v2, %v2468_v3 }
 0x4ca   :  { %v2520_v55 = vpop.f32.mrb[19].mxu1  ;;  %v5666_v28 = vmul.f32 -1.442695, %v2516_v40 }
 0x4cb   :  { %v5667_v15 = vmul.f32 -1.442695, %v2518_v9 }
 0x4cc   :  { %6699 = vpow2.f32 %v5666_v28 }
 0x4cd   :  { %6701 = vpow2.f32 %v5667_v15 }
 0x4d6   :  { %v6700_v59 = vpop.eup %6699 }
 0x4d7   :  { %v2566_v20 = vadd.f32 1.0, %v6700_v59  ;;  %v6702_v34 = vpop.eup %6701 }
 0x4d8   :  { %v2572_v50 = vadd.f32 1.0, %v6702_v34 }
 0x4d9   :  { %6703 = vrcp.f32 %v2566_v20  ;;  %v7722_v20 = vld [vmem:[#allocation9 + $0x8] ss:$16 sps:$4 sm:$0xff]  }
 0x4da   :  { %6705 = vrcp.f32 %v2572_v50  ;;  %v3369_v50 = vld [vmem:[%s3368_s5] sm:$0x1] }
 0x4e3   :  { %v6704_v63 = vpop.eup %6703 }
 0x4e4   :  { %v6706_v30 = vpop.eup %6705 }
 0x4e5   :  { %v2578_v40 = vsub.f32 1.0, %v6706_v30  ;;  %v2580_v3 = vmul.f32 %v6706_v30, %v7553_v62  ;;  %v7735_v62 = vld [vmem:[#allocation9 + $0x4c] ss:$16 sps:$4 sm:$0xff]  }
 0x4e6   :  { %v7750_v30 = vld [vmem:[#allocation9 + $0x8c] ss:$16 sps:$4 sm:$0xff]  }
 0x4fc   :  { %v2556_v10 = vpop.f32.mrb[20].mxu0 }
 0x4fd   :  { %v2558_v45 = vpop.f32.mrb[21].mxu0  ;;  %v2557_v25 = vadd.f32 %v2556_v10, %v2472_v8  ;;  %v7732_v8 = vld [vmem:[#allocation9 + $0x28] ss:$16 sps:$4 sm:$0xff]   ;;  %v3370_v10 = vmax.f32 %v3369_v50, 0.0  ;;  %v7777_v50 = vld [vmem:[#allocation9 + $0x10c] ss:$16 sps:$4 sm:$0xff]  }
 0x4fe   :  { %v2559_v16 = vadd.f32 %v2558_v45, %v2476_v46  ;;  %v2560_v32 = vpop.f32.mrb[22].mxu0  ;;  %v7729_v46 = vld [vmem:[#allocation9 + $0x2c] ss:$16 sps:$4 sm:$0xff]   ;;  %v7738_v45 = vld [vmem:[#allocation9 + $0x48] ss:$16 sps:$4 sm:$0xff]  }
 0x4ff   :  { %v2561_v21 = vpop.f32.mrb[23].mxu0 }
 0x500   :  { %v2575_v2 = vmul.f32 %v6704_v63, %v2559_v16  ;;  %v7745_v21 = vld [vmem:[#allocation9 + $0x6c] ss:$16 sps:$4 sm:$0xff]  }
 0x502   :  { %v2576_v55 = vadd.f32 %v2575_v2, %v2557_v25 }
 0x504   :  { %6707 = vtanh.f32 %v2576_v55  ;;  %v7748_v55 = vld [vmem:[#allocation9 + $0x68] ss:$16 sps:$4 sm:$0xff]  }
 0x50e   :  { %v6708_v28 = vpop.eup %6707 }
 0x50f   :  { %v2579_v9 = vmul.f32 %v6708_v28, %v2578_v40  ;;  %v7756_v40 = vld [vmem:[#allocation9 + $0x88] ss:$16 sps:$4 sm:$0xff]   ;;  %v7759_v28 = vld [vmem:[#allocation9 + $0xac] ss:$16 sps:$4 sm:$0xff]  }
 0x511   :  { %v2581_v15 = vadd.f32 %v2580_v3, %v2579_v9  ;;  %v7762_v3 = vld [vmem:[#allocation9 + $0xa8] ss:$16 sps:$4 sm:$0xff]   ;;  %v7765_v9 = vld [vmem:[#allocation9 + $0xcc] ss:$16 sps:$4 sm:$0xff]  }
 0x513   :  { %v7720_v59 = vadd.f32 %v2589_v23, %v2581_v15  ;;  %v7768_v15 = vld [vmem:[#allocation9 + $0xc8] ss:$16 sps:$4 sm:$0xff]   ;;  %v7771_v23 = vld [vmem:[#allocation9 + $0xec] ss:$16 sps:$4 sm:$0xff]  }
 0x515   :  { %v2591_v34 = vpack.c.bf16 %v7720_v59, %v7720_v59  ;;  %2716 = vst.msk [vmem:[#allocation3 + $0x1] sm:$0x1] %vm7106_vm0, %v7720_v59 }
 0x517   :  { %6125 = vmatmul.mubr.bf16.vlgmr.msra.gmra.mrb[20].mxu1 %v2591_v34  ;;  %v7774_v34 = vld [vmem:[#allocation9 + $0xe8] ss:$16 sps:$4 sm:$0xff]  }
 0x518   :  { %3179 = vmatpush1.bf16.msra.mxu1 %v7722_v20 }
 0x519   :  { %3180 = vmatprep.subr.bf16.mxu1 %v7729_v46 }
 0x51c   :  { %3181 = vmatpush1.bf16.msra.mxu1 %v7732_v8  ;;  %v2717_v16 = vld [vmem:[#allocation3] sm:$0x3] }
 0x51d   :  { %3182 = vmatprep.subr.bf16.mxu1 %v7735_v62  ;;  %v2726_v32 = vrot.slane %v2717_v16, %v7125_v53  ;;  %3371 = vst.msk [vmem:[#allocation3] sm:$0x1] %vm7106_vm0, %v3370_v10  ;;  %v2722_v63 = vrot.slane %v2717_v16, %v7160_v17  ;;  %v7780_v10 = vld [vmem:[#allocation9 + $0x108] ss:$16 sps:$4 sm:$0xff]   ;;  %v7783_v16 = vld [vmem:[#allocation9 + $0x12c] ss:$16 sps:$4 sm:$0xff]  }
 0x51e   :  { %8391 = vst [vmem:[#allocation22_spill] sm:$0xff] %v7780_v10  ;;  %8392 = vst [vmem:[#allocation23_spill] sm:$0xff] %v7783_v16 }
 0x51f   :  { %v2730_v25 = vpack.c.bf16 %v2726_v32, %v2726_v32  ;;  %v2729_v2 = vpack.c.bf16 %v2722_v63, %v2722_v63  ;;  %v7786_v32 = vld [vmem:[#allocation9 + $0x128] ss:$16 sps:$4 sm:$0xff]   ;;  %v7789_v63 = vld [vmem:[#allocation9 + $0x14c] ss:$16 sps:$4 sm:$0xff]  }
 0x520   :  { %3183 = vmatpush1.bf16.msra.mxu1 %v7738_v45  ;;  %8393 = vst [vmem:[#allocation24_spill] sm:$0xff] %v7786_v32  ;;  %8394 = vst [vmem:[#allocation25_spill] sm:$0xff] %v7789_v63 }
 0x521   :  { %3169 = vmatprep.mubr.bf16.mxu0 %v2730_v25  ;;  %3210 = vmatprep.mubr.bf16.mxu1 %v2730_v25  ;;  %v7792_v25 = vld [vmem:[#allocation9 + $0x148] ss:$16 sps:$4 sm:$0xff]  }
 0x522   :  { %3170 = vmatmul.mubr.bf16.vlgmr.msra.gmra.mrb[24].mxu0 %v2729_v2  ;;  %3184 = vmatprep.subr.bf16.mxu1 %v7745_v21  ;;  %8395 = vst [vmem:[#allocation26_spill] sm:$0xff] %v7792_v25 }
 0x523   :  { %6144 = vmatprep.mubr.msk.bf16.mxu0 %vm6943_vm1, %v8381_v61 }
 0x524   :  { %3185 = vmatpush1.bf16.msra.mxu1 %v7748_v55 }
 0x525   :  { %3186 = vmatprep.subr.bf16.mxu1 %v7750_v30 }
 0x528   :  { %3187 = vmatpush1.bf16.msra.mxu1 %v7756_v40 }
 0x529   :  { %3188 = vmatprep.subr.bf16.mxu1 %v7759_v28 }
 0x52c   :  { %3189 = vmatpush1.bf16.msra.mxu1 %v7762_v3 }
 0x52d   :  { %3190 = vmatprep.subr.bf16.mxu1 %v7765_v9 }
 0x530   :  { %3191 = vmatpush1.bf16.msra.mxu1 %v7768_v15 }
 0x531   :  { %3192 = vmatprep.subr.bf16.mxu1 %v7771_v23 }
 0x534   :  { %3193 = vmatpush1.bf16.msra.mxu1 %v7774_v34 }
 0x535   :  { %3194 = vmatprep.subr.bf16.mxu1 %v7777_v50 }
 0x538   :  { %3195 = vmatpush1.bf16.msra.mxu1 %v7780_v10  ;;  %v7801_v10 = vld [vmem:[#allocation9 + $0x18c] ss:$16 sps:$4 sm:$0xff]  }
 0x539   :  { %3196 = vmatprep.subr.bf16.mxu1 %v7783_v16  ;;  %8398 = vst [vmem:[#allocation30_spill] sm:$0xff] %v7801_v10  ;;  %v7804_v16 = vld [vmem:[#allocation9 + $0x188] ss:$16 sps:$4 sm:$0xff]  }
 0x53c   :  { %3197 = vmatpush1.bf16.msra.mxu1 %v7786_v32  ;;  %v7807_v32 = vld [vmem:[#allocation9 + $0x1ac] ss:$16 sps:$4 sm:$0xff]  }
 0x53d   :  { %3198 = vmatprep.subr.bf16.mxu1 %v7789_v63  ;;  %v7810_v63 = vld [vmem:[#allocation9 + $0x1a8] ss:$16 sps:$4 sm:$0xff]  }
 0x540   :  { %3199 = vmatpush1.bf16.msra.mxu1 %v7792_v25  ;;  %v7813_v25 = vld [vmem:[#allocation9 + $0x1cc] ss:$16 sps:$4 sm:$0xff]  }
 0x541   :  { %3200 = vmatprep.subr.bf16.mxu1 %v7795_v49  ;;  %v7816_v49 = vld [vmem:[#allocation9 + $0x1c8] ss:$16 sps:$4 sm:$0xff]  }
 0x544   :  { %3201 = vmatpush1.bf16.msra.mxu1 %v7798_v57  ;;  %v7819_v57 = vld [vmem:[#allocation9 + $0x1ec] ss:$16 sps:$4 sm:$0xff]  }
 0x545   :  { %3202 = vmatprep.subr.bf16.mxu1 %v7801_v10  ;;  %v7822_v10 = vld [vmem:[#allocation9 + $0x1e8] ss:$16 sps:$4 sm:$0xff]  }
 0x548   :  { %3203 = vmatpush1.bf16.msra.mxu1 %v7804_v16 }
 0x549   :  { %3204 = vmatprep.subr.bf16.mxu1 %v7807_v32 }
 0x54c   :  { %3205 = vmatpush1.bf16.msra.mxu1 %v7810_v63 }
 0x54d   :  { %3206 = vmatprep.subr.bf16.mxu1 %v7813_v25 }
 0x550   :  { %3207 = vmatpush1.bf16.msra.mxu1 %v7816_v49 }
 0x551   :  { %3208 = vmatprep.subr.bf16.mxu1 %v7819_v57 }
 0x554   :  { %3209 = vmatpush1.bf16.msra.mxu1 %v7822_v10 }
 0x555   :  { %3793 = vmatprep.subr.bf16.mxu1 %v7595_v31  ;;  %v6541_v31 = vld [vmem:[#allocation11] sm:$0xff]  }
 0x556   :  { %6129 = vmatpush3.bf16.msra.mxu0 %v6541_v31 }
 0x557   :  { %3211 = vmatmul.mubr.bf16.vlgmr.msra.gmra.mrb[24].mxu1 %v2729_v2  ;;  %6130 = vmatprep.subr.bf16.mxu0 %v8381_v61 }
 0x558   :  { %3794 = vmatpush1.bf16.msra.mxu1 %v7597_v35  ;;  %v6542_v35 = vld [vmem:[#allocation11 + $0x8] sm:$0xff]  }
 0x559   :  { %3795 = vmatprep.subr.bf16.mxu1 %v7601_v36  ;;  %v6543_v36 = vld [vmem:[#allocation11 + $0x10] sm:$0xff]  }
 0x55a   :  { %6131 = vmatpush3.bf16.msra.mxu0 %v6542_v35 }
 0x55b   :  { %6132 = vmatprep.subr.bf16.mxu0 %v8381_v61 }
 0x55c   :  { %3796 = vmatpush1.bf16.msra.mxu1 %v7603_v37  ;;  %v6544_v37 = vld [vmem:[#allocation11 + $0x18] sm:$0xff]  }
 0x55d   :  { %3797 = vmatprep.subr.bf16.mxu1 %v7605_v39  ;;  %v6545_v39 = vld [vmem:[#allocation11 + $0x20] sm:$0xff]  }
 0x55e   :  { %6133 = vmatpush3.bf16.msra.mxu0 %v6543_v36 }
 0x55f   :  { %6134 = vmatprep.subr.bf16.mxu0 %v8381_v61 }
 0x560   :  { %3798 = vmatpush1.bf16.msra.mxu1 %v7609_v1  ;;  %v6546_v1 = vld [vmem:[#allocation11 + $0x28] sm:$0xff]  }
 0x561   :  { %3799 = vmatprep.subr.bf16.mxu1 %v7612_v22  ;;  %v6547_v22 = vld [vmem:[#allocation11 + $0x30] sm:$0xff]  }
 0x562   :  { %6135 = vmatpush3.bf16.msra.mxu0 %v6544_v37 }
 0x563   :  { %6136 = vmatprep.subr.bf16.mxu0 %v8381_v61 }
 0x564   :  { %3800 = vmatpush1.bf16.msra.mxu1 %v7615_v29  ;;  %v6548_v29 = vld [vmem:[#allocation11 + $0x38] sm:$0xff]  }
 0x565   :  { %3801 = vmatprep.subr.bf16.mxu1 %v7619_v52  ;;  %v2608_v52 = vld [vmem:[%s8338_s6] sm:$0x1] }
 0x566   :  { %6137 = vmatpush3.bf16.msra.mxu0 %v6545_v39 }
 0x567   :  { %6138 = vmatprep.subr.bf16.mxu0 %v8381_v61 }
 0x568   :  { %3802 = vmatpush1.bf16.msra.mxu1 %v7622_v38 }
 0x569   :  { %3803 = vmatprep.subr.bf16.mxu1 %v7626_v14 }
 0x56a   :  { %6139 = vmatpush3.bf16.msra.mxu0 %v6546_v1 }
 0x56b   :  { %6140 = vmatprep.subr.bf16.mxu0 %v8381_v61 }
 0x56c   :  { %3804 = vmatpush1.bf16.msra.mxu1 %v7629_v6 }
 0x56d   :  { %3805 = vmatprep.subr.bf16.mxu1 %v7632_v18 }
 0x56e   :  { %6141 = vmatpush3.bf16.msra.mxu0 %v6547_v22 }
 0x56f   :  { %6142 = vmatprep.subr.bf16.mxu0 %v8381_v61 }
 0x570   :  { %3806 = vmatpush1.bf16.msra.mxu1 %v7635_v19 }
 0x571   :  { %3807 = vmatprep.subr.bf16.mxu1 %v7639_v26 }
 0x572   :  { %6143 = vmatpush3.bf16.msra.mxu0 %v6548_v29 }
 0x573   :  { %3834 = vmatprep.subr.bf16.mxu0 %v7681_v43 }
 0x574   :  { %3808 = vmatpush1.bf16.msra.mxu1 %v7641_v0 }
 0x575   :  { %3809 = vmatprep.subr.bf16.mxu1 %v7646_v4 }
 0x578   :  { %3810 = vmatpush1.bf16.msra.mxu1 %v7648_v5 }
 0x579   :  { %3811 = vmatprep.subr.bf16.mxu1 %v7653_v12 }
 0x57c   :  { %3812 = vmatpush1.bf16.msra.mxu1 %v7655_v13  ;;  %v2795_v13 = vld [vmem:[%s8336_s4] sm:$0xf] }
 0x57d   :  { %3813 = vmatprep.subr.bf16.mxu1 %v7660_v27  ;;  %v3120_v27 = vrot.slane %v2795_v13, %v7160_v17 }
 0x580   :  { %3814 = vmatpush1.bf16.msra.mxu1 %v7662_v58 }
 0x581   :  { %3815 = vmatprep.subr.bf16.mxu1 %v7667_v7 }
 0x584   :  { %3816 = vmatpush1.bf16.msra.mxu1 %v7669_v11  ;;  %v3124_v11 = vrot.slane %v2795_v13, %v7125_v53 }
 0x585   :  { %3817 = vmatprep.subr.bf16.mxu1 %v7675_v33 }
 0x588   :  { %3818 = vmatpush1.bf16.msra.mxu1 %v7673_v24 }
 0x589   :  { %3819 = vmatprep.subr.bf16.mxu1 %v7678_v42 }
 0x58c   :  { %3820 = vmatpush1.bf16.msra.mxu1 %v7684_v44 }
 0x58d   :  { %3821 = vmatprep.subr.bf16.mxu1 %v7693_v54 }
 0x590   :  { %3822 = vmatpush1.bf16.msra.mxu1 %v7691_v51  ;;  %v3132_v51 = vrot.slane %v2795_v13, %v7234_v47 }
 0x591   :  { %3823 = vmatprep.subr.bf16.mxu1 %v7699_v60 }
 0x594   :  { %3824 = vmatpush1.bf16.msra.mxu1 %v7697_v56  ;;  %v3128_v56 = vrot.slane %v2795_v13, %v7237_v48 }
 0x595   :  { %6148 = vmatprep.subr.bf16.mxu1 %v8381_v61 }
 0x5ea   :  { %v2691_v38 = vpop.f32.mrb[20].mxu1 }
 0x5eb   :  { %v7870_v14 = vadd.f32 %v2691_v38, %v2608_v52  ;;  %v6126_v6 = vpop.f32.mrb[21].mxu1 }
 0x5ec   :  { %v2694_v18 = vpop.f32.mrb[22].mxu1 }
 0x5ed   :  { %8399 = vst [vmem:[#allocation31_spill] sm:$0xff] %v7870_v14  ;;  %v6127_v19 = vpop.f32.mrb[23].mxu1  ;;  %v2697_v26 = vsel %vm728_vm2, %v7870_v14, -inf  ;;  %v8123_v14 = vld [vmem:[#allocation9 + $0x16c] ss:$16 sps:$4 sm:$0xff]  }
 0x5ee   :  { %2698 = vmax.xlane.f32.xlu1 %v2697_v26  ;;  %v3245_v26 = vmul.f32 0.0, %v7720_v59 }
 0x5f5   :  { %v3171_v0 = vpop.f32.mrb[24].mxu0 }
 0x5f6   :  { %v3173_v4 = vpop.f32.mrb[25].mxu0  ;;  %v3172_v58 = vadd.f32 %v3171_v0, %v3120_v27 }
 0x5f7   :  { %v3175_v5 = vpop.f32.mrb[26].mxu0  ;;  %v3174_v24 = vadd.f32 %v3173_v4, %v3124_v11  ;;  %v7967_v11 = vld [vmem:[#allocation9 + $0xc0] ss:$16 sps:$4 sm:$0xff]  }
 0x5f8   :  { %v3176_v12 = vpop.f32.mrb[27].mxu0  ;;  %v5741_v7 = vmul.f32 -1.442695, %v3172_v58  ;;  %v4025_v5 = vld [vmem:[%s4024_s13] sm:$0x1] }
 0x5f9   :  { %v5742_v33 = vmul.f32 -1.442695, %v3174_v24  ;;  %v4026_v12 = vmax.f32 %v4025_v5, 0.0  ;;  %v7971_v24 = vld [vmem:[#allocation9 + $0xe4] ss:$16 sps:$4 sm:$0xff]  }
 0x5fa   :  { %6709 = vpow2.f32 %v5741_v7  ;;  %v3264_v5 = vld [vmem:[%s8338_s6] sm:$0x1] }
 0x5fb   :  { %6711 = vpow2.f32 %v5742_v33  ;;  %v7973_v33 = vld [vmem:[#allocation9 + $0xe0] ss:$16 sps:$4 sm:$0xff]  }
 0x604   :  { %v6710_v42 = vpop.eup %6709 }
 0x605   :  { %v3222_v43 = vadd.f32 1.0, %v6710_v42  ;;  %v6712_v44 = vpop.eup %6711  ;;  %v6575_v42 = vld [vmem:[#allocation11 + $0x10] sm:$0xff]  }
 0x606   :  { %v3228_v54 = vadd.f32 1.0, %v6712_v44  ;;  %v7980_v44 = vld [vmem:[#allocation9 + $0x100] ss:$16 sps:$4 sm:$0xff]  }
 0x607   :  { %6713 = vrcp.f32 %v3222_v43  ;;  %v7978_v43 = vld [vmem:[#allocation9 + $0x104] ss:$16 sps:$4 sm:$0xff]  }
 0x608   :  { %6715 = vrcp.f32 %v3228_v54  ;;  %v7985_v54 = vld [vmem:[#allocation9 + $0x124] ss:$16 sps:$4 sm:$0xff]  }
 0x611   :  { %v6714_v36 = vpop.eup %6713 }
 0x612   :  { %v6716_v29 = vpop.eup %6715 }
 0x613   :  { %v3234_v52 = vsub.f32 1.0, %v6716_v29  ;;  %v3236_v6 = vmul.f32 %v6716_v29, %v7720_v59  ;;  %v6595_v29 = vld [vmem:[#allocation11 + $0x38] sm:$0xff]  }
 0x62a   :  { %v3212_v60 = vpop.f32.mrb[24].mxu1 }
 0x62b   :  { %v3214_v2 = vpop.f32.mrb[25].mxu1  ;;  %v3213_v39 = vadd.f32 %v3212_v60, %v3128_v56  ;;  %v7987_v56 = vld [vmem:[#allocation9 + $0x120] ss:$16 sps:$4 sm:$0xff]  }
 0x62c   :  { %v3215_v31 = vadd.f32 %v3214_v2, %v3132_v51  ;;  %v3216_v35 = vpop.f32.mrb[26].mxu1  ;;  %v6579_v51 = vld [vmem:[#allocation11 + $0x18] sm:$0xff]   ;;  %v6583_v60 = vld [vmem:[#allocation11 + $0x20] sm:$0xff]  }
 0x62d   :  { %v3217_v37 = vpop.f32.mrb[27].mxu1  ;;  %v7992_v2 = vld [vmem:[#allocation9 + $0x144] ss:$16 sps:$4 sm:$0xff]   ;;  %v6587_v35 = vld [vmem:[#allocation11 + $0x28] sm:$0xff]  }
 0x62e   :  { %v3231_v1 = vmul.f32 %v6714_v36, %v3215_v31  ;;  %v7994_v31 = vld [vmem:[#allocation9 + $0x140] ss:$16 sps:$4 sm:$0xff]   ;;  %v7999_v36 = vld [vmem:[#allocation9 + $0x164] ss:$16 sps:$4 sm:$0xff]  }
 0x62f   :  { %v8001_v37 = vld [vmem:[#allocation9 + $0x160] ss:$16 sps:$4 sm:$0xff]  }
 0x630   :  { %v3232_v22 = vadd.f32 %v3231_v1, %v3213_v39  ;;  %v6591_v39 = vld [vmem:[#allocation11 + $0x30] sm:$0xff]  }
 0x631   :  { %v8005_v1 = vld [vmem:[#allocation9 + $0x180] ss:$16 sps:$4 sm:$0xff]  }
 0x632   :  { %6717 = vtanh.f32 %v3232_v22  ;;  %v8007_v22 = vld [vmem:[#allocation9 + $0x184] ss:$16 sps:$4 sm:$0xff]  }
 0x63c   :  { %v6718_v38 = vpop.eup %6717 }
 0x63d   :  { %v3235_v18 = vmul.f32 %v6718_v38, %v3234_v52  ;;  %v8010_v52 = vld [vmem:[#allocation9 + $0x1a4] ss:$16 sps:$4 sm:$0xff]   ;;  %v8013_v38 = vld [vmem:[#allocation9 + $0xc] ss:$16 sps:$4 sm:$0xff]  }
 0x63f   :  { %v3237_v19 = vadd.f32 %v3236_v6, %v3235_v18  ;;  %v8016_v6 = vld [vmem:[#allocation9 + $0x1a0] ss:$16 sps:$4 sm:$0xff]  }
 0x640   :  { %v8021_v18 = vld [vmem:[#allocation9 + $0x1c0] ss:$16 sps:$4 sm:$0xff]  }
 0x641   :  { %v7883_v0 = vadd.f32 %v3245_v26, %v3237_v19  ;;  %v8023_v19 = vld [vmem:[#allocation9 + $0x1c4] ss:$16 sps:$4 sm:$0xff]   ;;  %v8027_v26 = vld [vmem:[#allocation9 + $0x1e0] ss:$16 sps:$4 sm:$0xff]  }
 0x643   :  { %v3247_v4 = vpack.c.bf16 %v7883_v0, %v7883_v0  ;;  %3372 = vst.msk [vmem:[#allocation3 + $0x1] sm:$0x1] %vm7106_vm0, %v7883_v0 }
 0x645   :  { %6145 = vmatmul.mubr.bf16.vlgmr.msra.gmra.mrb[28].mxu0 %v3247_v4  ;;  %v8029_v4 = vld [vmem:[#allocation9 + $0x1e4] ss:$16 sps:$4 sm:$0xff]  }
 0x646   :  { %3835 = vmatpush1.bf16.msra.mxu0 %v7722_v20  ;;  %v8400_v20 = vld [vmem:[#allocation22_spill] sm:$0xff] }
 0x647   :  { %3836 = vmatprep.subr.bf16.mxu0 %v7729_v46  ;;  %v8401_v46 = vld [vmem:[#allocation23_spill] sm:$0xff] }
 0x64a   :  { %3837 = vmatpush1.bf16.msra.mxu0 %v7732_v8  ;;  %v3373_v59 = vld [vmem:[#allocation3] sm:$0x3] }
 0x64b   :  { %3838 = vmatprep.subr.bf16.mxu0 %v7735_v62  ;;  %v3382_v13 = vrot.slane %v3373_v59, %v7125_v53  ;;  %4027 = vst.msk [vmem:[#allocation3] sm:$0x1] %vm7106_vm0, %v4026_v12  ;;  %v3378_v27 = vrot.slane %v3373_v59, %v7160_v17  ;;  %v8402_v8 = vld [vmem:[#allocation24_spill] sm:$0xff]  ;;  %v8403_v62 = vld [vmem:[#allocation25_spill] sm:$0xff] }
 0x64d   :  { %v3386_v58 = vpack.c.bf16 %v3382_v13, %v3382_v13  ;;  %v3385_v7 = vpack.c.bf16 %v3378_v27, %v3378_v27 }
 0x64e   :  { %3839 = vmatpush1.bf16.msra.mxu0 %v7738_v45  ;;  %v8404_v45 = vld [vmem:[#allocation26_spill] sm:$0xff] }
 0x64f   :  { %3825 = vmatprep.mubr.bf16.mxu1 %v3386_v58  ;;  %3866 = vmatprep.mubr.bf16.mxu0 %v3386_v58 }
 0x650   :  { %3826 = vmatmul.mubr.bf16.vlgmr.msra.gmra.mrb[28].mxu1 %v3385_v7  ;;  %3840 = vmatprep.subr.bf16.mxu0 %v7745_v21  ;;  %v8405_v21 = vld [vmem:[#allocation27_spill] sm:$0xff] }
 0x651   :  { %6164 = vmatprep.mubr.msk.bf16.mxu1 %vm6943_vm1, %v8381_v61 }
 0x652   :  { %3841 = vmatpush1.bf16.msra.mxu0 %v7748_v55  ;;  %v8406_v55 = vld [vmem:[#allocation29_spill] sm:$0xff] }
 0x653   :  { %3842 = vmatprep.subr.bf16.mxu0 %v7750_v30  ;;  %v8407_v30 = vld [vmem:[#allocation30_spill] sm:$0xff]  ;;  %8414 = vst [vmem:[#allocation29_spill] sm:$0xff] %v8123_v14 }
 0x656   :  { %3843 = vmatpush1.bf16.msra.mxu0 %v7756_v40  ;;  %v7927_v40 = vld [vmem:[#allocation9 + $0x4] ss:$16 sps:$4 sm:$0xff]  }
 0x657   :  { %3844 = vmatprep.subr.bf16.mxu0 %v7759_v28  ;;  %v7929_v28 = vld [vmem:[#allocation9] ss:$16 sps:$4 sm:$0xff]  }
 0x65a   :  { %3845 = vmatpush1.bf16.msra.mxu0 %v7762_v3  ;;  %v7933_v3 = vld [vmem:[#allocation9 + $0x24] ss:$16 sps:$4 sm:$0xff]  }
 0x65b   :  { %3846 = vmatprep.subr.bf16.mxu0 %v7765_v9  ;;  %v7935_v9 = vld [vmem:[#allocation9 + $0x20] ss:$16 sps:$4 sm:$0xff]  }
 0x65e   :  { %3847 = vmatpush1.bf16.msra.mxu0 %v7768_v15  ;;  %v7937_v15 = vld [vmem:[#allocation9 + $0x44] ss:$16 sps:$4 sm:$0xff]  }
 0x65f   :  { %3848 = vmatprep.subr.bf16.mxu0 %v7771_v23  ;;  %v6567_v23 = vld [vmem:[#allocation11] sm:$0xff]  }
 0x660   :  { %6149 = vmatpush3.bf16.msra.mxu1 %v6567_v23 }
 0x661   :  { %6150 = vmatprep.subr.bf16.mxu1 %v8381_v61 }
 0x662   :  { %3849 = vmatpush1.bf16.msra.mxu0 %v7774_v34  ;;  %v6571_v34 = vld [vmem:[#allocation11 + $0x8] sm:$0xff]  }
 0x663   :  { %3850 = vmatprep.subr.bf16.mxu0 %v7777_v50  ;;  %v7947_v50 = vld [vmem:[#allocation9 + $0x60] ss:$16 sps:$4 sm:$0xff]  }
 0x664   :  { %6151 = vmatpush3.bf16.msra.mxu1 %v6571_v34 }
 0x665   :  { %6152 = vmatprep.subr.bf16.mxu1 %v8381_v61 }
 0x666   :  { %3851 = vmatpush1.bf16.msra.mxu0 %v8400_v20 }
 0x667   :  { %3852 = vmatprep.subr.bf16.mxu0 %v8401_v46 }
 0x668   :  { %6153 = vmatpush3.bf16.msra.mxu1 %v6575_v42 }
 0x669   :  { %6154 = vmatprep.subr.bf16.mxu1 %v8381_v61 }
 0x66a   :  { %3853 = vmatpush1.bf16.msra.mxu0 %v8402_v8 }
 0x66b   :  { %3854 = vmatprep.subr.bf16.mxu0 %v8403_v62 }
 0x66c   :  { %6155 = vmatpush3.bf16.msra.mxu1 %v6579_v51 }
 0x66d   :  { %6156 = vmatprep.subr.bf16.mxu1 %v8381_v61 }
 0x66e   :  { %3855 = vmatpush1.bf16.msra.mxu0 %v8404_v45  ;;  %v3451_v45 = vld [vmem:[%s8336_s4] sm:$0xf] }
 0x66f   :  { %3856 = vmatprep.subr.bf16.mxu0 %v8405_v21  ;;  %v3776_v21 = vrot.slane %v3451_v45, %v7160_v17  ;;  %v3780_v23 = vrot.slane %v3451_v45, %v7125_v53 }
 0x670   :  { %6157 = vmatpush3.bf16.msra.mxu1 %v6583_v60 }
 0x671   :  { %6158 = vmatprep.subr.bf16.mxu1 %v8381_v61 }
 0x672   :  { %3857 = vmatpush1.bf16.msra.mxu0 %v8406_v55 }
 0x673   :  { %3858 = vmatprep.subr.bf16.mxu0 %v8407_v30 }
 0x674   :  { %6159 = vmatpush3.bf16.msra.mxu1 %v6587_v35 }
 0x675   :  { %6160 = vmatprep.subr.bf16.mxu1 %v8381_v61 }
 0x676   :  { %3859 = vmatpush1.bf16.msra.mxu0 %v7804_v16  ;;  %v7954_v16 = vld [vmem:[#allocation9 + $0x80] ss:$16 sps:$4 sm:$0xff]  }
 0x677   :  { %3860 = vmatprep.subr.bf16.mxu0 %v7807_v32  ;;  %v7958_v32 = vld [vmem:[#allocation9 + $0xa4] ss:$16 sps:$4 sm:$0xff]  }
 0x678   :  { %6161 = vmatpush3.bf16.msra.mxu1 %v6591_v39  ;;  %v3788_v39 = vrot.slane %v3451_v45, %v7234_v47 }
 0x679   :  { %6162 = vmatprep.subr.bf16.mxu1 %v8381_v61 }
 0x67a   :  { %3861 = vmatpush1.bf16.msra.mxu0 %v7810_v63  ;;  %v7961_v63 = vld [vmem:[#allocation9 + $0xa0] ss:$16 sps:$4 sm:$0xff]  }
 0x67b   :  { %3862 = vmatprep.subr.bf16.mxu0 %v7813_v25  ;;  %v7964_v25 = vld [vmem:[#allocation9 + $0xc4] ss:$16 sps:$4 sm:$0xff]  }
 0x67c   :  { %6163 = vmatpush3.bf16.msra.mxu1 %v6595_v29 }
 0x67d   :  { %4490 = vmatprep.subr.bf16.mxu1 %v8013_v38 }
 0x67e   :  { %3863 = vmatpush1.bf16.msra.mxu0 %v7816_v49  ;;  %v7941_v49 = vld [vmem:[#allocation9 + $0x40] ss:$16 sps:$4 sm:$0xff]  }
 0x67f   :  { %3864 = vmatprep.subr.bf16.mxu0 %v7819_v57  ;;  %v7944_v57 = vld [vmem:[#allocation9 + $0x64] ss:$16 sps:$4 sm:$0xff]  }
 0x682   :  { %3865 = vmatpush1.bf16.msra.mxu0 %v7822_v10  ;;  %v7951_v10 = vld [vmem:[#allocation9 + $0x84] ss:$16 sps:$4 sm:$0xff]  }
 0x683   :  { %4449 = vmatprep.subr.bf16.mxu0 %v7927_v40 }
 0x685   :  { %3867 = vmatmul.mubr.bf16.vlgmr.msra.gmra.mrb[32].mxu0 %v3385_v7 }
 0x686   :  { %4450 = vmatpush1.bf16.msra.mxu0 %v7929_v28 }
 0x687   :  { %4451 = vmatprep.subr.bf16.mxu0 %v7933_v3 }
 0x68a   :  { %4452 = vmatpush1.bf16.msra.mxu0 %v7935_v9 }
 0x68b   :  { %4453 = vmatprep.subr.bf16.mxu0 %v7937_v15 }
 0x68e   :  { %4454 = vmatpush1.bf16.msra.mxu0 %v7941_v49 }
 0x68f   :  { %4455 = vmatprep.subr.bf16.mxu0 %v7944_v57 }
 0x692   :  { %4456 = vmatpush1.bf16.msra.mxu0 %v7947_v50 }
 0x693   :  { %4457 = vmatprep.subr.bf16.mxu0 %v7951_v10 }
 0x696   :  { %4458 = vmatpush1.bf16.msra.mxu0 %v7954_v16 }
 0x697   :  { %4459 = vmatprep.subr.bf16.mxu0 %v7958_v32 }
 0x69a   :  { %4460 = vmatpush1.bf16.msra.mxu0 %v7961_v63 }
 0x69b   :  { %4461 = vmatprep.subr.bf16.mxu0 %v7964_v25 }
 0x69e   :  { %4462 = vmatpush1.bf16.msra.mxu0 %v7967_v11 }
 0x69f   :  { %4463 = vmatprep.subr.bf16.mxu0 %v7971_v24 }
 0x6a2   :  { %4464 = vmatpush1.bf16.msra.mxu0 %v7973_v33 }
 0x6a3   :  { %4465 = vmatprep.subr.bf16.mxu0 %v7978_v43 }
 0x6a6   :  { %4466 = vmatpush1.bf16.msra.mxu0 %v7980_v44 }
 0x6a7   :  { %4467 = vmatprep.subr.bf16.mxu0 %v7985_v54 }
 0x6aa   :  { %4468 = vmatpush1.bf16.msra.mxu0 %v7987_v56 }
 0x6ab   :  { %4469 = vmatprep.subr.bf16.mxu0 %v7992_v2 }
 0x6ae   :  { %4470 = vmatpush1.bf16.msra.mxu0 %v7994_v31 }
 0x6af   :  { %4471 = vmatprep.subr.bf16.mxu0 %v7999_v36 }
 0x6b2   :  { %4472 = vmatpush1.bf16.msra.mxu0 %v8001_v37 }
 0x6b3   :  { %4473 = vmatprep.subr.bf16.mxu0 %v8007_v22 }
 0x6b6   :  { %4474 = vmatpush1.bf16.msra.mxu0 %v8005_v1 }
 0x6b7   :  { %4475 = vmatprep.subr.bf16.mxu0 %v8010_v52 }
 0x6ba   :  { %4476 = vmatpush1.bf16.msra.mxu0 %v8016_v6 }
 0x6bb   :  { %4477 = vmatprep.subr.bf16.mxu0 %v8023_v19 }
 0x6be   :  { %4478 = vmatpush1.bf16.msra.mxu0 %v8021_v18 }
 0x6bf   :  { %4479 = vmatprep.subr.bf16.mxu0 %v8029_v4 }
 0x6c2   :  { %4480 = vmatpush1.bf16.msra.mxu0 %v8027_v26 }
 0x6c3   :  { %6168 = vmatprep.subr.bf16.mxu0 %v8381_v61 }
 0x718   :  { %v3347_v12 = vpop.f32.mrb[28].mxu0 }
 0x719   :  { %v8037_v59 = vadd.f32 %v3347_v12, %v3264_v5  ;;  %v6146_v13 = vpop.f32.mrb[29].mxu0  ;;  %v3784_v5 = vrot.slane %v3451_v45, %v7237_v48  ;;  %v3901_v45 = vmul.f32 0.0, %v7883_v0 }
 0x71a   :  { %v3350_v27 = vpop.f32.mrb[30].mxu0 }
 0x71b   :  { %8408 = vst [vmem:[#allocation22_spill] sm:$0xff] %v8037_v59  ;;  %v6147_v58 = vpop.f32.mrb[31].mxu0  ;;  %v3353_v7 = vsel %vm728_vm2, %v8037_v59, -inf  ;;  %v8126_v59 = vld [vmem:[#allocation9 + $0x168] ss:$16 sps:$4 sm:$0xff]  }
 0x71c   :  { %3354 = vmax.xlane.f32.xlu0 %v3353_v7  ;;  %8415 = vst [vmem:[#allocation30_spill] sm:$0xff] %v8126_v59 }
 0x723   :  { %v3827_v20 = vpop.f32.mrb[28].mxu1 }
 0x724   :  { %v3829_v46 = vpop.f32.mrb[29].mxu1  ;;  %v3828_v55 = vadd.f32 %v3827_v20, %v3776_v21 }
 0x725   :  { %v3831_v8 = vpop.f32.mrb[30].mxu1  ;;  %v3830_v34 = vadd.f32 %v3829_v46, %v3780_v23 }
 0x726   :  { %v3832_v62 = vpop.f32.mrb[31].mxu1  ;;  %v5816_v30 = vmul.f32 -1.442695, %v3828_v55 }
 0x727   :  { %v5817_v42 = vmul.f32 -1.442695, %v3830_v34 }
 0x728   :  { %6719 = vpow2.f32 %v5816_v30 }
 0x729   :  { %6721 = vpow2.f32 %v5817_v42 }
 0x732   :  { %v6720_v51 = vpop.eup %6719 }
 0x733   :  { %v3878_v60 = vadd.f32 1.0, %v6720_v51  ;;  %v6722_v35 = vpop.eup %6721 }
 0x734   :  { %v3884_v29 = vadd.f32 1.0, %v6722_v35 }
 0x735   :  { %6723 = vrcp.f32 %v3878_v60  ;;  %v8052_v60 = vld [vmem:[#allocation9 + $0x8] ss:$16 sps:$4 sm:$0xff]  }
 0x736   :  { %6725 = vrcp.f32 %v3884_v29  ;;  %v8062_v29 = vld [vmem:[#allocation9 + $0x28] ss:$16 sps:$4 sm:$0xff]  }
 0x73f   :  { %v6724_v7 = vpop.eup %6723 }
 0x740   :  { %v6726_v21 = vpop.eup %6725 }
 0x741   :  { %v3890_v55 = vsub.f32 1.0, %v6726_v21  ;;  %v3892_v23 = vmul.f32 %v6726_v21, %v7883_v0  ;;  %v8065_v0 = vld [vmem:[#allocation9 + $0x4c] ss:$16 sps:$4 sm:$0xff]  }
 0x742   :  { %v8087_v21 = vld [vmem:[#allocation9 + $0xac] ss:$16 sps:$4 sm:$0xff]  }
 0x758   :  { %v3868_v12 = vpop.f32.mrb[32].mxu0 }
 0x759   :  { %v3870_v13 = vpop.f32.mrb[33].mxu0  ;;  %v3869_v8 = vadd.f32 %v3868_v12, %v3784_v5  ;;  %v8068_v5 = vld [vmem:[#allocation9 + $0x48] ss:$16 sps:$4 sm:$0xff]  }
 0x75a   :  { %v3871_v27 = vadd.f32 %v3870_v13, %v3788_v39  ;;  %v3872_v58 = vpop.f32.mrb[34].mxu0  ;;  %v8059_v39 = vld [vmem:[#allocation9 + $0x2c] ss:$16 sps:$4 sm:$0xff]  }
 0x75b   :  { %v3873_v20 = vpop.f32.mrb[35].mxu0  ;;  %v8073_v58 = vld [vmem:[#allocation9 + $0x6c] ss:$16 sps:$4 sm:$0xff]  }
 0x75c   :  { %v3887_v46 = vmul.f32 %v6724_v7, %v3871_v27 }
 0x75e   :  { %v3888_v62 = vadd.f32 %v3887_v46, %v3869_v8  ;;  %v8076_v8 = vld [vmem:[#allocation9 + $0x68] ss:$16 sps:$4 sm:$0xff]   ;;  %v8078_v46 = vld [vmem:[#allocation9 + $0x8c] ss:$16 sps:$4 sm:$0xff]  }
 0x760   :  { %6727 = vtanh.f32 %v3888_v62  ;;  %v8084_v62 = vld [vmem:[#allocation9 + $0x88] ss:$16 sps:$4 sm:$0xff]  }
 0x76a   :  { %v6728_v30 = vpop.eup %6727 }
 0x76b   :  { %v3891_v34 = vmul.f32 %v6728_v30, %v3890_v55  ;;  %v8090_v55 = vld [vmem:[#allocation9 + $0xa8] ss:$16 sps:$4 sm:$0xff]   ;;  %v8093_v30 = vld [vmem:[#allocation9 + $0xcc] ss:$16 sps:$4 sm:$0xff]  }
 0x76d   :  { %v3893_v42 = vadd.f32 %v3892_v23, %v3891_v34  ;;  %v8096_v23 = vld [vmem:[#allocation9 + $0xc8] ss:$16 sps:$4 sm:$0xff]   ;;  %v8099_v34 = vld [vmem:[#allocation9 + $0xec] ss:$16 sps:$4 sm:$0xff]  }
 0x76f   :  { %v8050_v51 = vadd.f32 %v3901_v45, %v3893_v42  ;;  %v8102_v42 = vld [vmem:[#allocation9 + $0xe8] ss:$16 sps:$4 sm:$0xff]   ;;  %v8105_v45 = vld [vmem:[#allocation9 + $0x10c] ss:$16 sps:$4 sm:$0xff]  }
 0x771   :  { %v3903_v35 = vpack.c.bf16 %v8050_v51, %v8050_v51  ;;  %4028 = vst.msk [vmem:[#allocation3 + $0x1] sm:$0x1] %vm7106_vm0, %v8050_v51 }
 0x773   :  { %6165 = vmatmul.mubr.bf16.vlgmr.msra.gmra.mrb[32].mxu1 %v3903_v35  ;;  %v8108_v35 = vld [vmem:[#allocation9 + $0x108] ss:$16 sps:$4 sm:$0xff]  }
 0x774   :  { %4491 = vmatpush1.bf16.msra.mxu1 %v8052_v60  ;;  %8409 = vst [vmem:[#allocation23_spill] sm:$0xff] %v8108_v35 }
 0x775   :  { %4492 = vmatprep.subr.bf16.mxu1 %v8059_v39 }
 0x778   :  { %4493 = vmatpush1.bf16.msra.mxu1 %v8062_v29  ;;  %v4029_v12 = vld [vmem:[#allocation3] sm:$0x3] }
 0x779   :  { %4494 = vmatprep.subr.bf16.mxu1 %v8065_v0  ;;  %v4038_v13 = vrot.slane %v4029_v12, %v7125_v53  ;;  %v4034_v27 = vrot.slane %v4029_v12, %v7160_v17  ;;  %v8111_v12 = vld [vmem:[#allocation9 + $0x12c] ss:$16 sps:$4 sm:$0xff]  }
 0x77a   :  { %8410 = vst [vmem:[#allocation24_spill] sm:$0xff] %v8111_v12 }
 0x77b   :  { %v4042_v7 = vpack.c.bf16 %v4038_v13, %v4038_v13  ;;  %v4041_v20 = vpack.c.bf16 %v4034_v27, %v4034_v27  ;;  %v8114_v13 = vld [vmem:[#allocation9 + $0x128] ss:$16 sps:$4 sm:$0xff]   ;;  %v8117_v27 = vld [vmem:[#allocation9 + $0x14c] ss:$16 sps:$4 sm:$0xff]  }
 0x77c   :  { %4495 = vmatpush1.bf16.msra.mxu1 %v8068_v5  ;;  %8411 = vst [vmem:[#allocation25_spill] sm:$0xff] %v8114_v13  ;;  %8412 = vst [vmem:[#allocation26_spill] sm:$0xff] %v8117_v27  ;;  %v8417_v41 = vld [vmem:[#allocation23_spill] sm:$0xff] }
 0x77d   :  { %4481 = vmatprep.mubr.bf16.mxu0 %v4042_v7  ;;  %4522 = vmatprep.mubr.bf16.mxu1 %v4042_v7  ;;  %v8120_v7 = vld [vmem:[#allocation9 + $0x148] ss:$16 sps:$4 sm:$0xff]  }
 0x77e   :  { %4482 = vmatmul.mubr.bf16.vlgmr.msra.gmra.mrb[36].mxu0 %v4041_v20  ;;  %4496 = vmatprep.subr.bf16.mxu1 %v8073_v58  ;;  %8413 = vst [vmem:[#allocation27_spill] sm:$0xff] %v8120_v7 }
 0x77f   :  { %6184 = vmatprep.mubr.msk.bf16.mxu0 %vm6943_vm1, %v8381_v61 }
 0x780   :  { %4497 = vmatpush1.bf16.msra.mxu1 %v8076_v8 }
 0x781   :  { %4498 = vmatprep.subr.bf16.mxu1 %v8078_v46 }
 0x784   :  { %4499 = vmatpush1.bf16.msra.mxu1 %v8084_v62 }
 0x785   :  { %4500 = vmatprep.subr.bf16.mxu1 %v8087_v21 }
 0x788   :  { %4501 = vmatpush1.bf16.msra.mxu1 %v8090_v55 }
 0x789   :  { %4502 = vmatprep.subr.bf16.mxu1 %v8093_v30 }
 0x78c   :  { %4503 = vmatpush1.bf16.msra.mxu1 %v8096_v23 }
 0x78d   :  { %4504 = vmatprep.subr.bf16.mxu1 %v8099_v34 }
 0x790   :  { %4505 = vmatpush1.bf16.msra.mxu1 %v8102_v42 }
 0x791   :  { %4506 = vmatprep.subr.bf16.mxu1 %v8105_v45 }
 0x794   :  { %4507 = vmatpush1.bf16.msra.mxu1 %v8108_v35  ;;  %v8129_v35 = vld [vmem:[#allocation9 + $0x18c] ss:$16 sps:$4 sm:$0xff]  }
 0x795   :  { %4508 = vmatprep.subr.bf16.mxu1 %v8111_v12  ;;  %8416 = vst [vmem:[#allocation32_spill] sm:$0xff] %v8129_v35  ;;  %v8132_v12 = vld [vmem:[#allocation9 + $0x188] ss:$16 sps:$4 sm:$0xff]  }
 0x798   :  { %4509 = vmatpush1.bf16.msra.mxu1 %v8114_v13  ;;  %v8135_v13 = vld [vmem:[#allocation9 + $0x1ac] ss:$16 sps:$4 sm:$0xff]  }
 0x799   :  { %4510 = vmatprep.subr.bf16.mxu1 %v8117_v27  ;;  %v8138_v27 = vld [vmem:[#allocation9 + $0x1a8] ss:$16 sps:$4 sm:$0xff]  }
 0x79c   :  { %4511 = vmatpush1.bf16.msra.mxu1 %v8120_v7  ;;  %v8141_v7 = vld [vmem:[#allocation9 + $0x1cc] ss:$16 sps:$4 sm:$0xff]  }
 0x79d   :  { %4512 = vmatprep.subr.bf16.mxu1 %v8123_v14  ;;  %v8144_v14 = vld [vmem:[#allocation9 + $0x1c8] ss:$16 sps:$4 sm:$0xff]  }
 0x7a0   :  { %4513 = vmatpush1.bf16.msra.mxu1 %v8126_v59  ;;  %v8147_v59 = vld [vmem:[#allocation9 + $0x1ec] ss:$16 sps:$4 sm:$0xff]  }
 0x7a1   :  { %4514 = vmatprep.subr.bf16.mxu1 %v8129_v35  ;;  %v8150_v35 = vld [vmem:[#allocation9 + $0x1e8] ss:$16 sps:$4 sm:$0xff]  }
 0x7a4   :  { %4515 = vmatpush1.bf16.msra.mxu1 %v8132_v12 }
 0x7a5   :  { %4516 = vmatprep.subr.bf16.mxu1 %v8135_v13 }
 0x7a8   :  { %4517 = vmatpush1.bf16.msra.mxu1 %v8138_v27 }
 0x7a9   :  { %4518 = vmatprep.subr.bf16.mxu1 %v8141_v7 }
 0x7ac   :  { %4519 = vmatpush1.bf16.msra.mxu1 %v8144_v14 }
 0x7ad   :  { %4520 = vmatprep.subr.bf16.mxu1 %v8147_v59 }
 0x7b0   :  { %4521 = vmatpush1.bf16.msra.mxu1 %v8150_v35 }
 0x7b1   :  { %5105 = vmatprep.subr.bf16.mxu1 %v7927_v40  ;;  %v6653_v40 = vld [vmem:[#allocation11] sm:$0xff]  }
 0x7b2   :  { %6169 = vmatpush3.bf16.msra.mxu0 %v6653_v40 }
 0x7b3   :  { %4523 = vmatmul.mubr.bf16.vlgmr.msra.gmra.mrb[36].mxu1 %v4041_v20  ;;  %6170 = vmatprep.subr.bf16.mxu0 %v8381_v61 }
 0x7b4   :  { %5106 = vmatpush1.bf16.msra.mxu1 %v7929_v28  ;;  %v6654_v28 = vld [vmem:[#allocation11 + $0x8] sm:$0xff]  }
 0x7b5   :  { %5107 = vmatprep.subr.bf16.mxu1 %v7933_v3  ;;  %v6655_v3 = vld [vmem:[#allocation11 + $0x10] sm:$0xff]  }
 0x7b6   :  { %6171 = vmatpush3.bf16.msra.mxu0 %v6654_v28 }
 0x7b7   :  { %6172 = vmatprep.subr.bf16.mxu0 %v8381_v61 }
 0x7b8   :  { %5108 = vmatpush1.bf16.msra.mxu1 %v7935_v9  ;;  %v6656_v9 = vld [vmem:[#allocation11 + $0x18] sm:$0xff]  }
 0x7b9   :  { %5109 = vmatprep.subr.bf16.mxu1 %v7937_v15  ;;  %v6657_v15 = vld [vmem:[#allocation11 + $0x20] sm:$0xff]  }
 0x7ba   :  { %6173 = vmatpush3.bf16.msra.mxu0 %v6655_v3 }
 0x7bb   :  { %6174 = vmatprep.subr.bf16.mxu0 %v8381_v61 }
 0x7bc   :  { %5110 = vmatpush1.bf16.msra.mxu1 %v7941_v49  ;;  %v6658_v49 = vld [vmem:[#allocation11 + $0x28] sm:$0xff]  }
 0x7bd   :  { %5111 = vmatprep.subr.bf16.mxu1 %v7944_v57  ;;  %v6659_v57 = vld [vmem:[#allocation11 + $0x30] sm:$0xff]  }
 0x7be   :  { %6175 = vmatpush3.bf16.msra.mxu0 %v6656_v9 }
 0x7bf   :  { %6176 = vmatprep.subr.bf16.mxu0 %v8381_v61 }
 0x7c0   :  { %5112 = vmatpush1.bf16.msra.mxu1 %v7947_v50  ;;  %v6660_v50 = vld [vmem:[#allocation11 + $0x38] sm:$0xff]  }
 0x7c1   :  { %5113 = vmatprep.subr.bf16.mxu1 %v7951_v10  ;;  %v4681_v10 = vld [vmem:[%s4680_s18] sm:$0x1] }
 0x7c2   :  { %6177 = vmatpush3.bf16.msra.mxu0 %v6657_v15 }
 0x7c3   :  { %6178 = vmatprep.subr.bf16.mxu0 %v8381_v61 }
 0x7c4   :  { %5114 = vmatpush1.bf16.msra.mxu1 %v7954_v16  ;;  %v4682_v16 = vmax.f32 %v4681_v10, 0.0 }
 0x7c5   :  { %5115 = vmatprep.subr.bf16.mxu1 %v7958_v32  ;;  %v3920_v32 = vld [vmem:[%s8338_s6] sm:$0x1] }
 0x7c6   :  { %6179 = vmatpush3.bf16.msra.mxu0 %v6658_v49  ;;  %4683 = vst.msk [vmem:[#allocation3] sm:$0x1] %vm7106_vm0, %v4682_v16 }
 0x7c7   :  { %6180 = vmatprep.subr.bf16.mxu0 %v8381_v61 }
 0x7c8   :  { %5116 = vmatpush1.bf16.msra.mxu1 %v7961_v63 }
 0x7c9   :  { %5117 = vmatprep.subr.bf16.mxu1 %v7964_v25 }
 0x7ca   :  { %6181 = vmatpush3.bf16.msra.mxu0 %v6659_v57 }
 0x7cb   :  { %6182 = vmatprep.subr.bf16.mxu0 %v8381_v61 }
 0x7cc   :  { %5118 = vmatpush1.bf16.msra.mxu1 %v7967_v11 }
 0x7cd   :  { %5119 = vmatprep.subr.bf16.mxu1 %v7971_v24 }
 0x7ce   :  { %6183 = vmatpush3.bf16.msra.mxu0 %v6660_v50 }
 0x7cf   :  { %5146 = vmatprep.subr.bf16.mxu0 %v8013_v38 }
 0x7d0   :  { %5120 = vmatpush1.bf16.msra.mxu1 %v7973_v33 }
 0x7d1   :  { %5121 = vmatprep.subr.bf16.mxu1 %v7978_v43 }
 0x7d4   :  { %5122 = vmatpush1.bf16.msra.mxu1 %v7980_v44 }
 0x7d5   :  { %5123 = vmatprep.subr.bf16.mxu1 %v7985_v54 }
 0x7d8   :  { %5124 = vmatpush1.bf16.msra.mxu1 %v7987_v56 }
 0x7d9   :  { %5125 = vmatprep.subr.bf16.mxu1 %v7992_v2 }
 0x7dc   :  { %5126 = vmatpush1.bf16.msra.mxu1 %v7994_v31  ;;  %v4107_v31 = vld [vmem:[%s8336_s4] sm:$0xf] }
 0x7dd   :  { %5127 = vmatprep.subr.bf16.mxu1 %v7999_v36  ;;  %v4432_v36 = vrot.slane %v4107_v31, %v7160_v17  ;;  %v4440_v20 = vrot.slane %v4107_v31, %v7237_v48 }
 0x7e0   :  { %5128 = vmatpush1.bf16.msra.mxu1 %v8001_v37 }
 0x7e1   :  { %5129 = vmatprep.subr.bf16.mxu1 %v8007_v22  ;;  %v4436_v22 = vrot.slane %v4107_v31, %v7125_v53 }
 0x7e4   :  { %5130 = vmatpush1.bf16.msra.mxu1 %v8005_v1 }
 0x7e5   :  { %5131 = vmatprep.subr.bf16.mxu1 %v8010_v52 }
 0x7e8   :  { %5132 = vmatpush1.bf16.msra.mxu1 %v8016_v6 }
 0x7e9   :  { %5133 = vmatprep.subr.bf16.mxu1 %v8023_v19 }
 0x7ec   :  { %5134 = vmatpush1.bf16.msra.mxu1 %v8021_v18 }
 0x7ed   :  { %5135 = vmatprep.subr.bf16.mxu1 %v8029_v4 }
 0x7f0   :  { %5136 = vmatpush1.bf16.msra.mxu1 %v8027_v26  ;;  %v4444_v26 = vrot.slane %v4107_v31, %v7234_v47 }
 0x7f1   :  { %6188 = vmatprep.subr.bf16.mxu1 %v8381_v61 }
 0x846   :  { %v4003_v63 = vpop.f32.mrb[32].mxu1 }
 0x847   :  { %v8200_v25 = vadd.f32 %v4003_v63, %v3920_v32  ;;  %v6166_v11 = vpop.f32.mrb[33].mxu1 }
 0x848   :  { %v4006_v24 = vpop.f32.mrb[34].mxu1 }
 0x849   :  { %v6167_v33 = vpop.f32.mrb[35].mxu1  ;;  %v4009_v43 = vsel %vm728_vm2, %v8200_v25, -inf }
 0x84a   :  { %4010 = vmax.xlane.f32.xlu1 %v4009_v43 }
 0x851   :  { %v4483_v44 = vpop.f32.mrb[36].mxu0 }
 0x852   :  { %v4485_v54 = vpop.f32.mrb[37].mxu0  ;;  %v4484_v37 = vadd.f32 %v4483_v44, %v4432_v36 }
 0x853   :  { %v4487_v56 = vpop.f32.mrb[38].mxu0  ;;  %v4486_v52 = vadd.f32 %v4485_v54, %v4436_v22  ;;  %v8427_v22 = vld [vmem:[#allocation22_spill] sm:$0xff] }
 0x854   :  { %v4488_v2 = vpop.f32.mrb[39].mxu0  ;;  %v5891_v1 = vmul.f32 -1.442695, %v4484_v37 }
 0x855   :  { %v5892_v38 = vmul.f32 -1.442695, %v4486_v52 }
 0x856   :  { %6729 = vpow2.f32 %v5891_v1 }
 0x857   :  { %6731 = vpow2.f32 %v5892_v38  ;;  %v4576_v38 = vld [vmem:[%s8338_s6] sm:$0x1] }
 0x860   :  { %v6730_v6 = vpop.eup %6729 }
 0x861   :  { %v4534_v18 = vadd.f32 1.0, %v6730_v6  ;;  %v6732_v19 = vpop.eup %6731 }
 0x862   :  { %v4540_v4 = vadd.f32 1.0, %v6732_v19 }
 0x863   :  { %6733 = vrcp.f32 %v4534_v18 }
 0x864   :  { %6735 = vrcp.f32 %v4540_v4 }
 0x86d   :  { %v6734_v15 = vpop.eup %6733 }
 0x86e   :  { %v6736_v16 = vpop.eup %6735 }
 0x86f   :  { %v4546_v32 = vsub.f32 1.0, %v6736_v16  ;;  %v4548_v11 = vmul.f32 %v6736_v16, %v8050_v51 }
 0x886   :  { %v4524_v40 = vpop.f32.mrb[36].mxu1 }
 0x887   :  { %v4526_v28 = vpop.f32.mrb[37].mxu1  ;;  %v4525_v57 = vadd.f32 %v4524_v40, %v4440_v20 }
 0x888   :  { %v4527_v3 = vadd.f32 %v4526_v28, %v4444_v26  ;;  %v4528_v9 = vpop.f32.mrb[38].mxu1 }
 0x889   :  { %v4529_v49 = vpop.f32.mrb[39].mxu1 }
 0x88a   :  { %v4543_v50 = vmul.f32 %v6734_v15, %v4527_v3 }
 0x88c   :  { %v4544_v10 = vadd.f32 %v4543_v50, %v4525_v57 }
 0x88e   :  { %6737 = vtanh.f32 %v4544_v10 }
 0x898   :  { %v6738_v63 = vpop.eup %6737 }
 0x899   :  { %v4547_v24 = vmul.f32 %v6738_v63, %v4546_v32  ;;  %v4763_v32 = vld [vmem:[%s8336_s4] sm:$0xf] }
 0x89a   :  { %v5088_v63 = vrot.slane %v4763_v32, %v7160_v17 }
 0x89b   :  { %v4549_v33 = vadd.f32 %v4548_v11, %v4547_v24 }
 0x89d   :  { %v4554_v43 = vmul.f32 0.0, %v4549_v33  ;;  %v5092_v33 = vrot.slane %v4763_v32, %v7125_v53 }
 0x89f   :  { %v8213_v44 = vadd.f32 %v4554_v43, %v8050_v51 }
 0x8a1   :  { %v4559_v54 = vpack.c.bf16 %v8213_v44, %v8213_v44  ;;  %4684 = vst.msk [vmem:[#allocation3 + $0x1] sm:$0x1] %vm7106_vm0, %v8213_v44 }
 0x8a3   :  { %6185 = vmatmul.mubr.bf16.vlgmr.msra.gmra.mrb[40].mxu0 %v4559_v54 }
 0x8a4   :  { %5147 = vmatpush1.bf16.msra.mxu0 %v8052_v60  ;;  %v8418_v60 = vld [vmem:[#allocation24_spill] sm:$0xff] }
 0x8a5   :  { %5148 = vmatprep.subr.bf16.mxu0 %v8059_v39  ;;  %v8419_v39 = vld [vmem:[#allocation25_spill] sm:$0xff] }
 0x8a8   :  { %5149 = vmatpush1.bf16.msra.mxu0 %v8062_v29  ;;  %v4685_v56 = vld [vmem:[#allocation3] sm:$0x3]  ;;  %v8420_v29 = vld [vmem:[#allocation26_spill] sm:$0xff] }
 0x8a9   :  { %5150 = vmatprep.subr.bf16.mxu0 %v8065_v0  ;;  %v4690_v51 = vrot.slane %v4685_v56, %v7160_v17  ;;  %v4694_v2 = vrot.slane %v4685_v56, %v7125_v53  ;;  %v8421_v0 = vld [vmem:[#allocation27_spill] sm:$0xff] }
 0x8ab   :  { %v4697_v31 = vpack.c.bf16 %v4690_v51, %v4690_v51  ;;  %v4698_v36 = vpack.c.bf16 %v4694_v2, %v4694_v2 }
 0x8ac   :  { %5151 = vmatpush1.bf16.msra.mxu0 %v8068_v5  ;;  %v8422_v5 = vld [vmem:[#allocation29_spill] sm:$0xff] }
 0x8ad   :  { %5137 = vmatprep.mubr.bf16.mxu1 %v4698_v36  ;;  %5178 = vmatprep.mubr.bf16.mxu0 %v4698_v36 }
 0x8ae   :  { %5138 = vmatmul.mubr.bf16.vlgmr.msra.gmra.mrb[40].mxu1 %v4697_v31  ;;  %5152 = vmatprep.subr.bf16.mxu0 %v8073_v58  ;;  %v8423_v58 = vld [vmem:[#allocation30_spill] sm:$0xff] }
 0x8af   :  { %6204 = vmatprep.mubr.msk.bf16.mxu1 %vm6943_vm1, %v8381_v61 }
 0x8b0   :  { %5153 = vmatpush1.bf16.msra.mxu0 %v8076_v8  ;;  %v8424_v8 = vld [vmem:[#allocation32_spill] sm:$0xff] }
 0x8b1   :  { %5154 = vmatprep.subr.bf16.mxu0 %v8078_v46  ;;  %v6661_v46 = vld [vmem:[#allocation11] sm:$0xff]  }
 0x8b2   :  { %6189 = vmatpush3.bf16.msra.mxu1 %v6661_v46 }
 0x8b3   :  { %6190 = vmatprep.subr.bf16.mxu1 %v8381_v61 }
 0x8b4   :  { %5155 = vmatpush1.bf16.msra.mxu0 %v8084_v62  ;;  %v6662_v62 = vld [vmem:[#allocation11 + $0x8] sm:$0xff]  }
 0x8b5   :  { %5156 = vmatprep.subr.bf16.mxu0 %v8087_v21  ;;  %v6663_v21 = vld [vmem:[#allocation11 + $0x10] sm:$0xff]  }
 0x8b6   :  { %6191 = vmatpush3.bf16.msra.mxu1 %v6662_v62 }
 0x8b7   :  { %6192 = vmatprep.subr.bf16.mxu1 %v8381_v61 }
 0x8b8   :  { %5157 = vmatpush1.bf16.msra.mxu0 %v8090_v55  ;;  %v6664_v55 = vld [vmem:[#allocation11 + $0x18] sm:$0xff]  }
 0x8b9   :  { %5158 = vmatprep.subr.bf16.mxu0 %v8093_v30  ;;  %v6667_v30 = vld [vmem:[#allocation11 + $0x30] sm:$0xff]  }
 0x8ba   :  { %6193 = vmatpush3.bf16.msra.mxu1 %v6663_v21 }
 0x8bb   :  { %6194 = vmatprep.subr.bf16.mxu1 %v8381_v61 }
 0x8bc   :  { %5159 = vmatpush1.bf16.msra.mxu0 %v8096_v23  ;;  %v6668_v23 = vld [vmem:[#allocation11 + $0x38] sm:$0xff]  }
 0x8bd   :  { %5160 = vmatprep.subr.bf16.mxu0 %v8099_v34  ;;  %v731_v34 = vpop.xlane.xlu0 %730 }
 0x8be   :  { %6195 = vmatpush3.bf16.msra.mxu1 %v6664_v55 }
 0x8bf   :  { %6196 = vmatprep.subr.bf16.mxu1 %v8381_v61 }
 0x8c0   :  { %5161 = vmatpush1.bf16.msra.mxu0 %v8102_v42  ;;  %v8425_v42 = vld [vmem:[#allocation20_spill] sm:$0xff] }
 0x8c1   :  { %5162 = vmatprep.subr.bf16.mxu0 %v8105_v45  ;;  %v8263_v45 = vsub.f32 %v8425_v42, %v731_v34 }
 0x8c4   :  { %5163 = vmatpush1.bf16.msra.mxu0 %v8417_v41  ;;  %v5096_v41 = vrot.slane %v4763_v32, %v7237_v48 }
 0x8c5   :  { %5164 = vmatprep.subr.bf16.mxu0 %v8418_v60 }
 0x8c8   :  { %5165 = vmatpush1.bf16.msra.mxu0 %v8419_v39 }
 0x8c9   :  { %5166 = vmatprep.subr.bf16.mxu0 %v8420_v29 }
 0x8cc   :  { %5167 = vmatpush1.bf16.msra.mxu0 %v8421_v0 }
 0x8cd   :  { %5168 = vmatprep.subr.bf16.mxu0 %v8422_v5 }
 0x8d0   :  { %5169 = vmatpush1.bf16.msra.mxu0 %v8423_v58 }
 0x8d1   :  { %5170 = vmatprep.subr.bf16.mxu0 %v8424_v8 }
 0x8d4   :  { %5171 = vmatpush1.bf16.msra.mxu0 %v8132_v12  ;;  %v2043_v12 = vpop.xlane.xlu1 %2042 }
 0x8d5   :  { %5172 = vmatprep.subr.bf16.mxu0 %v8135_v13  ;;  %v733_v13 = vmul.f32 1.442695, %v8263_v45 }
 0x8d7   :  { %6739 = vpow2.f32 %v733_v13 }
 0x8d8   :  { %5173 = vmatpush1.bf16.msra.mxu0 %v8138_v27  ;;  %v8426_v27 = vld [vmem:[#allocation21_spill] sm:$0xff] }
 0x8d9   :  { %5174 = vmatprep.subr.bf16.mxu0 %v8141_v7  ;;  %v8269_v7 = vsub.f32 %v8426_v27, %v2043_v12 }
 0x8db   :  { %v2045_v1 = vmul.f32 1.442695, %v8269_v7 }
 0x8dc   :  { %5175 = vmatpush1.bf16.msra.mxu0 %v8144_v14  ;;  %v6665_v14 = vld [vmem:[#allocation11 + $0x20] sm:$0xff]  }
 0x8dd   :  { %5176 = vmatprep.subr.bf16.mxu0 %v8147_v59  ;;  %6197 = vmatpush3.bf16.msra.mxu1 %v6665_v14  ;;  %v6666_v59 = vld [vmem:[#allocation11 + $0x28] sm:$0xff]   ;;  %6741 = vpow2.f32 %v2045_v1 }
 0x8de   :  { %6198 = vmatprep.subr.bf16.mxu1 %v8381_v61 }
 0x8e0   :  { %5177 = vmatpush1.bf16.msra.mxu0 %v8150_v35  ;;  %v8265_v35 = vpop.xlane.xlu0 %1386 }
 0x8e1   :  { %6199 = vmatpush3.bf16.msra.mxu1 %v6666_v59  ;;  %v6740_v40 = vpop.eup %6739 }
 0x8e2   :  { %6200 = vmatprep.subr.bf16.mxu1 %v8381_v61  ;;  %v735_v28 = vsel %vm728_vm2, %v6740_v40, 0.0 }
 0x8e3   :  { %5179 = vmatmul.mubr.bf16.vlgmr.msra.gmra.mrb[44].mxu0 %v4697_v31  ;;  %v5100_v31 = vrot.slane %v4763_v32, %v7234_v47 }
 0x8e4   :  { %v3355_v37 = vpop.xlane.xlu0 %3354 }
 0x8e5   :  { %6201 = vmatpush3.bf16.msra.mxu1 %v6667_v30  ;;  %v8273_v52 = vsub.f32 %v8427_v22, %v3355_v37 }
 0x8e6   :  { %6202 = vmatprep.subr.bf16.mxu1 %v8381_v61 }
 0x8e7   :  { %v3357_v61 = vmul.f32 1.442695, %v8273_v52  ;;  %v6742_v3 = vpop.eup %6741 }
 0x8e8   :  { %v2047_v15 = vsel %vm728_vm2, %v6742_v3, 0.0 }
 0x8e9   :  { %6203 = vmatpush3.bf16.msra.mxu1 %v6668_v23  ;;  %6743 = vpow2.f32 %v3357_v61 }
 0x8f3   :  { %v6744_v49 = vpop.eup %6743 }
 0x8f4   :  { %v3359_v16 = vsel %vm728_vm2, %v6744_v49, 0.0 }
 0x976   :  { %v4659_v6 = vpop.f32.mrb[40].mxu0 }
 0x977   :  { %v4660_v18 = vadd.f32 %v4659_v6, %v4576_v38  ;;  %v6186_v19 = vpop.f32.mrb[41].mxu0 }
 0x978   :  { %v4662_v26 = vpop.f32.mrb[42].mxu0 }
 0x979   :  { %v6187_v4 = vpop.f32.mrb[43].mxu0  ;;  %v4665_v20 = vsel %vm728_vm2, %v4660_v18, -inf }
 0x97a   :  { %4666 = vmax.xlane.f32.xlu0 %v4665_v20  ;;  %v8428_v20 = vld [vmem:[#allocation28_spill] sm:$0xff] }
 0x97b   :  { %v1388_v40 = vsub.f32 %v8428_v20, %v8265_v35 }
 0x97d   :  { %v1389_v3 = vmul.f32 1.442695, %v1388_v40 }
 0x97e   :  { %736 = vadd.xlane.f32.xlu0 %v735_v28  ;;  %v2699_v28 = vpop.xlane.xlu1 %2698 }
 0x981   :  { %v5139_v9 = vpop.f32.mrb[40].mxu1 }
 0x982   :  { %v5141_v57 = vpop.f32.mrb[41].mxu1  ;;  %2048 = vadd.xlane.f32.xlu0 %v2047_v15  ;;  %v5140_v11 = vadd.f32 %v5139_v9, %v5088_v63  ;;  %v8429_v9 = vld [vmem:[#allocation31_spill] sm:$0xff]  ;;  %v4011_v49 = vpop.xlane.xlu1 %4010 }
 0x983   :  { %v5143_v50 = vpop.f32.mrb[42].mxu1  ;;  %v5142_v43 = vadd.f32 %v5141_v57, %v5092_v33  ;;  %v2700_v15 = vsub.f32 %v8429_v9, %v2699_v28  ;;  %v4012_v57 = vsub.f32 %v8200_v25, %v4011_v49 }
 0x984   :  { %v5144_v10 = vpop.f32.mrb[43].mxu1  ;;  %v5966_v24 = vmul.f32 -1.442695, %v5140_v11  ;;  %v5232_v50 = vld [vmem:[%s8338_s6] sm:$0x1]  ;;  %s6944_s6 = smov [#allocation13]  }
 0x985   :  { %v5967_v54 = vmul.f32 -1.442695, %v5142_v43  ;;  %s5355_s27 = sshll.u32 %s6944_s6, 4  ;;  %s5356_s27 = int_to_ptr.vmem [resolvable:$true] %s5355_s27 }
 0x986   :  { %3360 = vadd.xlane.f32.xlu0 %v3359_v16  ;;  %6745 = vpow2.f32 %v5966_v24  ;;  %s6878_s1 = scalar_lea.vmem %s5356_s27, 16  ;;  %s6882_s28 = scalar_lea.vmem %s5356_s27, 32 }
 0x987   :  { %6747 = vpow2.f32 %v5967_v54  ;;  %p6879_p13 = scmp.ne.s32.totalorder %s5356_s27, %s6878_s1  ;;  %p6883_p0 = scmp.lt.s32.totalorder %s5356_s27, %s5356_s27 }
 0x988   :  { %p6884_p1 = scmp.lt.s32.totalorder %s6882_s28, %s6878_s1 }
 0x98a   :  { %p6885_p2 = por %p6884_p1, %p6883_p0 }
 0x98c   :  { %p6886_p3 = pnand %p6885_p2, %p6879_p13 }
 0x990   :  { %v6746_v56 = vpop.eup %6745 }
 0x991   :  { %v5190_v51 = vadd.f32 1.0, %v6746_v56  ;;  %v6748_v2 = vpop.eup %6747 }
 0x992   :  { %v5196_v36 = vadd.f32 1.0, %v6748_v2 }
 0x993   :  { %6749 = vrcp.f32 %v5190_v51 }
 0x994   :  { %6751 = vrcp.f32 %v5196_v36 }
 0x99d   :  { %v6750_v0 = vpop.eup %6749 }
 0x99e   :  { %v6752_v46 = vpop.eup %6751 }
 0x99f   :  { %v5202_v62 = vsub.f32 1.0, %v6752_v46  ;;  %v5204_v55 = vmul.f32 %v6752_v46, %v8213_v44 }
 0x9b6   :  { %v5180_v60 = vpop.f32.mrb[44].mxu0 }
 0x9b7   :  { %v5182_v39 = vpop.f32.mrb[45].mxu0  ;;  %v5181_v53 = vadd.f32 %v5180_v60, %v5096_v41 }
 0x9b8   :  { %v5183_v17 = vadd.f32 %v5182_v39, %v5100_v31  ;;  %v5184_v29 = vpop.f32.mrb[46].mxu0 }
 0x9b9   :  { %v5185_v5 = vpop.f32.mrb[47].mxu0 }
 0x9ba   :  { %v5199_v58 = vmul.f32 %v6750_v0, %v5183_v17 }
 0x9bc   :  { %v5200_v8 = vadd.f32 %v5199_v58, %v5181_v53 }
 0x9be   :  { %6753 = vtanh.f32 %v5200_v8 }
 0x9c8   :  { %v6754_v21 = vpop.eup %6753 }
 0x9c9   :  { %v5203_v47 = vmul.f32 %v6754_v21, %v5202_v62 }
 0x9cb   :  { %v5205_v14 = vadd.f32 %v5204_v55, %v5203_v47 }
 0x9cd   :  { %v5210_v59 = vmul.f32 0.0, %v5205_v14 }
 0x9cf   :  { %v5214_v48 = vadd.f32 %v5210_v59, %v8213_v44 }
 0x9d1   :  { %v5215_v30 = vpack.c.bf16 %v5214_v48, %v5214_v48  ;;  %5334 = vst [vmem:[#allocation2] sm:$0x1] %v5214_v48  ;;  %5338 = vst [vmem:[#allocation13] sm:$0x1] %v5214_v48 }
 0x9d3   :  { %6205 = vmatmul.mubr.bf16.vlgmr.msra.gmra.mrb[44].mxu1 %v5215_v30 }
 0xa07   :  { %v4667_v23 = vpop.xlane.xlu0 %4666 }
 0xa08   :  { %v4668_v34 = vsub.f32 %v4660_v18, %v4667_v23 }
 0xa0a   :  { %v4669_v42 = vmul.f32 1.442695, %v4668_v34 }
 0xa0b   :  { %v737_v12 = vpop.xlane.xlu0 %736 }
 0xa0c   :  { %6755 = vpow2.f32 %v4669_v42 }
 0xa0d   :  { %6757 = vlog2.f32 %v737_v12 }
 0xa0f   :  { %v2049_v13 = vpop.xlane.xlu0 %2048 }
 0xa10   :  { %6759 = vlog2.f32 %v2049_v13 }
 0xa13   :  { %v3361_v27 = vpop.xlane.xlu0 %3360 }
 0xa14   :  { %6761 = vlog2.f32 %v3361_v27 }
 0xa15   :  { %6763 = vpow2.f32 %v1389_v3 }
 0xa16   :  { %v6756_v37 = vpop.eup %6755 }
 0xa17   :  { %v6758_v1 = vpop.eup %6757  ;;  %v4671_v22 = vsel %vm728_vm2, %v6756_v37, 0.0 }
 0xa18   :  { %v739_v61 = vmul.f32 0.6931472, %v6758_v1  ;;  %4672 = vadd.xlane.f32.xlu0 %v4671_v22 }
 0xa1a   :  { %v6760_v44 = vpop.eup %6759  ;;  %v740_v38 = vsub.f32 %v8263_v45, %v739_v61  ;;  %v2701_v45 = vmul.f32 1.442695, %v2700_v15 }
 0xa1b   :  { %v2051_v6 = vmul.f32 0.6931472, %v6760_v44 }
 0xa1c   :  { %741 = vst [vmem:[#allocation12] sm:$0x1] %v740_v38  ;;  %6765 = vpow2.f32 %v2701_v45 }
 0xa1d   :  { %v2052_v18 = vsub.f32 %v8269_v7, %v2051_v6  ;;  %v4013_v7 = vmul.f32 1.442695, %v4012_v57 }
 0xa1e   :  { %v6762_v19 = vpop.eup %6761 }
 0xa1f   :  { %2053 = vst [vmem:[#allocation12 + $0x2] sm:$0x1] %v2052_v18  ;;  %v3363_v26 = vmul.f32 0.6931472, %v6762_v19  ;;  %v6764_v24 = vpop.eup %6763 }
 0xa20   :  { %v1391_v25 = vsel %vm728_vm2, %v6764_v24, 0.0 }
 0xa21   :  { %v3364_v4 = vsub.f32 %v8273_v52, %v3363_v26 }
 0xa23   :  { %3365 = vst [vmem:[#allocation12 + $0x4] sm:$0x1] %v3364_v4 }
 0xa26   :  { %v6766_v33 = vpop.eup %6765 }
 0xa27   :  { %v2703_v56 = vsel %vm728_vm2, %v6766_v33, 0.0 }
 0xaa5   :  { %v4673_v52 = vpop.xlane.xlu0 %4672 }
 0xaa6   :  { %6767 = vlog2.f32 %v4673_v52  ;;  %v5315_v10 = vpop.f32.mrb[44].mxu1 }
 0xaa7   :  { %v5316_v16 = vadd.f32 %v5315_v10, %v5232_v50  ;;  %v6206_v35 = vpop.f32.mrb[45].mxu1  ;;  %6769 = vpow2.f32 %v4013_v7 }
 0xaa8   :  { %v5318_v32 = vpop.f32.mrb[46].mxu1 }
 0xaa9   :  { %v6207_v63 = vpop.f32.mrb[47].mxu1  ;;  %v5321_v11 = vsel %vm728_vm2, %v5316_v16, -inf }
 0xaaa   :  { %5322 = vmax.xlane.f32.xlu1 %v5321_v11 }
 0xaae   :  { %1392 = vadd.xlane.f32.xlu1 %v1391_v25 }
 0xab0   :  { %v6768_v43 = vpop.eup %6767 }
 0xab1   :  { %v4675_v54 = vmul.f32 0.6931472, %v6768_v43  ;;  %v6770_v51 = vpop.eup %6769 }
 0xab2   :  { %2704 = vadd.xlane.f32.xlu1 %v2703_v56  ;;  %v4015_v31 = vsel %vm728_vm2, %v6770_v51, 0.0 }
 0xab3   :  { %v4676_v2 = vsub.f32 %v4668_v34, %v4675_v54 }
 0xab5   :  { %4677 = vst [vmem:[#allocation12 + $0x6] sm:$0x1] %v4676_v2 }
 0xab6   :  { %4016 = vadd.xlane.f32.xlu1 %v4015_v31 }
 0xb37   :  { %v5323_v36 = vpop.xlane.xlu1 %5322 }
 0xb38   :  { %v5324_v41 = vsub.f32 %v5316_v16, %v5323_v36 }
 0xb3a   :  { %v5325_v60 = vmul.f32 1.442695, %v5324_v41 }
 0xb3b   :  { %v1393_v39 = vpop.xlane.xlu1 %1392 }
 0xb3c   :  { %6771 = vpow2.f32 %v5325_v60 }
 0xb3d   :  { %6773 = vlog2.f32 %v1393_v39 }
 0xb3f   :  { %v2705_v17 = vpop.xlane.xlu1 %2704 }
 0xb40   :  { %6775 = vlog2.f32 %v2705_v17 }
 0xb43   :  { %v4017_v29 = vpop.xlane.xlu1 %4016 }
 0xb44   :  { %6777 = vlog2.f32 %v4017_v29 }
 0xb46   :  { %v6772_v0 = vpop.eup %6771 }
 0xb47   :  { %v6774_v5 = vpop.eup %6773  ;;  %v5327_v53 = vsel %vm728_vm2, %v6772_v0, 0.0 }
 0xb48   :  { %v1395_v58 = vmul.f32 0.6931472, %v6774_v5  ;;  %5328 = vadd.xlane.f32.xlu1 %v5327_v53 }
 0xb4a   :  { %v6776_v8 = vpop.eup %6775  ;;  %v1396_v46 = vsub.f32 %v1388_v40, %v1395_v58 }
 0xb4b   :  { %v2707_v62 = vmul.f32 0.6931472, %v6776_v8 }
 0xb4c   :  { %1397 = vst [vmem:[#allocation12 + $0x1] sm:$0x1] %v1396_v46 }
 0xb4d   :  { %v2708_v21 = vsub.f32 %v2700_v15, %v2707_v62 }
 0xb4e   :  { %v6778_v55 = vpop.eup %6777 }
 0xb4f   :  { %2709 = vst [vmem:[#allocation12 + $0x3] sm:$0x1] %v2708_v21  ;;  %v4019_v47 = vmul.f32 0.6931472, %v6778_v55 }
 0xb51   :  { %v4020_v14 = vsub.f32 %v4012_v57, %v4019_v47 }
 0xb53   :  { %4021 = vst [vmem:[#allocation12 + $0x5] sm:$0x1] %v4020_v14 }
 0xb54   :  { %6889 = shalt.err (!%p6886_p3)
}
 0xb55   :  { %s6890_s5 = scalar_lea.hbm %s8340_s8, 16 }
 0xb56   :  { %p6891_p4 = scmp.ne.s32.totalorder %s8340_s8, %s6890_s5  ;;  %p6894_p5 = scmp.lt.u32.totalorder %s6890_s5, %s8340_s8 }
 0xb58   :  { %p6896_p6 = pnand %p6894_p5, %p6891_p4 }
 0xb5a   :  { %6899 = shalt.err (!%p6896_p6)
}
 0xb5b   :  { %5358 = dma.vmem_to_hbm [thread:$0]  %s5356_s27, 16, %s8340_s8, [#allocation14]  }
 0xb5c   :  { %s6945_s14 = smov [#allocation12]  }
 0xb5d   :  { %s5345_s15 = sshll.u32 %s6945_s14, 4  ;;  %s5346_s15 = int_to_ptr.vmem [resolvable:$true] %s5345_s15 }
 0xb5e   :  { %s6900_s3 = scalar_lea.vmem %s5346_s15, 128  ;;  %p6905_p8 = scmp.lt.s32.totalorder %s5346_s15, %s5346_s15 }
 0xb5f   :  { %p6901_p7 = scmp.ne.s32.totalorder %s5346_s15, %s6900_s3  ;;  %p6906_p9 = scmp.lt.s32.totalorder %s6900_s3, %s6900_s3 }
 0xb61   :  { %p6907_p10 = por %p6906_p9, %p6905_p8 }
 0xb63   :  { %p6908_p11 = pnand %p6907_p10, %p6901_p7 }
 0xbd5   :  { %v5329_v59 = vpop.xlane.xlu1 %5328 }
 0xbd6   :  { %6779 = vlog2.f32 %v5329_v59 }
 0xbe0   :  { %v6780_v48 = vpop.eup %6779 }
 0xbe1   :  { %v5331_v30 = vmul.f32 0.6931472, %v6780_v48 }
 0xbe3   :  { %v5332_v23 = vsub.f32 %v5324_v41, %v5331_v30 }
 0xbe5   :  { %5333 = vst [vmem:[#allocation12 + $0x7] sm:$0x1] %v5332_v23 }
 0xbe6   :  { %6911 = shalt.err (!%p6908_p11)
}
 0xbe7   :  { %s6912_s8 = scalar_lea.hbm %s8339_s7, 128 }
 0xbe8   :  { %p6913_p12 = scmp.ne.s32.totalorder %s8339_s7, %s6912_s8  ;;  %p6916_p13 = scmp.lt.u32.totalorder %s6912_s8, %s8339_s7 }
 0xbea   :  { %p6918_p0 = pnand %p6916_p13, %p6913_p12 }
 0xbec   :  { %6921 = shalt.err (!%p6918_p0)
}
 0xbed   :  { %5348 = dma.vmem_to_hbm [thread:$0]  %s5346_s15, 128, %s8339_s7, [#allocation8]  }
 0xbee   :  { %6928 = dma.done.wait [#allocation8], 128  }
 0xbef   :  { %6929 = vsyncadd [#allocation8], 4294967168 }
 0xbf0   :  { %6930 = dma.done.wait [#allocation14], 16  }
 0xbf1   :  { %6931 = vsyncadd [#allocation14], 4294967280 }
 0xbf2   :  { %5365 = vsyncpa [#allocation7], 1 }
 0xbf3   :  { %5366 = vsyncpa [#allocation10], 1 }
 0xbf4   :  { %5367 = vsyncpa [#allocation8], 1 }
 0xbf5   :  { %5368 = vsyncpa [#allocation14], 1 }

</bundles_post_ra>
